<compile_context>
chip_gen: v7x
topology: tpu7x:2x2x1
jax: 0.10.0
libtpu: 0.0.40
codegen_flags: <defaults>
</compile_context>

<pallas_src>
import jax
import jax.numpy as jnp
from jax import lax
from jax.experimental import pallas as pl
from jax.experimental.pallas import tpu as pltpu

# ---------------- small deterministic config ----------------
VOCAB = 16     # source / target vocab size
D = 32         # word_vec_size
H = 32         # rnn_size == decoder.hidden_size
B = 2          # batch
S_LEN = 8      # source length
T_LEN = 7      # full target length; forward uses tgt = input[1][:-1] -> 6 steps


# ---------------- fused encoder + decoder kernel ----------------
def _nmt_fused_kernel(src_ids_ref, tgt_ids_ref,
                      enc_gate_tbl_ref, dec_gate_tbl_ref,
                      enc_whh_ref, enc_b_ref,
                      dec_w_ref, dec_b_ref,
                      attn_w_in_t_ref, attn_w_out_ref,
                      out_ref,
                      ctx_s):
    n_src = src_ids_ref.shape[0]
    n_tgt = out_ref.shape[0]

    def gate_rows(tbl_ref, ids_ref, t):
        # ids are SMEM scalars; gate tables are VMEM-resident (VOCAB x 4H,
        # 128 lanes -> lane-dense row slices).
        rows = [tbl_ref[pl.ds(ids_ref[t, b], 1), :] for b in range(B)]
        return jnp.concatenate(rows, axis=0)                       # (B, 4H)

    def lstm_cell(gates, c_prev):
        i = jax.nn.sigmoid(gates[:, 0 * H:1 * H])
        f = jax.nn.sigmoid(gates[:, 1 * H:2 * H])
        g = jnp.tanh(gates[:, 2 * H:3 * H])
        o = jax.nn.sigmoid(gates[:, 3 * H:4 * H])
        c = f * c_prev + i * g
        h = o * jnp.tanh(c)
        return h, c

    # ------------------ encoder ------------------
    enc_whh = enc_whh_ref[...]                                     # (H, 4H)
    enc_b = enc_b_ref[...]                                         # (1, 4H)

    def enc_step(t, carry):
        h, c = carry
        gates = (gate_rows(enc_gate_tbl_ref, src_ids_ref, t)       # emb @ W_ih (pre-folded)
                 + jnp.dot(h, enc_whh, preferred_element_type=jnp.float32)
                 + enc_b)
        h, c = lstm_cell(gates, c)
        # write context[t] directly in (B, S, H) layout, VMEM-resident
        ctx_s[:, pl.ds(t, 1), :] = h.reshape(B, 1, H)
        return h, c

    zeros_bh = jnp.zeros((B, H), jnp.float32)
    enc_h, enc_c = lax.fori_loop(0, n_src, enc_step, (zeros_bh, zeros_bh),
                                 unroll=True)

    ctx_bsh = ctx_s[...]                                           # (B, S, H)

    # Hoist the attention query projection onto the context (Luong "general"):
    #   score(h, ctx) = (h @ W_in) . ctx  ==  h . (ctx @ W_in^T)
    # One MXU push here instead of one per decoder step.
    w_in_t = attn_w_in_t_ref[...]                                  # (H, H) = W_in^T
    ctx_proj = jnp.dot(ctx_bsh.reshape(B * n_src, H), w_in_t,
                       preferred_element_type=jnp.float32).reshape(B, n_src, H)

    # ------------------ decoder (input feed + GlobalAttention) ------------------
    dec_w = dec_w_ref[...]                                         # (2H, 4H) = [W_f ; W_hh]
    dec_b = dec_b_ref[...]                                         # (1, 4H)
    w_out = attn_w_out_ref[...]                                    # (2H, H)  = [W_c ; W_h]

    def dec_step(t, carry):
        h, c, feed = carry
        gates = (gate_rows(dec_gate_tbl_ref, tgt_ids_ref, t)       # emb @ W_e (pre-folded)
                 + jnp.dot(jnp.concatenate([feed, h], axis=-1), dec_w,
                           preferred_element_type=jnp.float32)
                 + dec_b)
        h, c = lstm_cell(gates, c)

        # GlobalAttention ("general"): MXU contractions for score + mix.
        scores = jnp.einsum("bqh,bsh->bqs", h[:, None, :], ctx_proj,
                            preferred_element_type=jnp.float32)[:, 0, :]  # (B, S)
        scores = scores - jnp.max(scores, axis=-1, keepdims=True)
        e = jnp.exp(scores)
        # approx=False keeps the 1e-4 match vs. the exact-divide reference.
        attn = e * pl.reciprocal(jnp.sum(e, axis=-1, keepdims=True),
                                 approx=False)                            # (B, S)
        weighted = jnp.einsum("bqs,bsh->bqh", attn[:, None, :], ctx_bsh,
                              preferred_element_type=jnp.float32)[:, 0, :]  # (B, H)
        out = jnp.tanh(jnp.dot(jnp.concatenate([weighted, h], axis=-1), w_out,
                               preferred_element_type=jnp.float32))       # (B, H)
        # dropout p=0.0 -> identity
        out_ref[t] = out
        return h, c, out            # `out` is next step's input feed

    lax.fori_loop(0, n_tgt, dec_step, (enc_h, enc_c, zeros_bh), unroll=True)


# ---------------- glue: NMTModel.forward ----------------
def nmt_forward(src, tgt_full, p):
    tgt = tgt_full[:-1]                            # tgt = input[1][:-1]
    # TODO(synk): pack/unpack of padded variable-length sequences is skipped;
    # all sequences are treated as full length (the no-lengths code path).
    t_steps = tgt.shape[0]

    # Fold the embedding matmuls into the tables and fuse recurrent / output
    # weights once, so each decoder step is one MXU push + one row gather.
    enc_gate_tbl = jnp.dot(p["enc_embed"], p["enc_w_ih"])                    # (VOCAB, 4H)
    dec_gate_tbl = jnp.dot(p["dec_embed"], p["dec_w_ih_e"])                  # (VOCAB, 4H)
    dec_w = jnp.concatenate([p["dec_w_ih_f"], p["dec_w_hh"]], axis=0)        # (2H, 4H)
    w_out = jnp.concatenate([p["attn_w_out_c"], p["attn_w_out_h"]], axis=0)  # (2H, H)
    w_in_t = p["attn_w_in"].T                                                # (H, H)

    smem = pl.BlockSpec(memory_space=pltpu.MemorySpace.SMEM)
    vmem = pl.BlockSpec(memory_space=pltpu.MemorySpace.VMEM)

    return pl.pallas_call(
        _nmt_fused_kernel,
        out_shape=jax.ShapeDtypeStruct((t_steps, B, H), jnp.float32),
        in_specs=[smem, smem,                 # src / tgt token ids
                  vmem, vmem,                 # pre-folded embedding->gate tables
                  vmem, vmem,                 # encoder W_hh, b
                  vmem, vmem,                 # decoder fused [W_f;W_hh], b
                  vmem, vmem],                # attention linear_in^T, fused linear_out
        out_specs=vmem,
        scratch_shapes=[pltpu.VMEM((B, S_LEN, H), jnp.float32)],   # context
    )(src.astype(jnp.int32), tgt.astype(jnp.int32),
      enc_gate_tbl, dec_gate_tbl,
      p["enc_w_hh"], p["enc_b"], dec_w, p["dec_b"],
      w_in_t, w_out)


# ---------------- deterministic parameter init ----------------
def init_params(key):
    ks = jax.random.split(key, 12)

    def w(k, shape, scale=0.1):
        return (scale * jax.random.normal(k, shape)).astype(jnp.float32)

    enc_embed = w(ks[0], (VOCAB, D)).at[0].set(0.0)   # padding_idx = PAD = 0
    dec_embed = w(ks[1], (VOCAB, D)).at[0].set(0.0)
    return dict(
        enc_embed=enc_embed,
        enc_w_ih=w(ks[2], (D, 4 * H)),
        enc_w_hh=w(ks[3], (H, 4 * H)),
        enc_b=w(ks[4], (1, 4 * H)),        # b_ih + b_hh folded together
        dec_embed=dec_embed,
        dec_w_ih_e=w(ks[5], (D, 4 * H)),   # W_ih split: embedding half
        dec_w_ih_f=w(ks[6], (H, 4 * H)),   # W_ih split: input-feed half
        dec_w_hh=w(ks[7], (H, 4 * H)),
        dec_b=w(ks[8], (1, 4 * H)),
        attn_w_in=w(ks[9], (H, H)),
        attn_w_out_c=w(ks[10], (H, H)),    # linear_out split: weighted-context half
        attn_w_out_h=w(ks[11], (H, H)),    # linear_out split: decoder-state half
    )


# ---------------- pure-JAX reference (same math, plain loops) ----------------
def reference_forward(src, tgt_full, p):
    tgt = tgt_full[:-1]
    emb = p["enc_embed"][src]
    h = jnp.zeros((B, H), jnp.float32)
    c = jnp.zeros((B, H), jnp.float32)
    ctx = []
    for t in range(src.shape[0]):
        gates = emb[t] @ p["enc_w_ih"] + h @ p["enc_w_hh"] + p["enc_b"]
        i = jax.nn.sigmoid(gates[:, :H]); f = jax.nn.sigmoid(gates[:, H:2 * H])
        g = jnp.tanh(gates[:, 2 * H:3 * H]); o = jax.nn.sigmoid(gates[:, 3 * H:])
        c = f * c + i * g
        h = o * jnp.tanh(c)
        ctx.append(h)
    ctx_b = jnp.stack(ctx).transpose(1, 0, 2)
    demb = p["dec_embed"][tgt]
    feed = jnp.zeros((B, H), jnp.float32)
    outs = []
    for t in range(tgt.shape[0]):
        gates = (demb[t] @ p["dec_w_ih_e"] + feed @ p["dec_w_ih_f"]
                 + h @ p["dec_w_hh"] + p["dec_b"])
        i = jax.nn.sigmoid(gates[:, :H]); f = jax.nn.sigmoid(gates[:, H:2 * H])
        g = jnp.tanh(gates[:, 2 * H:3 * H]); o = jax.nn.sigmoid(gates[:, 3 * H:])
        c = f * c + i * g
        h = o * jnp.tanh(c)
        target = h @ p["attn_w_in"]
        attn = jax.nn.softmax(jnp.einsum("bsh,bh->bs", ctx_b, target), axis=-1)
        weighted = jnp.einsum("bs,bsh->bh", attn, ctx_b)
        out = jnp.tanh(weighted @ p["attn_w_out_c"] + h @ p["attn_w_out_h"])
        feed = out
        outs.append(out)
    return jnp.stack(outs)


if __name__ == "__main__":
    key = jax.random.PRNGKey(0)
    pk, sk, tk = jax.random.split(key, 3)
    params = init_params(pk)
    src = jax.random.randint(sk, (S_LEN, B), 1, VOCAB, dtype=jnp.int32)       # (srcLen, batch)
    tgt_full = jax.random.randint(tk, (T_LEN, B), 1, VOCAB, dtype=jnp.int32)  # (tgtLen, batch)

    out = jax.jit(nmt_forward)(src, tgt_full, params)
    out = jax.block_until_ready(out)

    assert out.shape == (T_LEN - 1, B, H)
    ref = reference_forward(src, tgt_full, params)
    assert jnp.allclose(out, ref, atol=1e-4, rtol=1e-4), "mismatch vs reference"
    print("KERNEL_OK")
</pallas_src>

<mosaic_0001>
module attributes {stable_mosaic.version = 11 : i64} {
  func.func @_nmt_fused_kernel(%arg0: memref<8x2xi32, #tpu.memory_space<smem>>, %arg1: memref<6x2xi32, #tpu.memory_space<smem>>, %arg2: memref<16x128xf32, #tpu.memory_space<vmem>>, %arg3: memref<16x128xf32, #tpu.memory_space<vmem>>, %arg4: memref<32x128xf32, #tpu.memory_space<vmem>>, %arg5: memref<1x128xf32, #tpu.memory_space<vmem>>, %arg6: memref<64x128xf32, #tpu.memory_space<vmem>>, %arg7: memref<1x128xf32, #tpu.memory_space<vmem>>, %arg8: memref<32x32xf32, #tpu.memory_space<vmem>>, %arg9: memref<64x32xf32, #tpu.memory_space<vmem>>, %arg10: memref<6x2x32xf32, #tpu.memory_space<vmem>>, %arg11: memref<2x8x32xf32, #tpu.memory_space<vmem>>) attributes {dimension_semantics = [], scalar_prefetch = 0 : i64, scratch_operands = 1 : i64, tpu.core_type = #tpu.core_type<tc>} {
    %c0 = arith.constant 0 : index
    %c0_0 = arith.constant 0 : index
    %0 = vector.load %arg4[%c0, %c0_0] : memref<32x128xf32, #tpu.memory_space<vmem>>, vector<32x128xf32>
    %c0_1 = arith.constant 0 : index
    %c0_2 = arith.constant 0 : index
    %1 = vector.load %arg5[%c0_1, %c0_2] : memref<1x128xf32, #tpu.memory_space<vmem>>, vector<1x128xf32>
    %cst = arith.constant 0.000000e+00 : f32
    %2 = vector.broadcast %cst : f32 to vector<2x32xf32>
    %c0_i32 = arith.constant 0 : i32
    %3 = arith.index_cast %c0_i32 : i32 to index
    %c0_3 = arith.constant 0 : index
    %4 = memref.load %arg0[%3, %c0_3] : memref<8x2xi32, #tpu.memory_space<smem>>
    %5 = arith.index_cast %4 : i32 to index
    %c0_4 = arith.constant 0 : index
    %6 = vector.load %arg2[%5, %c0_4] : memref<16x128xf32, #tpu.memory_space<vmem>>, vector<1x128xf32>
    %7 = arith.index_cast %c0_i32 : i32 to index
    %c1 = arith.constant 1 : index
    %8 = memref.load %arg0[%7, %c1] : memref<8x2xi32, #tpu.memory_space<smem>>
    %9 = arith.index_cast %8 : i32 to index
    %c0_5 = arith.constant 0 : index
    %10 = vector.load %arg2[%9, %c0_5] : memref<16x128xf32, #tpu.memory_space<vmem>>, vector<1x128xf32>
    %11 = tpu.concatenate %6, %10 in 0 : vector<1x128xf32>, vector<1x128xf32> -> vector<2x128xf32>
    %cst_6 = arith.constant dense<0.000000e+00> : vector<2x128xf32>
    %12 = tpu.matmul %2, %0, %cst_6 {dimension_numbers = #tpu.dot_dimension_numbers<[1], [0], [0], [1], [0, 0, 1, 1], [], []>} : vector<2x32xf32>, vector<32x128xf32>, vector<2x128xf32> -> vector<2x128xf32>
    %13 = arith.addf %11, %12 : vector<2x128xf32>
    %14 = vector.broadcast %1 : vector<1x128xf32> to vector<2x128xf32>
    %15 = arith.addf %13, %14 : vector<2x128xf32>
    %16 = vector.extract_strided_slice %15 {offsets = [0, 0], sizes = [2, 32], strides = [1, 1]} : vector<2x128xf32> to vector<2x32xf32>
    %17 = arith.negf %16 : vector<2x32xf32>
    %18 = math.exp %17 : vector<2x32xf32>
    %cst_7 = arith.constant 1.000000e+00 : f32
    %19 = vector.broadcast %cst_7 : f32 to vector<2x32xf32>
    %20 = arith.addf %19, %18 : vector<2x32xf32>
    %21 = arith.divf %19, %20 : vector<2x32xf32>
    %22 = vector.extract_strided_slice %15 {offsets = [0, 32], sizes = [2, 32], strides = [1, 1]} : vector<2x128xf32> to vector<2x32xf32>
    %23 = arith.negf %22 : vector<2x32xf32>
    %24 = math.exp %23 : vector<2x32xf32>
    %cst_8 = arith.constant 1.000000e+00 : f32
    %25 = vector.broadcast %cst_8 : f32 to vector<2x32xf32>
    %26 = arith.addf %25, %24 : vector<2x32xf32>
    %27 = arith.divf %25, %26 : vector<2x32xf32>
    %28 = vector.extract_strided_slice %15 {offsets = [0, 64], sizes = [2, 32], strides = [1, 1]} : vector<2x128xf32> to vector<2x32xf32>
    %29 = math.tanh %28 : vector<2x32xf32>
    %30 = vector.extract_strided_slice %15 {offsets = [0, 96], sizes = [2, 32], strides = [1, 1]} : vector<2x128xf32> to vector<2x32xf32>
    %31 = arith.negf %30 : vector<2x32xf32>
    %32 = math.exp %31 : vector<2x32xf32>
    %cst_9 = arith.constant 1.000000e+00 : f32
    %33 = vector.broadcast %cst_9 : f32 to vector<2x32xf32>
    %34 = arith.addf %33, %32 : vector<2x32xf32>
    %35 = arith.divf %33, %34 : vector<2x32xf32>
    %36 = arith.mulf %27, %2 : vector<2x32xf32>
    %37 = arith.mulf %21, %29 : vector<2x32xf32>
    %38 = arith.addf %36, %37 : vector<2x32xf32>
    %39 = math.tanh %38 : vector<2x32xf32>
    %40 = arith.mulf %35, %39 : vector<2x32xf32>
    %41 = vector.shape_cast %40 : vector<2x32xf32> to vector<2x1x32xf32>
    %c0_10 = arith.constant 0 : index
    %42 = arith.index_cast %c0_i32 : i32 to index
    %c0_11 = arith.constant 0 : index
    %43 = vector.load %arg11[%c0_10, %42, %c0_11] : memref<2x8x32xf32, #tpu.memory_space<vmem>>, vector<2x1x32xf32>
    tpu.vector_store %arg11[%c0_10, %42, %c0_11], %41 {strides = array<i32>} : memref<2x8x32xf32, #tpu.memory_space<vmem>>, vector<2x1x32xf32>,
    %c1_i32 = arith.constant 1 : i32
    %44 = arith.index_cast %c1_i32 : i32 to index
    %c0_12 = arith.constant 0 : index
    %45 = memref.load %arg0[%44, %c0_12] : memref<8x2xi32, #tpu.memory_space<smem>>
    %46 = arith.index_cast %45 : i32 to index
    %c0_13 = arith.constant 0 : index
    %47 = vector.load %arg2[%46, %c0_13] : memref<16x128xf32, #tpu.memory_space<vmem>>, vector<1x128xf32>
    %48 = arith.index_cast %c1_i32 : i32 to index
    %c1_14 = arith.constant 1 : index
    %49 = memref.load %arg0[%48, %c1_14] : memref<8x2xi32, #tpu.memory_space<smem>>
    %50 = arith.index_cast %49 : i32 to index
    %c0_15 = arith.constant 0 : index
    %51 = vector.load %arg2[%50, %c0_15] : memref<16x128xf32, #tpu.memory_space<vmem>>, vector<1x128xf32>
    %52 = tpu.concatenate %47, %51 in 0 : vector<1x128xf32>, vector<1x128xf32> -> vector<2x128xf32>
    %cst_16 = arith.constant dense<0.000000e+00> : vector<2x128xf32>
    %53 = tpu.matmul %40, %0, %cst_16 {dimension_numbers = #tpu.dot_dimension_numbers<[1], [0], [0], [1], [0, 0, 1, 1], [], []>} : vector<2x32xf32>, vector<32x128xf32>, vector<2x128xf32> -> vector<2x128xf32>
    %54 = arith.addf %52, %53 : vector<2x128xf32>
    %55 = vector.broadcast %1 : vector<1x128xf32> to vector<2x128xf32>
    %56 = arith.addf %54, %55 : vector<2x128xf32>
    %57 = vector.extract_strided_slice %56 {offsets = [0, 0], sizes = [2, 32], strides = [1, 1]} : vector<2x128xf32> to vector<2x32xf32>
    %58 = arith.negf %57 : vector<2x32xf32>
    %59 = math.exp %58 : vector<2x32xf32>
    %cst_17 = arith.constant 1.000000e+00 : f32
    %60 = vector.broadcast %cst_17 : f32 to vector<2x32xf32>
    %61 = arith.addf %60, %59 : vector<2x32xf32>
    %62 = arith.divf %60, %61 : vector<2x32xf32>
    %63 = vector.extract_strided_slice %56 {offsets = [0, 32], sizes = [2, 32], strides = [1, 1]} : vector<2x128xf32> to vector<2x32xf32>
    %64 = arith.negf %63 : vector<2x32xf32>
    %65 = math.exp %64 : vector<2x32xf32>
    %cst_18 = arith.constant 1.000000e+00 : f32
    %66 = vector.broadcast %cst_18 : f32 to vector<2x32xf32>
    %67 = arith.addf %66, %65 : vector<2x32xf32>
    %68 = arith.divf %66, %67 : vector<2x32xf32>
    %69 = vector.extract_strided_slice %56 {offsets = [0, 64], sizes = [2, 32], strides = [1, 1]} : vector<2x128xf32> to vector<2x32xf32>
    %70 = math.tanh %69 : vector<2x32xf32>
    %71 = vector.extract_strided_slice %56 {offsets = [0, 96], sizes = [2, 32], strides = [1, 1]} : vector<2x128xf32> to vector<2x32xf32>
    %72 = arith.negf %71 : vector<2x32xf32>
    %73 = math.exp %72 : vector<2x32xf32>
    %cst_19 = arith.constant 1.000000e+00 : f32
    %74 = vector.broadcast %cst_19 : f32 to vector<2x32xf32>
    %75 = arith.addf %74, %73 : vector<2x32xf32>
    %76 = arith.divf %74, %75 : vector<2x32xf32>
    %77 = arith.mulf %68, %38 : vector<2x32xf32>
    %78 = arith.mulf %62, %70 : vector<2x32xf32>
    %79 = arith.addf %77, %78 : vector<2x32xf32>
    %80 = math.tanh %79 : vector<2x32xf32>
    %81 = arith.mulf %76, %80 : vector<2x32xf32>
    %82 = vector.shape_cast %81 : vector<2x32xf32> to vector<2x1x32xf32>
    %c0_20 = arith.constant 0 : index
    %83 = arith.index_cast %c1_i32 : i32 to index
    %c0_21 = arith.constant 0 : index
    %84 = vector.load %arg11[%c0_20, %83, %c0_21] : memref<2x8x32xf32, #tpu.memory_space<vmem>>, vector<2x1x32xf32>
    tpu.vector_store %arg11[%c0_20, %83, %c0_21], %82 {strides = array<i32>} : memref<2x8x32xf32, #tpu.memory_space<vmem>>, vector<2x1x32xf32>,
    %c2_i32 = arith.constant 2 : i32
    %85 = arith.index_cast %c2_i32 : i32 to index
    %c0_22 = arith.constant 0 : index
    %86 = memref.load %arg0[%85, %c0_22] : memref<8x2xi32, #tpu.memory_space<smem>>
    %87 = arith.index_cast %86 : i32 to index
    %c0_23 = arith.constant 0 : index
    %88 = vector.load %arg2[%87, %c0_23] : memref<16x128xf32, #tpu.memory_space<vmem>>, vector<1x128xf32>
    %89 = arith.index_cast %c2_i32 : i32 to index
    %c1_24 = arith.constant 1 : index
    %90 = memref.load %arg0[%89, %c1_24] : memref<8x2xi32, #tpu.memory_space<smem>>
    %91 = arith.index_cast %90 : i32 to index
    %c0_25 = arith.constant 0 : index
    %92 = vector.load %arg2[%91, %c0_25] : memref<16x128xf32, #tpu.memory_space<vmem>>, vector<1x128xf32>
    %93 = tpu.concatenate %88, %92 in 0 : vector<1x128xf32>, vector<1x128xf32> -> vector<2x128xf32>
    %cst_26 = arith.constant dense<0.000000e+00> : vector<2x128xf32>
    %94 = tpu.matmul %81, %0, %cst_26 {dimension_numbers = #tpu.dot_dimension_numbers<[1], [0], [0], [1], [0, 0, 1, 1], [], []>} : vector<2x32xf32>, vector<32x128xf32>, vector<2x128xf32> -> vector<2x128xf32>
    %95 = arith.addf %93, %94 : vector<2x128xf32>
    %96 = vector.broadcast %1 : vector<1x128xf32> to vector<2x128xf32>
    %97 = arith.addf %95, %96 : vector<2x128xf32>
    %98 = vector.extract_strided_slice %97 {offsets = [0, 0], sizes = [2, 32], strides = [1, 1]} : vector<2x128xf32> to vector<2x32xf32>
    %99 = arith.negf %98 : vector<2x32xf32>
    %100 = math.exp %99 : vector<2x32xf32>
    %cst_27 = arith.constant 1.000000e+00 : f32
    %101 = vector.broadcast %cst_27 : f32 to vector<2x32xf32>
    %102 = arith.addf %101, %100 : vector<2x32xf32>
    %103 = arith.divf %101, %102 : vector<2x32xf32>
    %104 = vector.extract_strided_slice %97 {offsets = [0, 32], sizes = [2, 32], strides = [1, 1]} : vector<2x128xf32> to vector<2x32xf32>
    %105 = arith.negf %104 : vector<2x32xf32>
    %106 = math.exp %105 : vector<2x32xf32>
    %cst_28 = arith.constant 1.000000e+00 : f32
    %107 = vector.broadcast %cst_28 : f32 to vector<2x32xf32>
    %108 = arith.addf %107, %106 : vector<2x32xf32>
    %109 = arith.divf %107, %108 : vector<2x32xf32>
    %110 = vector.extract_strided_slice %97 {offsets = [0, 64], sizes = [2, 32], strides = [1, 1]} : vector<2x128xf32> to vector<2x32xf32>
    %111 = math.tanh %110 : vector<2x32xf32>
    %112 = vector.extract_strided_slice %97 {offsets = [0, 96], sizes = [2, 32], strides = [1, 1]} : vector<2x128xf32> to vector<2x32xf32>
    %113 = arith.negf %112 : vector<2x32xf32>
    %114 = math.exp %113 : vector<2x32xf32>
    %cst_29 = arith.constant 1.000000e+00 : f32
    %115 = vector.broadcast %cst_29 : f32 to vector<2x32xf32>
    %116 = arith.addf %115, %114 : vector<2x32xf32>
    %117 = arith.divf %115, %116 : vector<2x32xf32>
    %118 = arith.mulf %109, %79 : vector<2x32xf32>
    %119 = arith.mulf %103, %111 : vector<2x32xf32>
    %120 = arith.addf %118, %119 : vector<2x32xf32>
    %121 = math.tanh %120 : vector<2x32xf32>
    %122 = arith.mulf %117, %121 : vector<2x32xf32>
    %123 = vector.shape_cast %122 : vector<2x32xf32> to vector<2x1x32xf32>
    %c0_30 = arith.constant 0 : index
    %124 = arith.index_cast %c2_i32 : i32 to index
    %c0_31 = arith.constant 0 : index
    %125 = vector.load %arg11[%c0_30, %124, %c0_31] : memref<2x8x32xf32, #tpu.memory_space<vmem>>, vector<2x1x32xf32>
    tpu.vector_store %arg11[%c0_30, %124, %c0_31], %123 {strides = array<i32>} : memref<2x8x32xf32, #tpu.memory_space<vmem>>, vector<2x1x32xf32>,
    %c3_i32 = arith.constant 3 : i32
    %126 = arith.index_cast %c3_i32 : i32 to index
    %c0_32 = arith.constant 0 : index
    %127 = memref.load %arg0[%126, %c0_32] : memref<8x2xi32, #tpu.memory_space<smem>>
    %128 = arith.index_cast %127 : i32 to index
    %c0_33 = arith.constant 0 : index
    %129 = vector.load %arg2[%128, %c0_33] : memref<16x128xf32, #tpu.memory_space<vmem>>, vector<1x128xf32>
    %130 = arith.index_cast %c3_i32 : i32 to index
    %c1_34 = arith.constant 1 : index
    %131 = memref.load %arg0[%130, %c1_34] : memref<8x2xi32, #tpu.memory_space<smem>>
    %132 = arith.index_cast %131 : i32 to index
    %c0_35 = arith.constant 0 : index
    %133 = vector.load %arg2[%132, %c0_35] : memref<16x128xf32, #tpu.memory_space<vmem>>, vector<1x128xf32>
    %134 = tpu.concatenate %129, %133 in 0 : vector<1x128xf32>, vector<1x128xf32> -> vector<2x128xf32>
    %cst_36 = arith.constant dense<0.000000e+00> : vector<2x128xf32>
    %135 = tpu.matmul %122, %0, %cst_36 {dimension_numbers = #tpu.dot_dimension_numbers<[1], [0], [0], [1], [0, 0, 1, 1], [], []>} : vector<2x32xf32>, vector<32x128xf32>, vector<2x128xf32> -> vector<2x128xf32>
    %136 = arith.addf %134, %135 : vector<2x128xf32>
    %137 = vector.broadcast %1 : vector<1x128xf32> to vector<2x128xf32>
    %138 = arith.addf %136, %137 : vector<2x128xf32>
    %139 = vector.extract_strided_slice %138 {offsets = [0, 0], sizes = [2, 32], strides = [1, 1]} : vector<2x128xf32> to vector<2x32xf32>
    %140 = arith.negf %139 : vector<2x32xf32>
    %141 = math.exp %140 : vector<2x32xf32>
    %cst_37 = arith.constant 1.000000e+00 : f32
    %142 = vector.broadcast %cst_37 : f32 to vector<2x32xf32>
    %143 = arith.addf %142, %141 : vector<2x32xf32>
    %144 = arith.divf %142, %143 : vector<2x32xf32>
    %145 = vector.extract_strided_slice %138 {offsets = [0, 32], sizes = [2, 32], strides = [1, 1]} : vector<2x128xf32> to vector<2x32xf32>
    %146 = arith.negf %145 : vector<2x32xf32>
    %147 = math.exp %146 : vector<2x32xf32>
    %cst_38 = arith.constant 1.000000e+00 : f32
    %148 = vector.broadcast %cst_38 : f32 to vector<2x32xf32>
    %149 = arith.addf %148, %147 : vector<2x32xf32>
    %150 = arith.divf %148, %149 : vector<2x32xf32>
    %151 = vector.extract_strided_slice %138 {offsets = [0, 64], sizes = [2, 32], strides = [1, 1]} : vector<2x128xf32> to vector<2x32xf32>
    %152 = math.tanh %151 : vector<2x32xf32>
    %153 = vector.extract_strided_slice %138 {offsets = [0, 96], sizes = [2, 32], strides = [1, 1]} : vector<2x128xf32> to vector<2x32xf32>
    %154 = arith.negf %153 : vector<2x32xf32>
    %155 = math.exp %154 : vector<2x32xf32>
    %cst_39 = arith.constant 1.000000e+00 : f32
    %156 = vector.broadcast %cst_39 : f32 to vector<2x32xf32>
    %157 = arith.addf %156, %155 : vector<2x32xf32>
    %158 = arith.divf %156, %157 : vector<2x32xf32>
    %159 = arith.mulf %150, %120 : vector<2x32xf32>
    %160 = arith.mulf %144, %152 : vector<2x32xf32>
    %161 = arith.addf %159, %160 : vector<2x32xf32>
    %162 = math.tanh %161 : vector<2x32xf32>
    %163 = arith.mulf %158, %162 : vector<2x32xf32>
    %164 = vector.shape_cast %163 : vector<2x32xf32> to vector<2x1x32xf32>
    %c0_40 = arith.constant 0 : index
    %165 = arith.index_cast %c3_i32 : i32 to index
    %c0_41 = arith.constant 0 : index
    %166 = vector.load %arg11[%c0_40, %165, %c0_41] : memref<2x8x32xf32, #tpu.memory_space<vmem>>, vector<2x1x32xf32>
    tpu.vector_store %arg11[%c0_40, %165, %c0_41], %164 {strides = array<i32>} : memref<2x8x32xf32, #tpu.memory_space<vmem>>, vector<2x1x32xf32>,
    %c4_i32 = arith.constant 4 : i32
    %167 = arith.index_cast %c4_i32 : i32 to index
    %c0_42 = arith.constant 0 : index
    %168 = memref.load %arg0[%167, %c0_42] : memref<8x2xi32, #tpu.memory_space<smem>>
    %169 = arith.index_cast %168 : i32 to index
    %c0_43 = arith.constant 0 : index
    %170 = vector.load %arg2[%169, %c0_43] : memref<16x128xf32, #tpu.memory_space<vmem>>, vector<1x128xf32>
    %171 = arith.index_cast %c4_i32 : i32 to index
    %c1_44 = arith.constant 1 : index
    %172 = memref.load %arg0[%171, %c1_44] : memref<8x2xi32, #tpu.memory_space<smem>>
    %173 = arith.index_cast %172 : i32 to index
    %c0_45 = arith.constant 0 : index
    %174 = vector.load %arg2[%173, %c0_45] : memref<16x128xf32, #tpu.memory_space<vmem>>, vector<1x128xf32>
    %175 = tpu.concatenate %170, %174 in 0 : vector<1x128xf32>, vector<1x128xf32> -> vector<2x128xf32>
    %cst_46 = arith.constant dense<0.000000e+00> : vector<2x128xf32>
    %176 = tpu.matmul %163, %0, %cst_46 {dimension_numbers = #tpu.dot_dimension_numbers<[1], [0], [0], [1], [0, 0, 1, 1], [], []>} : vector<2x32xf32>, vector<32x128xf32>, vector<2x128xf32> -> vector<2x128xf32>
    %177 = arith.addf %175, %176 : vector<2x128xf32>
    %178 = vector.broadcast %1 : vector<1x128xf32> to vector<2x128xf32>
    %179 = arith.addf %177, %178 : vector<2x128xf32>
    %180 = vector.extract_strided_slice %179 {offsets = [0, 0], sizes = [2, 32], strides = [1, 1]} : vector<2x128xf32> to vector<2x32xf32>
    %181 = arith.negf %180 : vector<2x32xf32>
    %182 = math.exp %181 : vector<2x32xf32>
    %cst_47 = arith.constant 1.000000e+00 : f32
    %183 = vector.broadcast %cst_47 : f32 to vector<2x32xf32>
    %184 = arith.addf %183, %182 : vector<2x32xf32>
    %185 = arith.divf %183, %184 : vector<2x32xf32>
    %186 = vector.extract_strided_slice %179 {offsets = [0, 32], sizes = [2, 32], strides = [1, 1]} : vector<2x128xf32> to vector<2x32xf32>
    %187 = arith.negf %186 : vector<2x32xf32>
    %188 = math.exp %187 : vector<2x32xf32>
    %cst_48 = arith.constant 1.000000e+00 : f32
    %189 = vector.broadcast %cst_48 : f32 to vector<2x32xf32>
    %190 = arith.addf %189, %188 : vector<2x32xf32>
    %191 = arith.divf %189, %190 : vector<2x32xf32>
    %192 = vector.extract_strided_slice %179 {offsets = [0, 64], sizes = [2, 32], strides = [1, 1]} : vector<2x128xf32> to vector<2x32xf32>
    %193 = math.tanh %192 : vector<2x32xf32>
    %194 = vector.extract_strided_slice %179 {offsets = [0, 96], sizes = [2, 32], strides = [1, 1]} : vector<2x128xf32> to vector<2x32xf32>
    %195 = arith.negf %194 : vector<2x32xf32>
    %196 = math.exp %195 : vector<2x32xf32>
    %cst_49 = arith.constant 1.000000e+00 : f32
    %197 = vector.broadcast %cst_49 : f32 to vector<2x32xf32>
    %198 = arith.addf %197, %196 : vector<2x32xf32>
    %199 = arith.divf %197, %198 : vector<2x32xf32>
    %200 = arith.mulf %191, %161 : vector<2x32xf32>
    %201 = arith.mulf %185, %193 : vector<2x32xf32>
    %202 = arith.addf %200, %201 : vector<2x32xf32>
    %203 = math.tanh %202 : vector<2x32xf32>
    %204 = arith.mulf %199, %203 : vector<2x32xf32>
    %205 = vector.shape_cast %204 : vector<2x32xf32> to vector<2x1x32xf32>
    %c0_50 = arith.constant 0 : index
    %206 = arith.index_cast %c4_i32 : i32 to index
    %c0_51 = arith.constant 0 : index
    %207 = vector.load %arg11[%c0_50, %206, %c0_51] : memref<2x8x32xf32, #tpu.memory_space<vmem>>, vector<2x1x32xf32>
    tpu.vector_store %arg11[%c0_50, %206, %c0_51], %205 {strides = array<i32>} : memref<2x8x32xf32, #tpu.memory_space<vmem>>, vector<2x1x32xf32>,
    %c5_i32 = arith.constant 5 : i32
    %208 = arith.index_cast %c5_i32 : i32 to index
    %c0_52 = arith.constant 0 : index
    %209 = memref.load %arg0[%208, %c0_52] : memref<8x2xi32, #tpu.memory_space<smem>>
    %210 = arith.index_cast %209 : i32 to index
    %c0_53 = arith.constant 0 : index
    %211 = vector.load %arg2[%210, %c0_53] : memref<16x128xf32, #tpu.memory_space<vmem>>, vector<1x128xf32>
    %212 = arith.index_cast %c5_i32 : i32 to index
    %c1_54 = arith.constant 1 : index
    %213 = memref.load %arg0[%212, %c1_54] : memref<8x2xi32, #tpu.memory_space<smem>>
    %214 = arith.index_cast %213 : i32 to index
    %c0_55 = arith.constant 0 : index
    %215 = vector.load %arg2[%214, %c0_55] : memref<16x128xf32, #tpu.memory_space<vmem>>, vector<1x128xf32>
    %216 = tpu.concatenate %211, %215 in 0 : vector<1x128xf32>, vector<1x128xf32> -> vector<2x128xf32>
    %cst_56 = arith.constant dense<0.000000e+00> : vector<2x128xf32>
    %217 = tpu.matmul %204, %0, %cst_56 {dimension_numbers = #tpu.dot_dimension_numbers<[1], [0], [0], [1], [0, 0, 1, 1], [], []>} : vector<2x32xf32>, vector<32x128xf32>, vector<2x128xf32> -> vector<2x128xf32>
    %218 = arith.addf %216, %217 : vector<2x128xf32>
    %219 = vector.broadcast %1 : vector<1x128xf32> to vector<2x128xf32>
    %220 = arith.addf %218, %219 : vector<2x128xf32>
    %221 = vector.extract_strided_slice %220 {offsets = [0, 0], sizes = [2, 32], strides = [1, 1]} : vector<2x128xf32> to vector<2x32xf32>
    %222 = arith.negf %221 : vector<2x32xf32>
    %223 = math.exp %222 : vector<2x32xf32>
    %cst_57 = arith.constant 1.000000e+00 : f32
    %224 = vector.broadcast %cst_57 : f32 to vector<2x32xf32>
    %225 = arith.addf %224, %223 : vector<2x32xf32>
    %226 = arith.divf %224, %225 : vector<2x32xf32>
    %227 = vector.extract_strided_slice %220 {offsets = [0, 32], sizes = [2, 32], strides = [1, 1]} : vector<2x128xf32> to vector<2x32xf32>
    %228 = arith.negf %227 : vector<2x32xf32>
    %229 = math.exp %228 : vector<2x32xf32>
    %cst_58 = arith.constant 1.000000e+00 : f32
    %230 = vector.broadcast %cst_58 : f32 to vector<2x32xf32>
    %231 = arith.addf %230, %229 : vector<2x32xf32>
    %232 = arith.divf %230, %231 : vector<2x32xf32>
    %233 = vector.extract_strided_slice %220 {offsets = [0, 64], sizes = [2, 32], strides = [1, 1]} : vector<2x128xf32> to vector<2x32xf32>
    %234 = math.tanh %233 : vector<2x32xf32>
    %235 = vector.extract_strided_slice %220 {offsets = [0, 96], sizes = [2, 32], strides = [1, 1]} : vector<2x128xf32> to vector<2x32xf32>
    %236 = arith.negf %235 : vector<2x32xf32>
    %237 = math.exp %236 : vector<2x32xf32>
    %cst_59 = arith.constant 1.000000e+00 : f32
    %238 = vector.broadcast %cst_59 : f32 to vector<2x32xf32>
    %239 = arith.addf %238, %237 : vector<2x32xf32>
    %240 = arith.divf %238, %239 : vector<2x32xf32>
    %241 = arith.mulf %232, %202 : vector<2x32xf32>
    %242 = arith.mulf %226, %234 : vector<2x32xf32>
    %243 = arith.addf %241, %242 : vector<2x32xf32>
    %244 = math.tanh %243 : vector<2x32xf32>
    %245 = arith.mulf %240, %244 : vector<2x32xf32>
    %246 = vector.shape_cast %245 : vector<2x32xf32> to vector<2x1x32xf32>
    %c0_60 = arith.constant 0 : index
    %247 = arith.index_cast %c5_i32 : i32 to index
    %c0_61 = arith.constant 0 : index
    %248 = vector.load %arg11[%c0_60, %247, %c0_61] : memref<2x8x32xf32, #tpu.memory_space<vmem>>, vector<2x1x32xf32>
    tpu.vector_store %arg11[%c0_60, %247, %c0_61], %246 {strides = array<i32>} : memref<2x8x32xf32, #tpu.memory_space<vmem>>, vector<2x1x32xf32>,
    %c6_i32 = arith.constant 6 : i32
    %249 = arith.index_cast %c6_i32 : i32 to index
    %c0_62 = arith.constant 0 : index
    %250 = memref.load %arg0[%249, %c0_62] : memref<8x2xi32, #tpu.memory_space<smem>>
    %251 = arith.index_cast %250 : i32 to index
    %c0_63 = arith.constant 0 : index
    %252 = vector.load %arg2[%251, %c0_63] : memref<16x128xf32, #tpu.memory_space<vmem>>, vector<1x128xf32>
    %253 = arith.index_cast %c6_i32 : i32 to index
    %c1_64 = arith.constant 1 : index
    %254 = memref.load %arg0[%253, %c1_64] : memref<8x2xi32, #tpu.memory_space<smem>>
    %255 = arith.index_cast %254 : i32 to index
    %c0_65 = arith.constant 0 : index
    %256 = vector.load %arg2[%255, %c0_65] : memref<16x128xf32, #tpu.memory_space<vmem>>, vector<1x128xf32>
    %257 = tpu.concatenate %252, %256 in 0 : vector<1x128xf32>, vector<1x128xf32> -> vector<2x128xf32>
    %cst_66 = arith.constant dense<0.000000e+00> : vector<2x128xf32>
    %258 = tpu.matmul %245, %0, %cst_66 {dimension_numbers = #tpu.dot_dimension_numbers<[1], [0], [0], [1], [0, 0, 1, 1], [], []>} : vector<2x32xf32>, vector<32x128xf32>, vector<2x128xf32> -> vector<2x128xf32>
    %259 = arith.addf %257, %258 : vector<2x128xf32>
    %260 = vector.broadcast %1 : vector<1x128xf32> to vector<2x128xf32>
    %261 = arith.addf %259, %260 : vector<2x128xf32>
    %262 = vector.extract_strided_slice %261 {offsets = [0, 0], sizes = [2, 32], strides = [1, 1]} : vector<2x128xf32> to vector<2x32xf32>
    %263 = arith.negf %262 : vector<2x32xf32>
    %264 = math.exp %263 : vector<2x32xf32>
    %cst_67 = arith.constant 1.000000e+00 : f32
    %265 = vector.broadcast %cst_67 : f32 to vector<2x32xf32>
    %266 = arith.addf %265, %264 : vector<2x32xf32>
    %267 = arith.divf %265, %266 : vector<2x32xf32>
    %268 = vector.extract_strided_slice %261 {offsets = [0, 32], sizes = [2, 32], strides = [1, 1]} : vector<2x128xf32> to vector<2x32xf32>
    %269 = arith.negf %268 : vector<2x32xf32>
    %270 = math.exp %269 : vector<2x32xf32>
    %cst_68 = arith.constant 1.000000e+00 : f32
    %271 = vector.broadcast %cst_68 : f32 to vector<2x32xf32>
    %272 = arith.addf %271, %270 : vector<2x32xf32>
    %273 = arith.divf %271, %272 : vector<2x32xf32>
    %274 = vector.extract_strided_slice %261 {offsets = [0, 64], sizes = [2, 32], strides = [1, 1]} : vector<2x128xf32> to vector<2x32xf32>
    %275 = math.tanh %274 : vector<2x32xf32>
    %276 = vector.extract_strided_slice %261 {offsets = [0, 96], sizes = [2, 32], strides = [1, 1]} : vector<2x128xf32> to vector<2x32xf32>
    %277 = arith.negf %276 : vector<2x32xf32>
    %278 = math.exp %277 : vector<2x32xf32>
    %cst_69 = arith.constant 1.000000e+00 : f32
    %279 = vector.broadcast %cst_69 : f32 to vector<2x32xf32>
    %280 = arith.addf %279, %278 : vector<2x32xf32>
    %281 = arith.divf %279, %280 : vector<2x32xf32>
    %282 = arith.mulf %273, %243 : vector<2x32xf32>
    %283 = arith.mulf %267, %275 : vector<2x32xf32>
    %284 = arith.addf %282, %283 : vector<2x32xf32>
    %285 = math.tanh %284 : vector<2x32xf32>
    %286 = arith.mulf %281, %285 : vector<2x32xf32>
    %287 = vector.shape_cast %286 : vector<2x32xf32> to vector<2x1x32xf32>
    %c0_70 = arith.constant 0 : index
    %288 = arith.index_cast %c6_i32 : i32 to index
    %c0_71 = arith.constant 0 : index
    %289 = vector.load %arg11[%c0_70, %288, %c0_71] : memref<2x8x32xf32, #tpu.memory_space<vmem>>, vector<2x1x32xf32>
    tpu.vector_store %arg11[%c0_70, %288, %c0_71], %287 {strides = array<i32>} : memref<2x8x32xf32, #tpu.memory_space<vmem>>, vector<2x1x32xf32>,
    %c7_i32 = arith.constant 7 : i32
    %290 = arith.index_cast %c7_i32 : i32 to index
    %c0_72 = arith.constant 0 : index
    %291 = memref.load %arg0[%290, %c0_72] : memref<8x2xi32, #tpu.memory_space<smem>>
    %292 = arith.index_cast %291 : i32 to index
    %c0_73 = arith.constant 0 : index
    %293 = vector.load %arg2[%292, %c0_73] : memref<16x128xf32, #tpu.memory_space<vmem>>, vector<1x128xf32>
    %294 = arith.index_cast %c7_i32 : i32 to index
    %c1_74 = arith.constant 1 : index
    %295 = memref.load %arg0[%294, %c1_74] : memref<8x2xi32, #tpu.memory_space<smem>>
    %296 = arith.index_cast %295 : i32 to index
    %c0_75 = arith.constant 0 : index
    %297 = vector.load %arg2[%296, %c0_75] : memref<16x128xf32, #tpu.memory_space<vmem>>, vector<1x128xf32>
    %298 = tpu.concatenate %293, %297 in 0 : vector<1x128xf32>, vector<1x128xf32> -> vector<2x128xf32>
    %cst_76 = arith.constant dense<0.000000e+00> : vector<2x128xf32>
    %299 = tpu.matmul %286, %0, %cst_76 {dimension_numbers = #tpu.dot_dimension_numbers<[1], [0], [0], [1], [0, 0, 1, 1], [], []>} : vector<2x32xf32>, vector<32x128xf32>, vector<2x128xf32> -> vector<2x128xf32>
    %300 = arith.addf %298, %299 : vector<2x128xf32>
    %301 = vector.broadcast %1 : vector<1x128xf32> to vector<2x128xf32>
    %302 = arith.addf %300, %301 : vector<2x128xf32>
    %303 = vector.extract_strided_slice %302 {offsets = [0, 0], sizes = [2, 32], strides = [1, 1]} : vector<2x128xf32> to vector<2x32xf32>
    %304 = arith.negf %303 : vector<2x32xf32>
    %305 = math.exp %304 : vector<2x32xf32>
    %cst_77 = arith.constant 1.000000e+00 : f32
    %306 = vector.broadcast %cst_77 : f32 to vector<2x32xf32>
    %307 = arith.addf %306, %305 : vector<2x32xf32>
    %308 = arith.divf %306, %307 : vector<2x32xf32>
    %309 = vector.extract_strided_slice %302 {offsets = [0, 32], sizes = [2, 32], strides = [1, 1]} : vector<2x128xf32> to vector<2x32xf32>
    %310 = arith.negf %309 : vector<2x32xf32>
    %311 = math.exp %310 : vector<2x32xf32>
    %cst_78 = arith.constant 1.000000e+00 : f32
    %312 = vector.broadcast %cst_78 : f32 to vector<2x32xf32>
    %313 = arith.addf %312, %311 : vector<2x32xf32>
    %314 = arith.divf %312, %313 : vector<2x32xf32>
    %315 = vector.extract_strided_slice %302 {offsets = [0, 64], sizes = [2, 32], strides = [1, 1]} : vector<2x128xf32> to vector<2x32xf32>
    %316 = math.tanh %315 : vector<2x32xf32>
    %317 = vector.extract_strided_slice %302 {offsets = [0, 96], sizes = [2, 32], strides = [1, 1]} : vector<2x128xf32> to vector<2x32xf32>
    %318 = arith.negf %317 : vector<2x32xf32>
    %319 = math.exp %318 : vector<2x32xf32>
    %cst_79 = arith.constant 1.000000e+00 : f32
    %320 = vector.broadcast %cst_79 : f32 to vector<2x32xf32>
    %321 = arith.addf %320, %319 : vector<2x32xf32>
    %322 = arith.divf %320, %321 : vector<2x32xf32>
    %323 = arith.mulf %314, %284 : vector<2x32xf32>
    %324 = arith.mulf %308, %316 : vector<2x32xf32>
    %325 = arith.addf %323, %324 : vector<2x32xf32>
    %326 = math.tanh %325 : vector<2x32xf32>
    %327 = arith.mulf %322, %326 : vector<2x32xf32>
    %328 = vector.shape_cast %327 : vector<2x32xf32> to vector<2x1x32xf32>
    %c0_80 = arith.constant 0 : index
    %329 = arith.index_cast %c7_i32 : i32 to index
    %c0_81 = arith.constant 0 : index
    %330 = vector.load %arg11[%c0_80, %329, %c0_81] : memref<2x8x32xf32, #tpu.memory_space<vmem>>, vector<2x1x32xf32>
    tpu.vector_store %arg11[%c0_80, %329, %c0_81], %328 {strides = array<i32>} : memref<2x8x32xf32, #tpu.memory_space<vmem>>, vector<2x1x32xf32>,
    %c8_i32 = arith.constant 8 : i32
    %c0_82 = arith.constant 0 : index
    %c0_83 = arith.constant 0 : index
    %c0_84 = arith.constant 0 : index
    %331 = vector.load %arg11[%c0_82, %c0_83, %c0_84] : memref<2x8x32xf32, #tpu.memory_space<vmem>>, vector<2x8x32xf32>
    %c0_85 = arith.constant 0 : index
    %c0_86 = arith.constant 0 : index
    %332 = vector.load %arg8[%c0_85, %c0_86] : memref<32x32xf32, #tpu.memory_space<vmem>>, vector<32x32xf32>
    %333 = vector.shape_cast %331 : vector<2x8x32xf32> to vector<16x32xf32>
    %cst_87 = arith.constant dense<0.000000e+00> : vector<16x32xf32>
    %334 = tpu.matmul %333, %332, %cst_87 {dimension_numbers = #tpu.dot_dimension_numbers<[1], [0], [0], [1], [0, 0, 1, 1], [], []>} : vector<16x32xf32>, vector<32x32xf32>, vector<16x32xf32> -> vector<16x32xf32>
    %335 = vector.shape_cast %334 : vector<16x32xf32> to vector<2x8x32xf32>
    %c0_88 = arith.constant 0 : index
    %c0_89 = arith.constant 0 : index
    %336 = vector.load %arg6[%c0_88, %c0_89] : memref<64x128xf32, #tpu.memory_space<vmem>>, vector<64x128xf32>
    %c0_90 = arith.constant 0 : index
    %c0_91 = arith.constant 0 : index
    %337 = vector.load %arg7[%c0_90, %c0_91] : memref<1x128xf32, #tpu.memory_space<vmem>>, vector<1x128xf32>
    %c0_92 = arith.constant 0 : index
    %c0_93 = arith.constant 0 : index
    %338 = vector.load %arg9[%c0_92, %c0_93] : memref<64x32xf32, #tpu.memory_space<vmem>>, vector<64x32xf32>
    %c0_i32_94 = arith.constant 0 : i32
    %339 = arith.index_cast %c0_i32_94 : i32 to index
    %c0_95 = arith.constant 0 : index
    %340 = memref.load %arg1[%339, %c0_95] : memref<6x2xi32, #tpu.memory_space<smem>>
    %341 = arith.index_cast %340 : i32 to index
    %c0_96 = arith.constant 0 : index
    %342 = vector.load %arg3[%341, %c0_96] : memref<16x128xf32, #tpu.memory_space<vmem>>, vector<1x128xf32>
    %343 = arith.index_cast %c0_i32_94 : i32 to index
    %c1_97 = arith.constant 1 : index
    %344 = memref.load %arg1[%343, %c1_97] : memref<6x2xi32, #tpu.memory_space<smem>>
    %345 = arith.index_cast %344 : i32 to index
    %c0_98 = arith.constant 0 : index
    %346 = vector.load %arg3[%345, %c0_98] : memref<16x128xf32, #tpu.memory_space<vmem>>, vector<1x128xf32>
    %347 = tpu.concatenate %342, %346 in 0 : vector<1x128xf32>, vector<1x128xf32> -> vector<2x128xf32>
    %348 = tpu.concatenate %2, %327 in 1 : vector<2x32xf32>, vector<2x32xf32> -> vector<2x64xf32>
    %cst_99 = arith.constant dense<0.000000e+00> : vector<2x128xf32>
    %349 = tpu.matmul %348, %336, %cst_99 {dimension_numbers = #tpu.dot_dimension_numbers<[1], [0], [0], [1], [0, 0, 1, 1], [], []>} : vector<2x64xf32>, vector<64x128xf32>, vector<2x128xf32> -> vector<2x128xf32>
    %350 = arith.addf %347, %349 : vector<2x128xf32>
    %351 = vector.broadcast %337 : vector<1x128xf32> to vector<2x128xf32>
    %352 = arith.addf %350, %351 : vector<2x128xf32>
    %353 = vector.extract_strided_slice %352 {offsets = [0, 0], sizes = [2, 32], strides = [1, 1]} : vector<2x128xf32> to vector<2x32xf32>
    %354 = arith.negf %353 : vector<2x32xf32>
    %355 = math.exp %354 : vector<2x32xf32>
    %cst_100 = arith.constant 1.000000e+00 : f32
    %356 = vector.broadcast %cst_100 : f32 to vector<2x32xf32>
    %357 = arith.addf %356, %355 : vector<2x32xf32>
    %358 = arith.divf %356, %357 : vector<2x32xf32>
    %359 = vector.extract_strided_slice %352 {offsets = [0, 32], sizes = [2, 32], strides = [1, 1]} : vector<2x128xf32> to vector<2x32xf32>
    %360 = arith.negf %359 : vector<2x32xf32>
    %361 = math.exp %360 : vector<2x32xf32>
    %cst_101 = arith.constant 1.000000e+00 : f32
    %362 = vector.broadcast %cst_101 : f32 to vector<2x32xf32>
    %363 = arith.addf %362, %361 : vector<2x32xf32>
    %364 = arith.divf %362, %363 : vector<2x32xf32>
    %365 = vector.extract_strided_slice %352 {offsets = [0, 64], sizes = [2, 32], strides = [1, 1]} : vector<2x128xf32> to vector<2x32xf32>
    %366 = math.tanh %365 : vector<2x32xf32>
    %367 = vector.extract_strided_slice %352 {offsets = [0, 96], sizes = [2, 32], strides = [1, 1]} : vector<2x128xf32> to vector<2x32xf32>
    %368 = arith.negf %367 : vector<2x32xf32>
    %369 = math.exp %368 : vector<2x32xf32>
    %cst_102 = arith.constant 1.000000e+00 : f32
    %370 = vector.broadcast %cst_102 : f32 to vector<2x32xf32>
    %371 = arith.addf %370, %369 : vector<2x32xf32>
    %372 = arith.divf %370, %371 : vector<2x32xf32>
    %373 = arith.mulf %364, %325 : vector<2x32xf32>
    %374 = arith.mulf %358, %366 : vector<2x32xf32>
    %375 = arith.addf %373, %374 : vector<2x32xf32>
    %376 = math.tanh %375 : vector<2x32xf32>
    %377 = arith.mulf %372, %376 : vector<2x32xf32>
    %378 = vector.shape_cast %377 : vector<2x32xf32> to vector<2x1x32xf32>
    "tpu.trace_start"() <{level = 10 : i32, message = "bqh,bsh->bqs"}> : () -> ()
    %cst_103 = arith.constant dense<0.000000e+00> : vector<2x1x8xf32>
    %379 = tpu.matmul %378, %335, %cst_103 {dimension_numbers = #tpu.dot_dimension_numbers<[2], [2], [1], [1], [0, 0, 0, 1, 1, 1], [0], [0]>} : vector<2x1x32xf32>, vector<2x8x32xf32>, vector<2x1x8xf32> -> vector<2x1x8xf32>
    "tpu.trace_stop"() : () -> ()
    %380 = vector.shape_cast %379 : vector<2x1x8xf32> to vector<2x8xf32>
    %cst_104 = arith.constant dense<0xFF800000> : vector<2xf32>
    %381 = vector.multi_reduction <maximumf>, %380, %cst_104 [1] : vector<2x8xf32> to vector<2xf32>
    %382 = vector.shape_cast %381 : vector<2xf32> to vector<2x1xf32>
    %383 = vector.broadcast %382 : vector<2x1xf32> to vector<2x8xf32>
    %384 = arith.subf %380, %383 : vector<2x8xf32>
    %385 = math.exp %384 : vector<2x8xf32>
    %cst_105 = arith.constant dense<0.000000e+00> : vector<2xf32>
    %386 = vector.multi_reduction <add>, %385, %cst_105 [1] : vector<2x8xf32> to vector<2xf32>
    %387 = vector.shape_cast %386 : vector<2xf32> to vector<2x1xf32>
    %388 = tpu.reciprocal %387 : vector<2x1xf32> -> vector<2x1xf32>
    %389 = vector.broadcast %388 : vector<2x1xf32> to vector<2x8xf32>
    %390 = arith.mulf %385, %389 : vector<2x8xf32>
    %391 = vector.shape_cast %390 : vector<2x8xf32> to vector<2x1x8xf32>
    "tpu.trace_start"() <{level = 10 : i32, message = "bqs,bsh->bqh"}> : () -> ()
    %cst_106 = arith.constant dense<0.000000e+00> : vector<2x1x32xf32>
    %392 = tpu.matmul %391, %331, %cst_106 {dimension_numbers = #tpu.dot_dimension_numbers<[2], [1], [1], [2], [0, 0, 0, 1, 1, 2], [0], [0]>} : vector<2x1x8xf32>, vector<2x8x32xf32>, vector<2x1x32xf32> -> vector<2x1x32xf32>
    "tpu.trace_stop"() : () -> ()
    %393 = vector.shape_cast %392 : vector<2x1x32xf32> to vector<2x32xf32>
    %394 = tpu.concatenate %393, %377 in 1 : vector<2x32xf32>, vector<2x32xf32> -> vector<2x64xf32>
    %cst_107 = arith.constant dense<0.000000e+00> : vector<2x32xf32>
    %395 = tpu.matmul %394, %338, %cst_107 {dimension_numbers = #tpu.dot_dimension_numbers<[1], [0], [0], [1], [0, 0, 1, 1], [], []>} : vector<2x64xf32>, vector<64x32xf32>, vector<2x32xf32> -> vector<2x32xf32>
    %396 = math.tanh %395 : vector<2x32xf32>
    %397 = arith.index_cast %c0_i32_94 : i32 to index
    %c0_108 = arith.constant 0 : index
    %c0_109 = arith.constant 0 : index
    %398 = vector.load %arg10[%397, %c0_108, %c0_109] : memref<6x2x32xf32, #tpu.memory_space<vmem>>, vector<1x2x32xf32>
    %399 = vector.shape_cast %398 : vector<1x2x32xf32> to vector<2x32xf32>
    %400 = vector.shape_cast %396 : vector<2x32xf32> to vector<1x2x32xf32>
    tpu.vector_store %arg10[%397, %c0_108, %c0_109], %400 {strides = array<i32>} : memref<6x2x32xf32, #tpu.memory_space<vmem>>, vector<1x2x32xf32>,
    %c1_i32_110 = arith.constant 1 : i32
    %401 = arith.index_cast %c1_i32_110 : i32 to index
    %c0_111 = arith.constant 0 : index
    %402 = memref.load %arg1[%401, %c0_111] : memref<6x2xi32, #tpu.memory_space<smem>>
    %403 = arith.index_cast %402 : i32 to index
    %c0_112 = arith.constant 0 : index
    %404 = vector.load %arg3[%403, %c0_112] : memref<16x128xf32, #tpu.memory_space<vmem>>, vector<1x128xf32>
    %405 = arith.index_cast %c1_i32_110 : i32 to index
    %c1_113 = arith.constant 1 : index
    %406 = memref.load %arg1[%405, %c1_113] : memref<6x2xi32, #tpu.memory_space<smem>>
    %407 = arith.index_cast %406 : i32 to index
    %c0_114 = arith.constant 0 : index
    %408 = vector.load %arg3[%407, %c0_114] : memref<16x128xf32, #tpu.memory_space<vmem>>, vector<1x128xf32>
    %409 = tpu.concatenate %404, %408 in 0 : vector<1x128xf32>, vector<1x128xf32> -> vector<2x128xf32>
    %410 = tpu.concatenate %396, %377 in 1 : vector<2x32xf32>, vector<2x32xf32> -> vector<2x64xf32>
    %cst_115 = arith.constant dense<0.000000e+00> : vector<2x128xf32>
    %411 = tpu.matmul %410, %336, %cst_115 {dimension_numbers = #tpu.dot_dimension_numbers<[1], [0], [0], [1], [0, 0, 1, 1], [], []>} : vector<2x64xf32>, vector<64x128xf32>, vector<2x128xf32> -> vector<2x128xf32>
    %412 = arith.addf %409, %411 : vector<2x128xf32>
    %413 = vector.broadcast %337 : vector<1x128xf32> to vector<2x128xf32>
    %414 = arith.addf %412, %413 : vector<2x128xf32>
    %415 = vector.extract_strided_slice %414 {offsets = [0, 0], sizes = [2, 32], strides = [1, 1]} : vector<2x128xf32> to vector<2x32xf32>
    %416 = arith.negf %415 : vector<2x32xf32>
    %417 = math.exp %416 : vector<2x32xf32>
    %cst_116 = arith.constant 1.000000e+00 : f32
    %418 = vector.broadcast %cst_116 : f32 to vector<2x32xf32>
    %419 = arith.addf %418, %417 : vector<2x32xf32>
    %420 = arith.divf %418, %419 : vector<2x32xf32>
    %421 = vector.extract_strided_slice %414 {offsets = [0, 32], sizes = [2, 32], strides = [1, 1]} : vector<2x128xf32> to vector<2x32xf32>
    %422 = arith.negf %421 : vector<2x32xf32>
    %423 = math.exp %422 : vector<2x32xf32>
    %cst_117 = arith.constant 1.000000e+00 : f32
    %424 = vector.broadcast %cst_117 : f32 to vector<2x32xf32>
    %425 = arith.addf %424, %423 : vector<2x32xf32>
    %426 = arith.divf %424, %425 : vector<2x32xf32>
    %427 = vector.extract_strided_slice %414 {offsets = [0, 64], sizes = [2, 32], strides = [1, 1]} : vector<2x128xf32> to vector<2x32xf32>
    %428 = math.tanh %427 : vector<2x32xf32>
    %429 = vector.extract_strided_slice %414 {offsets = [0, 96], sizes = [2, 32], strides = [1, 1]} : vector<2x128xf32> to vector<2x32xf32>
    %430 = arith.negf %429 : vector<2x32xf32>
    %431 = math.exp %430 : vector<2x32xf32>
    %cst_118 = arith.constant 1.000000e+00 : f32
    %432 = vector.broadcast %cst_118 : f32 to vector<2x32xf32>
    %433 = arith.addf %432, %431 : vector<2x32xf32>
    %434 = arith.divf %432, %433 : vector<2x32xf32>
    %435 = arith.mulf %426, %375 : vector<2x32xf32>
    %436 = arith.mulf %420, %428 : vector<2x32xf32>
    %437 = arith.addf %435, %436 : vector<2x32xf32>
    %438 = math.tanh %437 : vector<2x32xf32>
    %439 = arith.mulf %434, %438 : vector<2x32xf32>
    %440 = vector.shape_cast %439 : vector<2x32xf32> to vector<2x1x32xf32>
    "tpu.trace_start"() <{level = 10 : i32, message = "bqh,bsh->bqs"}> : () -> ()
    %cst_119 = arith.constant dense<0.000000e+00> : vector<2x1x8xf32>
    %441 = tpu.matmul %440, %335, %cst_119 {dimension_numbers = #tpu.dot_dimension_numbers<[2], [2], [1], [1], [0, 0, 0, 1, 1, 1], [0], [0]>} : vector<2x1x32xf32>, vector<2x8x32xf32>, vector<2x1x8xf32> -> vector<2x1x8xf32>
    "tpu.trace_stop"() : () -> ()
    %442 = vector.shape_cast %441 : vector<2x1x8xf32> to vector<2x8xf32>
    %cst_120 = arith.constant dense<0xFF800000> : vector<2xf32>
    %443 = vector.multi_reduction <maximumf>, %442, %cst_120 [1] : vector<2x8xf32> to vector<2xf32>
    %444 = vector.shape_cast %443 : vector<2xf32> to vector<2x1xf32>
    %445 = vector.broadcast %444 : vector<2x1xf32> to vector<2x8xf32>
    %446 = arith.subf %442, %445 : vector<2x8xf32>
    %447 = math.exp %446 : vector<2x8xf32>
    %cst_121 = arith.constant dense<0.000000e+00> : vector<2xf32>
    %448 = vector.multi_reduction <add>, %447, %cst_121 [1] : vector<2x8xf32> to vector<2xf32>
    %449 = vector.shape_cast %448 : vector<2xf32> to vector<2x1xf32>
    %450 = tpu.reciprocal %449 : vector<2x1xf32> -> vector<2x1xf32>
    %451 = vector.broadcast %450 : vector<2x1xf32> to vector<2x8xf32>
    %452 = arith.mulf %447, %451 : vector<2x8xf32>
    %453 = vector.shape_cast %452 : vector<2x8xf32> to vector<2x1x8xf32>
    "tpu.trace_start"() <{level = 10 : i32, message = "bqs,bsh->bqh"}> : () -> ()
    %cst_122 = arith.constant dense<0.000000e+00> : vector<2x1x32xf32>
    %454 = tpu.matmul %453, %331, %cst_122 {dimension_numbers = #tpu.dot_dimension_numbers<[2], [1], [1], [2], [0, 0, 0, 1, 1, 2], [0], [0]>} : vector<2x1x8xf32>, vector<2x8x32xf32>, vector<2x1x32xf32> -> vector<2x1x32xf32>
    "tpu.trace_stop"() : () -> ()
    %455 = vector.shape_cast %454 : vector<2x1x32xf32> to vector<2x32xf32>
    %456 = tpu.concatenate %455, %439 in 1 : vector<2x32xf32>, vector<2x32xf32> -> vector<2x64xf32>
    %cst_123 = arith.constant dense<0.000000e+00> : vector<2x32xf32>
    %457 = tpu.matmul %456, %338, %cst_123 {dimension_numbers = #tpu.dot_dimension_numbers<[1], [0], [0], [1], [0, 0, 1, 1], [], []>} : vector<2x64xf32>, vector<64x32xf32>, vector<2x32xf32> -> vector<2x32xf32>
    %458 = math.tanh %457 : vector<2x32xf32>
    %459 = arith.index_cast %c1_i32_110 : i32 to index
    %c0_124 = arith.constant 0 : index
    %c0_125 = arith.constant 0 : index
    %460 = vector.load %arg10[%459, %c0_124, %c0_125] : memref<6x2x32xf32, #tpu.memory_space<vmem>>, vector<1x2x32xf32>
    %461 = vector.shape_cast %460 : vector<1x2x32xf32> to vector<2x32xf32>
    %462 = vector.shape_cast %458 : vector<2x32xf32> to vector<1x2x32xf32>
    tpu.vector_store %arg10[%459, %c0_124, %c0_125], %462 {strides = array<i32>} : memref<6x2x32xf32, #tpu.memory_space<vmem>>, vector<1x2x32xf32>,
    %c2_i32_126 = arith.constant 2 : i32
    %463 = arith.index_cast %c2_i32_126 : i32 to index
    %c0_127 = arith.constant 0 : index
    %464 = memref.load %arg1[%463, %c0_127] : memref<6x2xi32, #tpu.memory_space<smem>>
    %465 = arith.index_cast %464 : i32 to index
    %c0_128 = arith.constant 0 : index
    %466 = vector.load %arg3[%465, %c0_128] : memref<16x128xf32, #tpu.memory_space<vmem>>, vector<1x128xf32>
    %467 = arith.index_cast %c2_i32_126 : i32 to index
    %c1_129 = arith.constant 1 : index
    %468 = memref.load %arg1[%467, %c1_129] : memref<6x2xi32, #tpu.memory_space<smem>>
    %469 = arith.index_cast %468 : i32 to index
    %c0_130 = arith.constant 0 : index
    %470 = vector.load %arg3[%469, %c0_130] : memref<16x128xf32, #tpu.memory_space<vmem>>, vector<1x128xf32>
    %471 = tpu.concatenate %466, %470 in 0 : vector<1x128xf32>, vector<1x128xf32> -> vector<2x128xf32>
    %472 = tpu.concatenate %458, %439 in 1 : vector<2x32xf32>, vector<2x32xf32> -> vector<2x64xf32>
    %cst_131 = arith.constant dense<0.000000e+00> : vector<2x128xf32>
    %473 = tpu.matmul %472, %336, %cst_131 {dimension_numbers = #tpu.dot_dimension_numbers<[1], [0], [0], [1], [0, 0, 1, 1], [], []>} : vector<2x64xf32>, vector<64x128xf32>, vector<2x128xf32> -> vector<2x128xf32>
    %474 = arith.addf %471, %473 : vector<2x128xf32>
    %475 = vector.broadcast %337 : vector<1x128xf32> to vector<2x128xf32>
    %476 = arith.addf %474, %475 : vector<2x128xf32>
    %477 = vector.extract_strided_slice %476 {offsets = [0, 0], sizes = [2, 32], strides = [1, 1]} : vector<2x128xf32> to vector<2x32xf32>
    %478 = arith.negf %477 : vector<2x32xf32>
    %479 = math.exp %478 : vector<2x32xf32>
    %cst_132 = arith.constant 1.000000e+00 : f32
    %480 = vector.broadcast %cst_132 : f32 to vector<2x32xf32>
    %481 = arith.addf %480, %479 : vector<2x32xf32>
    %482 = arith.divf %480, %481 : vector<2x32xf32>
    %483 = vector.extract_strided_slice %476 {offsets = [0, 32], sizes = [2, 32], strides = [1, 1]} : vector<2x128xf32> to vector<2x32xf32>
    %484 = arith.negf %483 : vector<2x32xf32>
    %485 = math.exp %484 : vector<2x32xf32>
    %cst_133 = arith.constant 1.000000e+00 : f32
    %486 = vector.broadcast %cst_133 : f32 to vector<2x32xf32>
    %487 = arith.addf %486, %485 : vector<2x32xf32>
    %488 = arith.divf %486, %487 : vector<2x32xf32>
    %489 = vector.extract_strided_slice %476 {offsets = [0, 64], sizes = [2, 32], strides = [1, 1]} : vector<2x128xf32> to vector<2x32xf32>
    %490 = math.tanh %489 : vector<2x32xf32>
    %491 = vector.extract_strided_slice %476 {offsets = [0, 96], sizes = [2, 32], strides = [1, 1]} : vector<2x128xf32> to vector<2x32xf32>
    %492 = arith.negf %491 : vector<2x32xf32>
    %493 = math.exp %492 : vector<2x32xf32>
    %cst_134 = arith.constant 1.000000e+00 : f32
    %494 = vector.broadcast %cst_134 : f32 to vector<2x32xf32>
    %495 = arith.addf %494, %493 : vector<2x32xf32>
    %496 = arith.divf %494, %495 : vector<2x32xf32>
    %497 = arith.mulf %488, %437 : vector<2x32xf32>
    %498 = arith.mulf %482, %490 : vector<2x32xf32>
    %499 = arith.addf %497, %498 : vector<2x32xf32>
    %500 = math.tanh %499 : vector<2x32xf32>
    %501 = arith.mulf %496, %500 : vector<2x32xf32>
    %502 = vector.shape_cast %501 : vector<2x32xf32> to vector<2x1x32xf32>
    "tpu.trace_start"() <{level = 10 : i32, message = "bqh,bsh->bqs"}> : () -> ()
    %cst_135 = arith.constant dense<0.000000e+00> : vector<2x1x8xf32>
    %503 = tpu.matmul %502, %335, %cst_135 {dimension_numbers = #tpu.dot_dimension_numbers<[2], [2], [1], [1], [0, 0, 0, 1, 1, 1], [0], [0]>} : vector<2x1x32xf32>, vector<2x8x32xf32>, vector<2x1x8xf32> -> vector<2x1x8xf32>
    "tpu.trace_stop"() : () -> ()
    %504 = vector.shape_cast %503 : vector<2x1x8xf32> to vector<2x8xf32>
    %cst_136 = arith.constant dense<0xFF800000> : vector<2xf32>
    %505 = vector.multi_reduction <maximumf>, %504, %cst_136 [1] : vector<2x8xf32> to vector<2xf32>
    %506 = vector.shape_cast %505 : vector<2xf32> to vector<2x1xf32>
    %507 = vector.broadcast %506 : vector<2x1xf32> to vector<2x8xf32>
    %508 = arith.subf %504, %507 : vector<2x8xf32>
    %509 = math.exp %508 : vector<2x8xf32>
    %cst_137 = arith.constant dense<0.000000e+00> : vector<2xf32>
    %510 = vector.multi_reduction <add>, %509, %cst_137 [1] : vector<2x8xf32> to vector<2xf32>
    %511 = vector.shape_cast %510 : vector<2xf32> to vector<2x1xf32>
    %512 = tpu.reciprocal %511 : vector<2x1xf32> -> vector<2x1xf32>
    %513 = vector.broadcast %512 : vector<2x1xf32> to vector<2x8xf32>
    %514 = arith.mulf %509, %513 : vector<2x8xf32>
    %515 = vector.shape_cast %514 : vector<2x8xf32> to vector<2x1x8xf32>
    "tpu.trace_start"() <{level = 10 : i32, message = "bqs,bsh->bqh"}> : () -> ()
    %cst_138 = arith.constant dense<0.000000e+00> : vector<2x1x32xf32>
    %516 = tpu.matmul %515, %331, %cst_138 {dimension_numbers = #tpu.dot_dimension_numbers<[2], [1], [1], [2], [0, 0, 0, 1, 1, 2], [0], [0]>} : vector<2x1x8xf32>, vector<2x8x32xf32>, vector<2x1x32xf32> -> vector<2x1x32xf32>
    "tpu.trace_stop"() : () -> ()
    %517 = vector.shape_cast %516 : vector<2x1x32xf32> to vector<2x32xf32>
    %518 = tpu.concatenate %517, %501 in 1 : vector<2x32xf32>, vector<2x32xf32> -> vector<2x64xf32>
    %cst_139 = arith.constant dense<0.000000e+00> : vector<2x32xf32>
    %519 = tpu.matmul %518, %338, %cst_139 {dimension_numbers = #tpu.dot_dimension_numbers<[1], [0], [0], [1], [0, 0, 1, 1], [], []>} : vector<2x64xf32>, vector<64x32xf32>, vector<2x32xf32> -> vector<2x32xf32>
    %520 = math.tanh %519 : vector<2x32xf32>
    %521 = arith.index_cast %c2_i32_126 : i32 to index
    %c0_140 = arith.constant 0 : index
    %c0_141 = arith.constant 0 : index
    %522 = vector.load %arg10[%521, %c0_140, %c0_141] : memref<6x2x32xf32, #tpu.memory_space<vmem>>, vector<1x2x32xf32>
    %523 = vector.shape_cast %522 : vector<1x2x32xf32> to vector<2x32xf32>
    %524 = vector.shape_cast %520 : vector<2x32xf32> to vector<1x2x32xf32>
    tpu.vector_store %arg10[%521, %c0_140, %c0_141], %524 {strides = array<i32>} : memref<6x2x32xf32, #tpu.memory_space<vmem>>, vector<1x2x32xf32>,
    %c3_i32_142 = arith.constant 3 : i32
    %525 = arith.index_cast %c3_i32_142 : i32 to index
    %c0_143 = arith.constant 0 : index
    %526 = memref.load %arg1[%525, %c0_143] : memref<6x2xi32, #tpu.memory_space<smem>>
    %527 = arith.index_cast %526 : i32 to index
    %c0_144 = arith.constant 0 : index
    %528 = vector.load %arg3[%527, %c0_144] : memref<16x128xf32, #tpu.memory_space<vmem>>, vector<1x128xf32>
    %529 = arith.index_cast %c3_i32_142 : i32 to index
    %c1_145 = arith.constant 1 : index
    %530 = memref.load %arg1[%529, %c1_145] : memref<6x2xi32, #tpu.memory_space<smem>>
    %531 = arith.index_cast %530 : i32 to index
    %c0_146 = arith.constant 0 : index
    %532 = vector.load %arg3[%531, %c0_146] : memref<16x128xf32, #tpu.memory_space<vmem>>, vector<1x128xf32>
    %533 = tpu.concatenate %528, %532 in 0 : vector<1x128xf32>, vector<1x128xf32> -> vector<2x128xf32>
    %534 = tpu.concatenate %520, %501 in 1 : vector<2x32xf32>, vector<2x32xf32> -> vector<2x64xf32>
    %cst_147 = arith.constant dense<0.000000e+00> : vector<2x128xf32>
    %535 = tpu.matmul %534, %336, %cst_147 {dimension_numbers = #tpu.dot_dimension_numbers<[1], [0], [0], [1], [0, 0, 1, 1], [], []>} : vector<2x64xf32>, vector<64x128xf32>, vector<2x128xf32> -> vector<2x128xf32>
    %536 = arith.addf %533, %535 : vector<2x128xf32>
    %537 = vector.broadcast %337 : vector<1x128xf32> to vector<2x128xf32>
    %538 = arith.addf %536, %537 : vector<2x128xf32>
    %539 = vector.extract_strided_slice %538 {offsets = [0, 0], sizes = [2, 32], strides = [1, 1]} : vector<2x128xf32> to vector<2x32xf32>
    %540 = arith.negf %539 : vector<2x32xf32>
    %541 = math.exp %540 : vector<2x32xf32>
    %cst_148 = arith.constant 1.000000e+00 : f32
    %542 = vector.broadcast %cst_148 : f32 to vector<2x32xf32>
    %543 = arith.addf %542, %541 : vector<2x32xf32>
    %544 = arith.divf %542, %543 : vector<2x32xf32>
    %545 = vector.extract_strided_slice %538 {offsets = [0, 32], sizes = [2, 32], strides = [1, 1]} : vector<2x128xf32> to vector<2x32xf32>
    %546 = arith.negf %545 : vector<2x32xf32>
    %547 = math.exp %546 : vector<2x32xf32>
    %cst_149 = arith.constant 1.000000e+00 : f32
    %548 = vector.broadcast %cst_149 : f32 to vector<2x32xf32>
    %549 = arith.addf %548, %547 : vector<2x32xf32>
    %550 = arith.divf %548, %549 : vector<2x32xf32>
    %551 = vector.extract_strided_slice %538 {offsets = [0, 64], sizes = [2, 32], strides = [1, 1]} : vector<2x128xf32> to vector<2x32xf32>
    %552 = math.tanh %551 : vector<2x32xf32>
    %553 = vector.extract_strided_slice %538 {offsets = [0, 96], sizes = [2, 32], strides = [1, 1]} : vector<2x128xf32> to vector<2x32xf32>
    %554 = arith.negf %553 : vector<2x32xf32>
    %555 = math.exp %554 : vector<2x32xf32>
    %cst_150 = arith.constant 1.000000e+00 : f32
    %556 = vector.broadcast %cst_150 : f32 to vector<2x32xf32>
    %557 = arith.addf %556, %555 : vector<2x32xf32>
    %558 = arith.divf %556, %557 : vector<2x32xf32>
    %559 = arith.mulf %550, %499 : vector<2x32xf32>
    %560 = arith.mulf %544, %552 : vector<2x32xf32>
    %561 = arith.addf %559, %560 : vector<2x32xf32>
    %562 = math.tanh %561 : vector<2x32xf32>
    %563 = arith.mulf %558, %562 : vector<2x32xf32>
    %564 = vector.shape_cast %563 : vector<2x32xf32> to vector<2x1x32xf32>
    "tpu.trace_start"() <{level = 10 : i32, message = "bqh,bsh->bqs"}> : () -> ()
    %cst_151 = arith.constant dense<0.000000e+00> : vector<2x1x8xf32>
    %565 = tpu.matmul %564, %335, %cst_151 {dimension_numbers = #tpu.dot_dimension_numbers<[2], [2], [1], [1], [0, 0, 0, 1, 1, 1], [0], [0]>} : vector<2x1x32xf32>, vector<2x8x32xf32>, vector<2x1x8xf32> -> vector<2x1x8xf32>
    "tpu.trace_stop"() : () -> ()
    %566 = vector.shape_cast %565 : vector<2x1x8xf32> to vector<2x8xf32>
    %cst_152 = arith.constant dense<0xFF800000> : vector<2xf32>
    %567 = vector.multi_reduction <maximumf>, %566, %cst_152 [1] : vector<2x8xf32> to vector<2xf32>
    %568 = vector.shape_cast %567 : vector<2xf32> to vector<2x1xf32>
    %569 = vector.broadcast %568 : vector<2x1xf32> to vector<2x8xf32>
    %570 = arith.subf %566, %569 : vector<2x8xf32>
    %571 = math.exp %570 : vector<2x8xf32>
    %cst_153 = arith.constant dense<0.000000e+00> : vector<2xf32>
    %572 = vector.multi_reduction <add>, %571, %cst_153 [1] : vector<2x8xf32> to vector<2xf32>
    %573 = vector.shape_cast %572 : vector<2xf32> to vector<2x1xf32>
    %574 = tpu.reciprocal %573 : vector<2x1xf32> -> vector<2x1xf32>
    %575 = vector.broadcast %574 : vector<2x1xf32> to vector<2x8xf32>
    %576 = arith.mulf %571, %575 : vector<2x8xf32>
    %577 = vector.shape_cast %576 : vector<2x8xf32> to vector<2x1x8xf32>
    "tpu.trace_start"() <{level = 10 : i32, message = "bqs,bsh->bqh"}> : () -> ()
    %cst_154 = arith.constant dense<0.000000e+00> : vector<2x1x32xf32>
    %578 = tpu.matmul %577, %331, %cst_154 {dimension_numbers = #tpu.dot_dimension_numbers<[2], [1], [1], [2], [0, 0, 0, 1, 1, 2], [0], [0]>} : vector<2x1x8xf32>, vector<2x8x32xf32>, vector<2x1x32xf32> -> vector<2x1x32xf32>
    "tpu.trace_stop"() : () -> ()
    %579 = vector.shape_cast %578 : vector<2x1x32xf32> to vector<2x32xf32>
    %580 = tpu.concatenate %579, %563 in 1 : vector<2x32xf32>, vector<2x32xf32> -> vector<2x64xf32>
    %cst_155 = arith.constant dense<0.000000e+00> : vector<2x32xf32>
    %581 = tpu.matmul %580, %338, %cst_155 {dimension_numbers = #tpu.dot_dimension_numbers<[1], [0], [0], [1], [0, 0, 1, 1], [], []>} : vector<2x64xf32>, vector<64x32xf32>, vector<2x32xf32> -> vector<2x32xf32>
    %582 = math.tanh %581 : vector<2x32xf32>
    %583 = arith.index_cast %c3_i32_142 : i32 to index
    %c0_156 = arith.constant 0 : index
    %c0_157 = arith.constant 0 : index
    %584 = vector.load %arg10[%583, %c0_156, %c0_157] : memref<6x2x32xf32, #tpu.memory_space<vmem>>, vector<1x2x32xf32>
    %585 = vector.shape_cast %584 : vector<1x2x32xf32> to vector<2x32xf32>
    %586 = vector.shape_cast %582 : vector<2x32xf32> to vector<1x2x32xf32>
    tpu.vector_store %arg10[%583, %c0_156, %c0_157], %586 {strides = array<i32>} : memref<6x2x32xf32, #tpu.memory_space<vmem>>, vector<1x2x32xf32>,
    %c4_i32_158 = arith.constant 4 : i32
    %587 = arith.index_cast %c4_i32_158 : i32 to index
    %c0_159 = arith.constant 0 : index
    %588 = memref.load %arg1[%587, %c0_159] : memref<6x2xi32, #tpu.memory_space<smem>>
    %589 = arith.index_cast %588 : i32 to index
    %c0_160 = arith.constant 0 : index
    %590 = vector.load %arg3[%589, %c0_160] : memref<16x128xf32, #tpu.memory_space<vmem>>, vector<1x128xf32>
    %591 = arith.index_cast %c4_i32_158 : i32 to index
    %c1_161 = arith.constant 1 : index
    %592 = memref.load %arg1[%591, %c1_161] : memref<6x2xi32, #tpu.memory_space<smem>>
    %593 = arith.index_cast %592 : i32 to index
    %c0_162 = arith.constant 0 : index
    %594 = vector.load %arg3[%593, %c0_162] : memref<16x128xf32, #tpu.memory_space<vmem>>, vector<1x128xf32>
    %595 = tpu.concatenate %590, %594 in 0 : vector<1x128xf32>, vector<1x128xf32> -> vector<2x128xf32>
    %596 = tpu.concatenate %582, %563 in 1 : vector<2x32xf32>, vector<2x32xf32> -> vector<2x64xf32>
    %cst_163 = arith.constant dense<0.000000e+00> : vector<2x128xf32>
    %597 = tpu.matmul %596, %336, %cst_163 {dimension_numbers = #tpu.dot_dimension_numbers<[1], [0], [0], [1], [0, 0, 1, 1], [], []>} : vector<2x64xf32>, vector<64x128xf32>, vector<2x128xf32> -> vector<2x128xf32>
    %598 = arith.addf %595, %597 : vector<2x128xf32>
    %599 = vector.broadcast %337 : vector<1x128xf32> to vector<2x128xf32>
    %600 = arith.addf %598, %599 : vector<2x128xf32>
    %601 = vector.extract_strided_slice %600 {offsets = [0, 0], sizes = [2, 32], strides = [1, 1]} : vector<2x128xf32> to vector<2x32xf32>
    %602 = arith.negf %601 : vector<2x32xf32>
    %603 = math.exp %602 : vector<2x32xf32>
    %cst_164 = arith.constant 1.000000e+00 : f32
    %604 = vector.broadcast %cst_164 : f32 to vector<2x32xf32>
    %605 = arith.addf %604, %603 : vector<2x32xf32>
    %606 = arith.divf %604, %605 : vector<2x32xf32>
    %607 = vector.extract_strided_slice %600 {offsets = [0, 32], sizes = [2, 32], strides = [1, 1]} : vector<2x128xf32> to vector<2x32xf32>
    %608 = arith.negf %607 : vector<2x32xf32>
    %609 = math.exp %608 : vector<2x32xf32>
    %cst_165 = arith.constant 1.000000e+00 : f32
    %610 = vector.broadcast %cst_165 : f32 to vector<2x32xf32>
    %611 = arith.addf %610, %609 : vector<2x32xf32>
    %612 = arith.divf %610, %611 : vector<2x32xf32>
    %613 = vector.extract_strided_slice %600 {offsets = [0, 64], sizes = [2, 32], strides = [1, 1]} : vector<2x128xf32> to vector<2x32xf32>
    %614 = math.tanh %613 : vector<2x32xf32>
    %615 = vector.extract_strided_slice %600 {offsets = [0, 96], sizes = [2, 32], strides = [1, 1]} : vector<2x128xf32> to vector<2x32xf32>
    %616 = arith.negf %615 : vector<2x32xf32>
    %617 = math.exp %616 : vector<2x32xf32>
    %cst_166 = arith.constant 1.000000e+00 : f32
    %618 = vector.broadcast %cst_166 : f32 to vector<2x32xf32>
    %619 = arith.addf %618, %617 : vector<2x32xf32>
    %620 = arith.divf %618, %619 : vector<2x32xf32>
    %621 = arith.mulf %612, %561 : vector<2x32xf32>
    %622 = arith.mulf %606, %614 : vector<2x32xf32>
    %623 = arith.addf %621, %622 : vector<2x32xf32>
    %624 = math.tanh %623 : vector<2x32xf32>
    %625 = arith.mulf %620, %624 : vector<2x32xf32>
    %626 = vector.shape_cast %625 : vector<2x32xf32> to vector<2x1x32xf32>
    "tpu.trace_start"() <{level = 10 : i32, message = "bqh,bsh->bqs"}> : () -> ()
    %cst_167 = arith.constant dense<0.000000e+00> : vector<2x1x8xf32>
    %627 = tpu.matmul %626, %335, %cst_167 {dimension_numbers = #tpu.dot_dimension_numbers<[2], [2], [1], [1], [0, 0, 0, 1, 1, 1], [0], [0]>} : vector<2x1x32xf32>, vector<2x8x32xf32>, vector<2x1x8xf32> -> vector<2x1x8xf32>
    "tpu.trace_stop"() : () -> ()
    %628 = vector.shape_cast %627 : vector<2x1x8xf32> to vector<2x8xf32>
    %cst_168 = arith.constant dense<0xFF800000> : vector<2xf32>
    %629 = vector.multi_reduction <maximumf>, %628, %cst_168 [1] : vector<2x8xf32> to vector<2xf32>
    %630 = vector.shape_cast %629 : vector<2xf32> to vector<2x1xf32>
    %631 = vector.broadcast %630 : vector<2x1xf32> to vector<2x8xf32>
    %632 = arith.subf %628, %631 : vector<2x8xf32>
    %633 = math.exp %632 : vector<2x8xf32>
    %cst_169 = arith.constant dense<0.000000e+00> : vector<2xf32>
    %634 = vector.multi_reduction <add>, %633, %cst_169 [1] : vector<2x8xf32> to vector<2xf32>
    %635 = vector.shape_cast %634 : vector<2xf32> to vector<2x1xf32>
    %636 = tpu.reciprocal %635 : vector<2x1xf32> -> vector<2x1xf32>
    %637 = vector.broadcast %636 : vector<2x1xf32> to vector<2x8xf32>
    %638 = arith.mulf %633, %637 : vector<2x8xf32>
    %639 = vector.shape_cast %638 : vector<2x8xf32> to vector<2x1x8xf32>
    "tpu.trace_start"() <{level = 10 : i32, message = "bqs,bsh->bqh"}> : () -> ()
    %cst_170 = arith.constant dense<0.000000e+00> : vector<2x1x32xf32>
    %640 = tpu.matmul %639, %331, %cst_170 {dimension_numbers = #tpu.dot_dimension_numbers<[2], [1], [1], [2], [0, 0, 0, 1, 1, 2], [0], [0]>} : vector<2x1x8xf32>, vector<2x8x32xf32>, vector<2x1x32xf32> -> vector<2x1x32xf32>
    "tpu.trace_stop"() : () -> ()
    %641 = vector.shape_cast %640 : vector<2x1x32xf32> to vector<2x32xf32>
    %642 = tpu.concatenate %641, %625 in 1 : vector<2x32xf32>, vector<2x32xf32> -> vector<2x64xf32>
    %cst_171 = arith.constant dense<0.000000e+00> : vector<2x32xf32>
    %643 = tpu.matmul %642, %338, %cst_171 {dimension_numbers = #tpu.dot_dimension_numbers<[1], [0], [0], [1], [0, 0, 1, 1], [], []>} : vector<2x64xf32>, vector<64x32xf32>, vector<2x32xf32> -> vector<2x32xf32>
    %644 = math.tanh %643 : vector<2x32xf32>
    %645 = arith.index_cast %c4_i32_158 : i32 to index
    %c0_172 = arith.constant 0 : index
    %c0_173 = arith.constant 0 : index
    %646 = vector.load %arg10[%645, %c0_172, %c0_173] : memref<6x2x32xf32, #tpu.memory_space<vmem>>, vector<1x2x32xf32>
    %647 = vector.shape_cast %646 : vector<1x2x32xf32> to vector<2x32xf32>
    %648 = vector.shape_cast %644 : vector<2x32xf32> to vector<1x2x32xf32>
    tpu.vector_store %arg10[%645, %c0_172, %c0_173], %648 {strides = array<i32>} : memref<6x2x32xf32, #tpu.memory_space<vmem>>, vector<1x2x32xf32>,
    %c5_i32_174 = arith.constant 5 : i32
    %649 = arith.index_cast %c5_i32_174 : i32 to index
    %c0_175 = arith.constant 0 : index
    %650 = memref.load %arg1[%649, %c0_175] : memref<6x2xi32, #tpu.memory_space<smem>>
    %651 = arith.index_cast %650 : i32 to index
    %c0_176 = arith.constant 0 : index
    %652 = vector.load %arg3[%651, %c0_176] : memref<16x128xf32, #tpu.memory_space<vmem>>, vector<1x128xf32>
    %653 = arith.index_cast %c5_i32_174 : i32 to index
    %c1_177 = arith.constant 1 : index
    %654 = memref.load %arg1[%653, %c1_177] : memref<6x2xi32, #tpu.memory_space<smem>>
    %655 = arith.index_cast %654 : i32 to index
    %c0_178 = arith.constant 0 : index
    %656 = vector.load %arg3[%655, %c0_178] : memref<16x128xf32, #tpu.memory_space<vmem>>, vector<1x128xf32>
    %657 = tpu.concatenate %652, %656 in 0 : vector<1x128xf32>, vector<1x128xf32> -> vector<2x128xf32>
    %658 = tpu.concatenate %644, %625 in 1 : vector<2x32xf32>, vector<2x32xf32> -> vector<2x64xf32>
    %cst_179 = arith.constant dense<0.000000e+00> : vector<2x128xf32>
    %659 = tpu.matmul %658, %336, %cst_179 {dimension_numbers = #tpu.dot_dimension_numbers<[1], [0], [0], [1], [0, 0, 1, 1], [], []>} : vector<2x64xf32>, vector<64x128xf32>, vector<2x128xf32> -> vector<2x128xf32>
    %660 = arith.addf %657, %659 : vector<2x128xf32>
    %661 = vector.broadcast %337 : vector<1x128xf32> to vector<2x128xf32>
    %662 = arith.addf %660, %661 : vector<2x128xf32>
    %663 = vector.extract_strided_slice %662 {offsets = [0, 0], sizes = [2, 32], strides = [1, 1]} : vector<2x128xf32> to vector<2x32xf32>
    %664 = arith.negf %663 : vector<2x32xf32>
    %665 = math.exp %664 : vector<2x32xf32>
    %cst_180 = arith.constant 1.000000e+00 : f32
    %666 = vector.broadcast %cst_180 : f32 to vector<2x32xf32>
    %667 = arith.addf %666, %665 : vector<2x32xf32>
    %668 = arith.divf %666, %667 : vector<2x32xf32>
    %669 = vector.extract_strided_slice %662 {offsets = [0, 32], sizes = [2, 32], strides = [1, 1]} : vector<2x128xf32> to vector<2x32xf32>
    %670 = arith.negf %669 : vector<2x32xf32>
    %671 = math.exp %670 : vector<2x32xf32>
    %cst_181 = arith.constant 1.000000e+00 : f32
    %672 = vector.broadcast %cst_181 : f32 to vector<2x32xf32>
    %673 = arith.addf %672, %671 : vector<2x32xf32>
    %674 = arith.divf %672, %673 : vector<2x32xf32>
    %675 = vector.extract_strided_slice %662 {offsets = [0, 64], sizes = [2, 32], strides = [1, 1]} : vector<2x128xf32> to vector<2x32xf32>
    %676 = math.tanh %675 : vector<2x32xf32>
    %677 = vector.extract_strided_slice %662 {offsets = [0, 96], sizes = [2, 32], strides = [1, 1]} : vector<2x128xf32> to vector<2x32xf32>
    %678 = arith.negf %677 : vector<2x32xf32>
    %679 = math.exp %678 : vector<2x32xf32>
    %cst_182 = arith.constant 1.000000e+00 : f32
    %680 = vector.broadcast %cst_182 : f32 to vector<2x32xf32>
    %681 = arith.addf %680, %679 : vector<2x32xf32>
    %682 = arith.divf %680, %681 : vector<2x32xf32>
    %683 = arith.mulf %674, %623 : vector<2x32xf32>
    %684 = arith.mulf %668, %676 : vector<2x32xf32>
    %685 = arith.addf %683, %684 : vector<2x32xf32>
    %686 = math.tanh %685 : vector<2x32xf32>
    %687 = arith.mulf %682, %686 : vector<2x32xf32>
    %688 = vector.shape_cast %687 : vector<2x32xf32> to vector<2x1x32xf32>
    "tpu.trace_start"() <{level = 10 : i32, message = "bqh,bsh->bqs"}> : () -> ()
    %cst_183 = arith.constant dense<0.000000e+00> : vector<2x1x8xf32>
    %689 = tpu.matmul %688, %335, %cst_183 {dimension_numbers = #tpu.dot_dimension_numbers<[2], [2], [1], [1], [0, 0, 0, 1, 1, 1], [0], [0]>} : vector<2x1x32xf32>, vector<2x8x32xf32>, vector<2x1x8xf32> -> vector<2x1x8xf32>
    "tpu.trace_stop"() : () -> ()
    %690 = vector.shape_cast %689 : vector<2x1x8xf32> to vector<2x8xf32>
    %cst_184 = arith.constant dense<0xFF800000> : vector<2xf32>
    %691 = vector.multi_reduction <maximumf>, %690, %cst_184 [1] : vector<2x8xf32> to vector<2xf32>
    %692 = vector.shape_cast %691 : vector<2xf32> to vector<2x1xf32>
    %693 = vector.broadcast %692 : vector<2x1xf32> to vector<2x8xf32>
    %694 = arith.subf %690, %693 : vector<2x8xf32>
    %695 = math.exp %694 : vector<2x8xf32>
    %cst_185 = arith.constant dense<0.000000e+00> : vector<2xf32>
    %696 = vector.multi_reduction <add>, %695, %cst_185 [1] : vector<2x8xf32> to vector<2xf32>
    %697 = vector.shape_cast %696 : vector<2xf32> to vector<2x1xf32>
    %698 = tpu.reciprocal %697 : vector<2x1xf32> -> vector<2x1xf32>
    %699 = vector.broadcast %698 : vector<2x1xf32> to vector<2x8xf32>
    %700 = arith.mulf %695, %699 : vector<2x8xf32>
    %701 = vector.shape_cast %700 : vector<2x8xf32> to vector<2x1x8xf32>
    "tpu.trace_start"() <{level = 10 : i32, message = "bqs,bsh->bqh"}> : () -> ()
    %cst_186 = arith.constant dense<0.000000e+00> : vector<2x1x32xf32>
    %702 = tpu.matmul %701, %331, %cst_186 {dimension_numbers = #tpu.dot_dimension_numbers<[2], [1], [1], [2], [0, 0, 0, 1, 1, 2], [0], [0]>} : vector<2x1x8xf32>, vector<2x8x32xf32>, vector<2x1x32xf32> -> vector<2x1x32xf32>
    "tpu.trace_stop"() : () -> ()
    %703 = vector.shape_cast %702 : vector<2x1x32xf32> to vector<2x32xf32>
    %704 = tpu.concatenate %703, %687 in 1 : vector<2x32xf32>, vector<2x32xf32> -> vector<2x64xf32>
    %cst_187 = arith.constant dense<0.000000e+00> : vector<2x32xf32>
    %705 = tpu.matmul %704, %338, %cst_187 {dimension_numbers = #tpu.dot_dimension_numbers<[1], [0], [0], [1], [0, 0, 1, 1], [], []>} : vector<2x64xf32>, vector<64x32xf32>, vector<2x32xf32> -> vector<2x32xf32>
    %706 = math.tanh %705 : vector<2x32xf32>
    %707 = arith.index_cast %c5_i32_174 : i32 to index
    %c0_188 = arith.constant 0 : index
    %c0_189 = arith.constant 0 : index
    %708 = vector.load %arg10[%707, %c0_188, %c0_189] : memref<6x2x32xf32, #tpu.memory_space<vmem>>, vector<1x2x32xf32>
    %709 = vector.shape_cast %708 : vector<1x2x32xf32> to vector<2x32xf32>
    %710 = vector.shape_cast %706 : vector<2x32xf32> to vector<1x2x32xf32>
    tpu.vector_store %arg10[%707, %c0_188, %c0_189], %710 {strides = array<i32>} : memref<6x2x32xf32, #tpu.memory_space<vmem>>, vector<1x2x32xf32>,
    %c6_i32_190 = arith.constant 6 : i32
    return
  }
}

</mosaic_0001>

<bundles_post_ra>
// kernel: nmt_forward.1
= control target key start
LH: loop header
LB: loop body
LE: loop exit
PB: predicated region body
PF: predicated region fallthrough
CT: control target
= control target key end

     0   :  { %15 = vsyncpa [#allocation5], 0  ;;  %s6838_s0 = inlined_call_operand.vmem [shape: s32[8,2], index: 0, kind: input, shape index: {}]   ;;  %s6839_s1 = inlined_call_operand.vmem [shape: s32[6,2], index: 1, kind: input, shape index: {}]   ;;  %s6840_s2 = inlined_call_operand.vmem [shape: f32[16,128], index: 2, kind: input, shape index: {}]   ;;  %s6841_s3 = inlined_call_operand.vmem [shape: f32[16,128], index: 3, kind: input, shape index: {}]   ;;  %s6842_s4 = inlined_call_operand.vmem [shape: f32[32,128], index: 4, kind: input, shape index: {}]   ;;  %s6843_s5 = inlined_call_operand.vmem [shape: f32[1,128], index: 5, kind: input, shape index: {}]   ;;  %s6844_s6 = inlined_call_operand.vmem [shape: f32[64,128], index: 6, kind: input, shape index: {}]   ;;  %s6845_s7 = inlined_call_operand.vmem [shape: f32[1,128], index: 7, kind: input, shape index: {}]   ;;  %s6846_s8 = inlined_call_operand.vmem [shape: f32[32,32], index: 8, kind: input, shape index: {}]   ;;  %s6847_s9 = inlined_call_operand.vmem [shape: f32[64,32], index: 9, kind: input, shape index: {}]   ;;  %s6848_s10 = inlined_call_operand.hbm [shape: f32[6,2,32], index: 10, kind: output, shape index: {}]  }
   0x1   :  { %16 = vsyncpa [#allocation7], 0 }
   0x2   :  { %17 = vsyncpa [#allocation4], 0  ;;  %s24_s15 = sshll.u32 %s6838_s0, 4  ;;  %s34_s18 = sshll.u32 %s6839_s1, 4  ;;  %s25_s15 = int_to_ptr.vmem [resolvable:$true] %s24_s15  ;;  %s35_s18 = int_to_ptr.vmem [resolvable:$true] %s34_s18 }
   0x3   :  { %s5874_s19 = scalar_lea.vmem %s25_s15, 128  ;;  %p5879_p1 = scmp.lt.s32.totalorder %s25_s15, %s25_s15 }
   0x4   :  { %p5875_p0 = scmp.ne.s32.totalorder %s25_s15, %s5874_s19  ;;  %p5880_p2 = scmp.lt.s32.totalorder %s5874_s19, %s5874_s19 }
   0x6   :  { %p5881_p3 = por %p5880_p2, %p5879_p1 }
   0x8   :  { %p5882_p4 = pnand %p5881_p3, %p5875_p0 }
   0xa   :  { %5885 = shalt.err (!%p5882_p4)
}
   0xb   :  { %s5926_s20 = smov [#allocation3]   ;;  %s5886_s21 = scalar_lea.vmem %s35_s18, 128 }
   0xc   :  { %27 = dma.vmem_to_smem %s25_s15, 128, %s5926_s20, [#allocation5]  }
   0xd   :  { %p5887_p5 = scmp.ne.s32.totalorder %s35_s18, %s5886_s21  ;;  %p5891_p6 = scmp.lt.s32.totalorder %s35_s18, %s35_s18 }
   0xe   :  { %p5892_p7 = scmp.lt.s32.totalorder %s5886_s21, %s5886_s21 }
  0x10   :  { %p5893_p8 = por %p5892_p7, %p5891_p6 }
  0x12   :  { %p5894_p9 = pnand %p5893_p8, %p5887_p5 }
  0x14   :  { %5897 = shalt.err (!%p5894_p9)
}
  0x15   :  { %s5927_s0 = smov [#allocation6]  }
  0x16   :  { %37 = dma.vmem_to_smem %s35_s18, 128, %s5927_s0, [#allocation7]  }
  0x17   :  { %5920 = dma.done.wait [#allocation5], 128  }
  0x18   :  { %5921 = vsyncadd [#allocation5], 4294967168 }
  0x19   :  { %5922 = dma.done.wait [#allocation7], 128  }
  0x1a   :  { %5923 = vsyncadd [#allocation7], 4294967168 }
  0x1b   :  { %60 = sfence }
  0x1c   :  { %v61_v0 = vld [vmem:[%s6842_s4] sm:$0xff]  ;;  %v62_v1 = vld [vmem:[%s6842_s4 + $0x8] sm:$0xff]  ;;  %v63_v2 = vld [vmem:[%s6842_s4 + $0x10] sm:$0xff]  ;;  %v5928_v3 = vmov 0.0|0.0   ;;  %vm5929_vm0 = vmmov 0   ;;  %v5930_v6 = vmov 0.0  }
  0x1d   :  { %5501 = vmatprep.subr.bf16.mxu1 %v5928_v3  ;;  %v6007_v4 = vpack.c.bf16 %v62_v1, %v61_v0  ;;  %v64_v5 = vld [vmem:[%s6842_s4 + $0x18] sm:$0xff]  ;;  %5062 = vmatprep.mubr.msk.f32.mxu1 %vm5929_vm0, %v5930_v6  ;;  %s4753_s4 = sld [smem:[#allocation3 + $0x1]]  ;;  %s66_s29 = sld [smem:[#allocation3]]  ;;  %vm75_vm1 = vcmask 1040384   ;;  %v6044_v12 = vld [vmem:[%s6843_s5] ss:$0 sm:$0xff] }
  0x1e   :  { %5513 = vmatprep.subr.bf16.mxu0 %v5928_v3  ;;  %5084 = vmatprep.mubr.msk.f32.mxu0 %vm5929_vm0, %v5930_v6  ;;  %v6018_v7 = vpack.c.bf16 %v64_v5, %v63_v2  ;;  %s5931_s18 = smov 64   ;;  %s5932_s5 = smov 32   ;;  %vm77_vm2 = vcmask 261120   ;;  %vm220_vm3 = vcmask 253952   ;;  %vm1384_vm4 = vcmask 523264  }
  0x1f   :  { %5503 = vmatpush3.bf16.msra.mxu1 %v6007_v4  ;;  %5515 = vmatpush3.bf16.msra.mxu0 %v6007_v4  ;;  %s4757_s19 = sld [smem:[#allocation3 + $0x81]]  ;;  %s4756_s20 = sld [smem:[#allocation3 + $0x80]]  ;;  %vm1678_vm5 = vcmask 1041409   ;;  %vm1681_vm6 = vcmask 58368   ;;  %vm1710_vm7 = vcmask 64512   ;;  %vm1940_vm8 = vcmask 254976  }
  0x20   :  { %5504 = vmatprep.subr.bf16.mxu1 %v5928_v3  ;;  %5516 = vmatprep.subr.bf16.mxu0 %v5928_v3  ;;  %s4761_s25 = sld [smem:[#allocation3 + $0x101]]  ;;  %s4760_s26 = sld [smem:[#allocation3 + $0x100]] }
  0x21   :  { %s4764_s13 = sld [smem:[#allocation3 + $0x180]]  ;;  %s4769_s21 = sld [smem:[#allocation3 + $0x201]] }
  0x22   :  { %s4768_s0 = sld [smem:[#allocation3 + $0x200]]  ;;  %s4773_s27 = sld [smem:[#allocation3 + $0x281]] }
  0x23   :  { %5506 = vmatpush3.bf16.msra.mxu1 %v6018_v7  ;;  %5518 = vmatpush3.bf16.msra.mxu0 %v6018_v7  ;;  %s70_s12 = scalar_lea.vmem %s6840_s2, %s4753_s4  ;;  %s67_s15 = scalar_lea.vmem %s6840_s2, %s66_s29 }
  0x24   :  { %5507 = vmatprep.subr.bf16.mxu1 %v5928_v3  ;;  %5525 = vmatprep.subr.bf16.mxu0 %v5928_v3  ;;  %v71_v8 = vld [vmem:[%s70_s12] sm:$0x1]  ;;  %s4765_s12 = sld [smem:[#allocation3 + $0x181]]  ;;  %s4772_s28 = sld [smem:[#allocation3 + $0x280]] }
  0x25   :  { %v73_v9 = vrot.slane %v71_v8, 7  ;;  %v68_v10 = vld [vmem:[%s67_s15] sm:$0x1]  ;;  %s227_s1 = scalar_lea.vmem %s6840_s2, %s4757_s19  ;;  %s224_s24 = scalar_lea.vmem %s6840_s2, %s4756_s20 }
  0x26   :  { %5063 = vmatmul.mubr.f32.vlgmr.msra.gmra.mrb[0].mxu1 %v5930_v6  ;;  %v228_v31 = vld [vmem:[%s227_s1] sm:$0x1]  ;;  %s376_s4 = scalar_lea.vmem %s6840_s2, %s4761_s25  ;;  %s373_s11 = scalar_lea.vmem %s6840_s2, %s4760_s26 }
  0x27   :  { %5509 = vmatpush3.bf16.msra.mxu1 %v6007_v4  ;;  %5073 = vmatprep.mubr.msk.f32.mxu1 %vm5929_vm0, %v5930_v6  ;;  %v76_v11 = vsel %vm75_vm1, %v68_v10, %v73_v9  ;;  %v230_v32 = vrot.slane %v228_v31, 7  ;;  %v225_v33 = vld [vmem:[%s224_s24] sm:$0x1]  ;;  %s522_s20 = scalar_lea.vmem %s6840_s2, %s4764_s13  ;;  %s674_s23 = scalar_lea.vmem %s6840_s2, %s4769_s21 }
  0x28   :  { %5510 = vmatprep.subr.bf16.mxu1 %v5928_v3  ;;  %v377_v53 = vld [vmem:[%s376_s4] sm:$0x1]  ;;  %s671_s26 = scalar_lea.vmem %s6840_s2, %s4768_s0  ;;  %s823_s30 = scalar_lea.vmem %s6840_s2, %s4773_s27 }
  0x29   :  { %v232_v34 = vsel %vm75_vm1, %v225_v33, %v230_v32  ;;  %v379_v54 = vrot.slane %v377_v53, 7  ;;  %v374_v55 = vld [vmem:[%s373_s11] sm:$0x1]  ;;  %s4777_s14 = sld [smem:[#allocation3 + $0x301]]  ;;  %s4776_s15 = sld [smem:[#allocation3 + $0x300]] }
  0x2a   :  { %s525_s16 = scalar_lea.vmem %s6840_s2, %s4765_s12  ;;  %s820_s13 = scalar_lea.vmem %s6840_s2, %s4772_s28 }
  0x2b   :  { %5512 = vmatpush3.bf16.msra.mxu1 %v6018_v7  ;;  %v381_v56 = vsel %vm75_vm1, %v374_v55, %v379_v54  ;;  %s4781_s1 = sld [smem:[#allocation3 + $0x381]]  ;;  %s4780_s22 = sld [smem:[#allocation3 + $0x380]] }
  0x2c   :  { %5519 = vmatprep.subr.bf16.mxu1 %v5928_v3  ;;  %s4842_s12 = sld [smem:[#allocation6 + $0x281]] }
  0x2f   :  { %s972_s19 = scalar_lea.vmem %s6840_s2, %s4777_s14  ;;  %s969_s0 = scalar_lea.vmem %s6840_s2, %s4776_s15 }
  0x30   :  { %s4809_s14 = sld [smem:[#allocation6 + $0x101]]  ;;  %s4808_s15 = sld [smem:[#allocation6 + $0x100]] }
  0x31   :  { %s1121_s25 = scalar_lea.vmem %s6840_s2, %s4781_s1  ;;  %s1118_s28 = scalar_lea.vmem %s6840_s2, %s4780_s22 }
  0x32   :  { %s1370_s2 = sld [smem:[#allocation6]]  ;;  %s4820_s1 = sld [smem:[#allocation6 + $0x181]] }
  0x38   :  { %s3052_s24 = scalar_lea.vmem %s6841_s3, %s4820_s1 }
  0xf9   :  { %v147_v13 = vpop.f32.mrb[0].mxu1 }
  0xfa   :  { %v151_v14 = vadd.f32 %v147_v13, %v76_v11  ;;  %v5064_v15 = vpop.f32.mrb[1].mxu1 }
  0xfc   :  { %v158_v16 = vadd.f32 %v6044_v12, %v151_v14 }
  0xfe   :  { %5711 = vtanh.f32 %v158_v16  ;;  %v4755_v18 = vmul.f32 -1.442695, %v158_v16  ;;  %v526_v16 = vld [vmem:[%s525_s16] sm:$0x1]  ;;  %s4158_s16 = scalar_lea.vmem %s6841_s3, %s4842_s12 }
 0x100   :  { %5713 = vpow2.f32 %v4755_v18  ;;  %v523_v18 = vld [vmem:[%s522_s20] sm:$0x1] }
 0x108   :  { %v5712_v17 = vpop.eup %5711 }
 0x109   :  { %168 = vrot.lane.b32.xlu0 %v5712_v17, %s5931_s18  ;;  %v528_v17 = vrot.slane %v526_v16, 7 }
 0x10a   :  { %v5714_v19 = vpop.eup %5713 }
 0x10b   :  { %v162_v20 = vadd.f32 1.0, %v5714_v19  ;;  %v530_v19 = vsel %vm75_vm1, %v523_v18, %v528_v17 }
 0x10d   :  { %5715 = vrcp.f32 %v162_v20 }
 0x117   :  { %v5716_v21 = vpop.eup %5715 }
 0x118   :  { %v166_v24 = vmul.f32 0.0, %v5716_v21 }
 0x17b   :  { %v169_v22 = vpop.permute.xlu0 %168 }
 0x17c   :  { %v171_v23 = vmul.f32 %v5716_v21, %v169_v22 }
 0x17e   :  { %173 = vrot.lane.b32.xlu0 %v171_v23, %s5932_s5 }
 0x1f0   :  { %v174_v25 = vpop.permute.xlu0 %173 }
 0x1f1   :  { %v176_v26 = vadd.f32 %v174_v25, %v166_v24 }
 0x1f3   :  { %5717 = vtanh.f32 %v176_v26 }
 0x1fd   :  { %v5718_v27 = vpop.eup %5717 }
 0x1fe   :  { %179 = vrot.lane.b32.xlu1 %v5718_v27, %s5931_s18 }
 0x270   :  { %v180_v28 = vpop.permute.xlu1 %179 }
 0x271   :  { %v6050_v29 = vmul.f32 %v5716_v21, %v180_v28 }
 0x273   :  { %233 = vrot.lane.b32.xlu1 %v6050_v29, %s5932_s5 }
 0x2e5   :  { %v234_v30 = vpop.permute.xlu1 %233 }
 0x2e6   :  { %5074 = vmatmul.mubr.msk.f32.vlgmr.msra.gmra.mrb[2].mxu1 %vm77_vm2, %v234_v30 }
 0x2e7   :  { %5521 = vmatpush3.bf16.msra.mxu1 %v6007_v4  ;;  %5095 = vmatprep.mubr.msk.f32.mxu1 %vm5929_vm0, %v5930_v6 }
 0x2e8   :  { %5522 = vmatprep.subr.bf16.mxu1 %v5928_v3 }
 0x2eb   :  { %5524 = vmatpush3.bf16.msra.mxu1 %v6018_v7 }
 0x2ec   :  { %5531 = vmatprep.subr.bf16.mxu1 %v5928_v3 }
 0x3b9   :  { %v303_v35 = vpop.f32.mrb[2].mxu1 }
 0x3ba   :  { %v307_v36 = vadd.f32 %v303_v35, %v232_v34  ;;  %v5075_v37 = vpop.f32.mrb[3].mxu1 }
 0x3bc   :  { %v308_v38 = vadd.f32 %v6044_v12, %v307_v36 }
 0x3be   :  { %5719 = vtanh.f32 %v308_v38  ;;  %v4759_v40 = vmul.f32 -1.442695, %v308_v38 }
 0x3c0   :  { %5721 = vpow2.f32 %v4759_v40 }
 0x3c8   :  { %v5720_v39 = vpop.eup %5719 }
 0x3c9   :  { %318 = vrot.lane.b32.xlu0 %v5720_v39, %s5931_s18  ;;  %v675_v39 = vld [vmem:[%s674_s23] sm:$0x1] }
 0x3ca   :  { %v5722_v41 = vpop.eup %5721  ;;  %v677_v40 = vrot.slane %v675_v39, 7 }
 0x3cb   :  { %v312_v42 = vadd.f32 1.0, %v5722_v41  ;;  %v672_v41 = vld [vmem:[%s671_s26] sm:$0x1] }
 0x3cd   :  { %5723 = vrcp.f32 %v312_v42  ;;  %v679_v42 = vsel %vm75_vm1, %v672_v41, %v677_v40 }
 0x3d7   :  { %v5724_v43 = vpop.eup %5723 }
 0x3d8   :  { %v316_v46 = vmul.f32 %v5724_v43, %v176_v26 }
 0x43b   :  { %v319_v44 = vpop.permute.xlu0 %318 }
 0x43c   :  { %v321_v45 = vmul.f32 %v5724_v43, %v319_v44 }
 0x43e   :  { %323 = vrot.lane.b32.xlu1 %v321_v45, %s5932_s5 }
 0x4b0   :  { %v324_v47 = vpop.permute.xlu1 %323 }
 0x4b1   :  { %v326_v48 = vadd.f32 %v324_v47, %v316_v46 }
 0x4b3   :  { %5725 = vtanh.f32 %v326_v48 }
 0x4bd   :  { %v5726_v49 = vpop.eup %5725 }
 0x4be   :  { %329 = vrot.lane.b32.xlu0 %v5726_v49, %s5931_s18 }
 0x530   :  { %v330_v50 = vpop.permute.xlu0 %329 }
 0x531   :  { %v6072_v51 = vmul.f32 %v5724_v43, %v330_v50 }
 0x533   :  { %382 = vrot.lane.b32.xlu1 %v6072_v51, %s5932_s5 }
 0x5a5   :  { %v383_v52 = vpop.permute.xlu1 %382 }
 0x5a6   :  { %5085 = vmatmul.mubr.msk.f32.vlgmr.msra.gmra.mrb[0].mxu0 %vm77_vm2, %v383_v52 }
 0x5a7   :  { %5527 = vmatpush3.bf16.msra.mxu0 %v6007_v4  ;;  %5106 = vmatprep.mubr.msk.f32.mxu0 %vm5929_vm0, %v5930_v6 }
 0x5a8   :  { %5528 = vmatprep.subr.bf16.mxu0 %v5928_v3 }
 0x5ab   :  { %5530 = vmatpush3.bf16.msra.mxu0 %v6018_v7 }
 0x5ac   :  { %5537 = vmatprep.subr.bf16.mxu0 %v5928_v3 }
 0x679   :  { %v452_v57 = vpop.f32.mrb[0].mxu0 }
 0x67a   :  { %v456_v58 = vadd.f32 %v452_v57, %v381_v56  ;;  %v5086_v59 = vpop.f32.mrb[1].mxu0 }
 0x67c   :  { %v457_v60 = vadd.f32 %v6044_v12, %v456_v58 }
 0x67e   :  { %5727 = vtanh.f32 %v457_v60  ;;  %v4763_v62 = vmul.f32 -1.442695, %v457_v60 }
 0x680   :  { %5729 = vpow2.f32 %v4763_v62  ;;  %v824_v62 = vld [vmem:[%s823_s30] sm:$0x1] }
 0x688   :  { %v5728_v61 = vpop.eup %5727 }
 0x689   :  { %467 = vrot.lane.b32.xlu0 %v5728_v61, %s5931_s18 }
 0x68a   :  { %v5730_v63 = vpop.eup %5729 }
 0x68b   :  { %v461_v0 = vadd.f32 1.0, %v5730_v63  ;;  %v821_v63 = vld [vmem:[%s820_s13] sm:$0x1]  ;;  %s1371_s13 = scalar_lea.vmem %s6841_s3, %s1370_s2  ;;  %s4797_s2 = sld [smem:[#allocation6 + $0x80]] }
 0x68d   :  { %5731 = vrcp.f32 %v461_v0 }
 0x697   :  { %v5732_v1 = vpop.eup %5731 }
 0x698   :  { %v465_v8 = vmul.f32 %v5732_v1, %v326_v48 }
 0x6fb   :  { %v468_v2 = vpop.permute.xlu0 %467 }
 0x6fc   :  { %v470_v5 = vmul.f32 %v5732_v1, %v468_v2 }
 0x6fe   :  { %472 = vrot.lane.b32.xlu1 %v470_v5, %s5932_s5 }
 0x770   :  { %v473_v9 = vpop.permute.xlu1 %472 }
 0x771   :  { %v475_v10 = vadd.f32 %v473_v9, %v465_v8 }
 0x773   :  { %5733 = vtanh.f32 %v475_v10 }
 0x77d   :  { %v5734_v11 = vpop.eup %5733 }
 0x77e   :  { %478 = vrot.lane.b32.xlu0 %v5734_v11, %s5931_s18 }
 0x7f0   :  { %v479_v13 = vpop.permute.xlu0 %478 }
 0x7f1   :  { %v6094_v14 = vmul.f32 %v5732_v1, %v479_v13 }
 0x7f3   :  { %531 = vrot.lane.b32.xlu1 %v6094_v14, %s5932_s5 }
 0x865   :  { %v532_v15 = vpop.permute.xlu1 %531 }
 0x866   :  { %5096 = vmatmul.mubr.msk.f32.vlgmr.msra.gmra.mrb[4].mxu1 %vm77_vm2, %v532_v15 }
 0x867   :  { %5533 = vmatpush3.bf16.msra.mxu1 %v6007_v4  ;;  %5117 = vmatprep.mubr.msk.f32.mxu1 %vm5929_vm0, %v5930_v6 }
 0x868   :  { %5534 = vmatprep.subr.bf16.mxu1 %v5928_v3 }
 0x86b   :  { %5536 = vmatpush3.bf16.msra.mxu1 %v6018_v7 }
 0x86c   :  { %5543 = vmatprep.subr.bf16.mxu1 %v5928_v3 }
 0x939   :  { %v601_v20 = vpop.f32.mrb[4].mxu1 }
 0x93a   :  { %v605_v21 = vadd.f32 %v601_v20, %v530_v19  ;;  %v5097_v22 = vpop.f32.mrb[5].mxu1 }
 0x93c   :  { %v606_v23 = vadd.f32 %v6044_v12, %v605_v21 }
 0x93e   :  { %5735 = vtanh.f32 %v606_v23  ;;  %v4767_v25 = vmul.f32 -1.442695, %v606_v23 }
 0x940   :  { %5737 = vpow2.f32 %v4767_v25 }
 0x948   :  { %v5736_v24 = vpop.eup %5735 }
 0x949   :  { %616 = vrot.lane.b32.xlu0 %v5736_v24, %s5931_s18  ;;  %v973_v24 = vld [vmem:[%s972_s19] sm:$0x1]  ;;  %s2499_s19 = scalar_lea.vmem %s6841_s3, %s4809_s14 }
 0x94a   :  { %v5738_v26 = vpop.eup %5737  ;;  %v975_v25 = vrot.slane %v973_v24, 7 }
 0x94b   :  { %v610_v27 = vadd.f32 1.0, %v5738_v26  ;;  %v970_v26 = vld [vmem:[%s969_s0] sm:$0x1]  ;;  %s2496_s0 = scalar_lea.vmem %s6841_s3, %s4808_s15 }
 0x94d   :  { %5739 = vrcp.f32 %v610_v27  ;;  %v977_v27 = vsel %vm75_vm1, %v970_v26, %v975_v25 }
 0x957   :  { %v5740_v28 = vpop.eup %5739 }
 0x958   :  { %v614_v32 = vmul.f32 %v5740_v28, %v475_v10 }
 0x9bb   :  { %v617_v30 = vpop.permute.xlu0 %616 }
 0x9bc   :  { %v619_v31 = vmul.f32 %v5740_v28, %v617_v30 }
 0x9be   :  { %621 = vrot.lane.b32.xlu1 %v619_v31, %s5932_s5 }
 0xa30   :  { %v622_v33 = vpop.permute.xlu1 %621 }
 0xa31   :  { %v624_v34 = vadd.f32 %v622_v33, %v614_v32 }
 0xa33   :  { %5741 = vtanh.f32 %v624_v34 }
 0xa3d   :  { %v5742_v35 = vpop.eup %5741 }
 0xa3e   :  { %627 = vrot.lane.b32.xlu0 %v5742_v35, %s5931_s18 }
 0xab0   :  { %v628_v36 = vpop.permute.xlu0 %627 }
 0xab1   :  { %v6116_v37 = vmul.f32 %v5740_v28, %v628_v36 }
 0xab3   :  { %680 = vrot.lane.b32.xlu1 %v6116_v37, %s5932_s5 }
 0xb25   :  { %v681_v38 = vpop.permute.xlu1 %680 }
 0xb26   :  { %5107 = vmatmul.mubr.msk.f32.vlgmr.msra.gmra.mrb[2].mxu0 %vm77_vm2, %v681_v38 }
 0xb27   :  { %5539 = vmatpush3.bf16.msra.mxu0 %v6007_v4  ;;  %5128 = vmatprep.mubr.msk.f32.mxu0 %vm5929_vm0, %v5930_v6 }
 0xb28   :  { %5540 = vmatprep.subr.bf16.mxu0 %v5928_v3 }
 0xb2b   :  { %5542 = vmatpush3.bf16.msra.mxu0 %v6018_v7 }
 0xbf9   :  { %v750_v43 = vpop.f32.mrb[2].mxu0 }
 0xbfa   :  { %v754_v44 = vadd.f32 %v750_v43, %v679_v42  ;;  %v5108_v45 = vpop.f32.mrb[3].mxu0 }
 0xbfc   :  { %v755_v46 = vadd.f32 %v6044_v12, %v754_v44 }
 0xbfe   :  { %5743 = vtanh.f32 %v755_v46  ;;  %v4771_v48 = vmul.f32 -1.442695, %v755_v46 }
 0xc00   :  { %5745 = vpow2.f32 %v4771_v48  ;;  %v1122_v48 = vld [vmem:[%s1121_s25] sm:$0x1] }
 0xc08   :  { %v5744_v47 = vpop.eup %5743 }
 0xc09   :  { %765 = vrot.lane.b32.xlu0 %v5744_v47, %s5931_s18 }
 0xc0a   :  { %v5746_v49 = vpop.eup %5745 }
 0xc0b   :  { %v759_v50 = vadd.f32 1.0, %v5746_v49  ;;  %v1124_v49 = vrot.slane %v1122_v48, 7  ;;  %v1360_v48 = vld [vmem:[%s6844_s6 + $0x38] sm:$0xff] }
 0xc0d   :  { %5747 = vrcp.f32 %v759_v50  ;;  %v1119_v50 = vld [vmem:[%s1118_s28] sm:$0x1]  ;;  %s4831_s28 = sld [smem:[#allocation6 + $0x201]] }
 0xc13   :  { %s3605_s4 = scalar_lea.vmem %s6841_s3, %s4831_s28 }
 0xc17   :  { %v5748_v52 = vpop.eup %5747 }
 0xc18   :  { %v763_v55 = vmul.f32 %v5748_v52, %v624_v34 }
 0xc7b   :  { %v766_v53 = vpop.permute.xlu0 %765 }
 0xc7c   :  { %v768_v54 = vmul.f32 %v5748_v52, %v766_v53 }
 0xc7e   :  { %770 = vrot.lane.b32.xlu1 %v768_v54, %s5932_s5 }
 0xcf0   :  { %v771_v56 = vpop.permute.xlu1 %770 }
 0xcf1   :  { %v773_v57 = vadd.f32 %v771_v56, %v763_v55 }
 0xcf3   :  { %5749 = vtanh.f32 %v773_v57 }
 0xcfd   :  { %v5750_v58 = vpop.eup %5749 }
 0xcfe   :  { %776 = vrot.lane.b32.xlu0 %v5750_v58, %s5931_s18 }
 0xd70   :  { %v777_v59 = vpop.permute.xlu0 %776 }
 0xd71   :  { %v6137_v60 = vmul.f32 %v5748_v52, %v777_v59  ;;  %v1126_v52 = vsel %vm75_vm1, %v1119_v50, %v1124_v49 }
 0xd73   :  { %829 = vrot.lane.b32.xlu1 %v6137_v60, %s5932_s5 }
 0xde5   :  { %v830_v61 = vpop.permute.xlu1 %829 }
 0xde6   :  { %5118 = vmatmul.mubr.msk.f32.vlgmr.msra.gmra.mrb[6].mxu1 %vm77_vm2, %v830_v61 }
 0xde7   :  { %5545 = vmatpush3.bf16.msra.mxu1 %v6007_v4  ;;  %5139 = vmatprep.mubr.msk.f32.mxu1 %vm5929_vm0, %v5930_v6  ;;  %v826_v4 = vrot.slane %v824_v62, 7 }
 0xde8   :  { %5546 = vmatprep.subr.bf16.mxu1 %v5928_v3 }
 0xde9   :  { %v828_v0 = vsel %vm75_vm1, %v821_v63, %v826_v4 }
 0xdeb   :  { %5548 = vmatpush3.bf16.msra.mxu1 %v6018_v7 }
 0xdec   :  { %5557 = vmatprep.subr.bf16.mxu1 %v5928_v3 }
 0xeb9   :  { %v899_v1 = vpop.f32.mrb[6].mxu1 }
 0xeba   :  { %v903_v2 = vadd.f32 %v899_v1, %v828_v0  ;;  %v5119_v7 = vpop.f32.mrb[7].mxu1  ;;  %v5933_v0 = vmov 1966171168  }
 0xebb   :  { %v185_v1 = vunpack.c.l.s4 %v5933_v0 }
 0xebc   :  { %v904_v5 = vadd.f32 %v6044_v12, %v903_v2  ;;  %v187_v2 = vlaneseq }
 0xebd   :  { %v186_v7 = vunpack.c.0.s8 %v185_v1 }
 0xebe   :  { %5751 = vtanh.f32 %v904_v5  ;;  %v4775_v9 = vmul.f32 -1.442695, %v904_v5  ;;  %v188_v5 = vshrl.u32 %v187_v2, 7 }
 0xec0   :  { %5753 = vpow2.f32 %v4775_v9 }
 0xec8   :  { %v5752_v8 = vpop.eup %5751 }
 0xec9   :  { %914 = vrot.lane.b32.xlu0 %v5752_v8, %s5931_s18 }
 0xeca   :  { %v5754_v10 = vpop.eup %5753 }
 0xecb   :  { %v908_v11 = vadd.f32 1.0, %v5754_v10  ;;  %v6196_v10 = vsub.s32 %v186_v7, %v188_v5 }
 0xecd   :  { %5755 = vrcp.f32 %v908_v11  ;;  %v190_v11 = vrot.slane %v6050_v29, %v6196_v10 }
 0xed7   :  { %v5756_v13 = vpop.eup %5755 }
 0xed8   :  { %v912_v17 = vmul.f32 %v5756_v13, %v773_v57 }
 0xf3b   :  { %v915_v15 = vpop.permute.xlu0 %914 }
 0xf3c   :  { %v917_v16 = vmul.f32 %v5756_v13, %v915_v15  ;;  %v489_v15 = vrot.slane %v6094_v14, %v6196_v10 }
 0xf3e   :  { %919 = vrot.lane.b32.xlu1 %v917_v16, %s5932_s5  ;;  %v6203_v16 = vsub.s32 0, %v188_v5 }
 0xfb0   :  { %v920_v18 = vpop.permute.xlu1 %919 }
 0xfb1   :  { %v922_v19 = vadd.f32 %v920_v18, %v912_v17  ;;  %v497_v18 = vrot.slane %v489_v15, %v6196_v10 }
 0xfb3   :  { %5757 = vtanh.f32 %v922_v19  ;;  %v508_v14 = vrot.slane %v497_v18, %v6203_v16 }
 0xfbd   :  { %v5758_v20 = vpop.eup %5757 }
 0xfbe   :  { %925 = vrot.lane.b32.xlu0 %v5758_v20, %s5931_s18 }
0x1030   :  { %v926_v21 = vpop.permute.xlu0 %925 }
0x1031   :  { %v6159_v22 = vmul.f32 %v5756_v13, %v926_v21  ;;  %v198_v13 = vrot.slane %v190_v11, %v6196_v10 }
0x1033   :  { %978 = vrot.lane.b32.xlu1 %v6159_v22, %s5932_s5  ;;  %v209_v20 = vrot.slane %v198_v13, %v6203_v16 }
0x10a5   :  { %v979_v23 = vpop.permute.xlu1 %978 }
0x10a6   :  { %5129 = vmatmul.mubr.msk.f32.vlgmr.msra.gmra.mrb[4].mxu0 %vm77_vm2, %v979_v23  ;;  %v191_v23 = vcombine.high %v190_v11, %v190_v11  ;;  %v1269_v11 = vld [vmem:[%s6846_s8 + $0x8] sm:$0xff] }
0x1179   :  { %v1048_v28 = vpop.f32.mrb[4].mxu0 }
0x117a   :  { %v1052_v30 = vadd.f32 %v1048_v28, %v977_v27  ;;  %v5130_v31 = vpop.f32.mrb[5].mxu0  ;;  %v205_v27 = vrot.slane %v191_v23, %v6196_v10 }
0x117c   :  { %v1053_v32 = vadd.f32 %v6044_v12, %v1052_v30  ;;  %v213_v30 = vrot.slane %v205_v27, %v6203_v16 }
0x117e   :  { %5759 = vtanh.f32 %v1053_v32  ;;  %v4779_v34 = vmul.f32 -1.442695, %v1053_v32  ;;  %v1353_v32 = vld [vmem:[%s6844_s6] sm:$0xff] }
0x1180   :  { %5761 = vpow2.f32 %v4779_v34  ;;  %v1355_v34 = vld [vmem:[%s6844_s6 + $0x10] sm:$0xff] }
0x1188   :  { %v5760_v33 = vpop.eup %5759 }
0x1189   :  { %1063 = vrot.lane.b32.xlu0 %v5760_v33, %s5931_s18  ;;  %v1354_v33 = vld [vmem:[%s6844_s6 + $0x8] sm:$0xff] }
0x118a   :  { %v5762_v35 = vpop.eup %5761 }
0x118b   :  { %v1057_v36 = vadd.f32 1.0, %v5762_v35 }
0x118d   :  { %5763 = vrcp.f32 %v1057_v36 }
0x1197   :  { %v5764_v38 = vpop.eup %5763 }
0x1198   :  { %v1061_v41 = vmul.f32 %v5764_v38, %v922_v19  ;;  %v787_v19 = vrot.slane %v6137_v60, %v6196_v10  ;;  %v490_v60 = vcombine.high %v489_v15, %v489_v15 }
0x119a   :  { %v795_v29 = vrot.slane %v787_v19, %v6196_v10  ;;  %v788_v28 = vcombine.high %v787_v19, %v787_v19  ;;  %v504_v31 = vrot.slane %v490_v60, %v6196_v10 }
0x119c   :  { %v806_v25 = vrot.slane %v795_v29, %v6203_v16  ;;  %v512_v36 = vrot.slane %v504_v31, %v6203_v16  ;;  %v1271_v29 = vld [vmem:[%s6846_s8 + $0x18] sm:$0xff] }
0x11fb   :  { %v1064_v39 = vpop.permute.xlu0 %1063 }
0x11fc   :  { %v1066_v40 = vmul.f32 %v5764_v38, %v1064_v39  ;;  %v6235_v39 = vpack.c.bf16 %v1354_v33, %v1353_v32 }
0x11fe   :  { %1068 = vrot.lane.b32.xlu1 %v1066_v40, %s5932_s5  ;;  %v1356_v40 = vld [vmem:[%s6844_s6 + $0x18] sm:$0xff] }
0x1270   :  { %v1069_v42 = vpop.permute.xlu1 %1068 }
0x1271   :  { %v1071_v43 = vadd.f32 %v1069_v42, %v1061_v41  ;;  %v6242_v41 = vpack.c.bf16 %v1356_v40, %v1355_v34  ;;  %v1357_v42 = vld [vmem:[%s6844_s6 + $0x20] sm:$0xff] }
0x1273   :  { %5765 = vtanh.f32 %v1071_v43 }
0x127d   :  { %v5766_v44 = vpop.eup %5765 }
0x127e   :  { %1074 = vrot.lane.b32.xlu0 %v5766_v44, %s5931_s18 }
0x12f0   :  { %v1075_v45 = vpop.permute.xlu0 %1074 }
0x12f1   :  { %v1077_v46 = vmul.f32 %v5764_v38, %v1075_v45  ;;  %v802_v38 = vrot.slane %v788_v28, %v6196_v10 }
0x12f3   :  { %1127 = vrot.lane.b32.xlu1 %v1077_v46, %s5932_s5  ;;  %v1085_v21 = vrot.slane %v1077_v46, %v6196_v10  ;;  %v810_v44 = vrot.slane %v802_v38, %v6203_v16 }
0x12f5   :  { %v1093_v24 = vrot.slane %v1085_v21, %v6196_v10  ;;  %v1086_v35 = vcombine.high %v1085_v21, %v1085_v21 }
0x12f7   :  { %v1104_v26 = vrot.slane %v1093_v24, %v6203_v16  ;;  %v1100_v45 = vrot.slane %v1086_v35, %v6196_v10 }
0x12f9   :  { %v1108_v49 = vrot.slane %v1100_v45, %v6203_v16 }
0x1365   :  { %v1128_v47 = vpop.permute.xlu1 %1127 }
0x1366   :  { %5140 = vmatmul.mubr.msk.f32.vlgmr.msra.gmra.mrb[8].mxu1 %vm77_vm2, %v1128_v47  ;;  %v1359_v47 = vld [vmem:[%s6844_s6 + $0x30] sm:$0xff] }
0x1367   :  { %5169 = vmatprep.mubr.msk.f32.mxu1 %vm5929_vm0, %v5930_v6  ;;  %5559 = vmatpush3.bf16.msra.mxu1 %v6235_v39  ;;  %v6267_v50 = vpack.c.bf16 %v1360_v48, %v1359_v47 }
0x1368   :  { %5560 = vmatprep.subr.bf16.mxu1 %v5928_v3 }
0x136b   :  { %5562 = vmatpush3.bf16.msra.mxu1 %v6242_v41 }
0x136c   :  { %5563 = vmatprep.subr.bf16.mxu1 %v5928_v3 }
0x1439   :  { %v1197_v53 = vpop.f32.mrb[8].mxu1 }
0x143a   :  { %v1201_v54 = vadd.f32 %v1197_v53, %v1126_v52  ;;  %v5141_v55 = vpop.f32.mrb[9].mxu1  ;;  %v340_v52 = vrot.slane %v6072_v51, %v6196_v10 }
0x143b   :  { %v638_v55 = vrot.slane %v6116_v37, %v6196_v10 }
0x143c   :  { %v1202_v56 = vadd.f32 %v6044_v12, %v1201_v54  ;;  %v348_v54 = vrot.slane %v340_v52, %v6196_v10 }
0x143d   :  { %v639_v0 = vcombine.high %v638_v55, %v638_v55 }
0x143e   :  { %5767 = vtanh.f32 %v1202_v56  ;;  %v4783_v58 = vmul.f32 -1.442695, %v1202_v56  ;;  %v359_v51 = vrot.slane %v348_v54, %v6203_v16 }
0x143f   :  { %v653_v5 = vrot.slane %v639_v0, %v6196_v10 }
0x1440   :  { %5769 = vpow2.f32 %v4783_v58  ;;  %v646_v58 = vrot.slane %v638_v55, %v6196_v10 }
0x1441   :  { %v661_v18 = vrot.slane %v653_v5, %v6203_v16 }
0x1448   :  { %v5768_v57 = vpop.eup %5767 }
0x1449   :  { %1212 = vrot.lane.b32.xlu0 %v5768_v57, %s5931_s18 }
0x144a   :  { %v5770_v59 = vpop.eup %5769 }
0x144b   :  { %v1206_v61 = vadd.f32 1.0, %v5770_v59  ;;  %v936_v59 = vrot.slane %v6159_v22, %v6196_v10 }
0x144d   :  { %5771 = vrcp.f32 %v1206_v61  ;;  %v944_v37 = vrot.slane %v936_v59, %v6196_v10 }
0x144f   :  { %v955_v22 = vrot.slane %v944_v37, %v6203_v16 }
0x1457   :  { %v6188_v62 = vpop.eup %5771 }
0x1458   :  { %v1210_v12 = vmul.f32 %v6188_v62, %v1071_v43  ;;  %v1358_v43 = vld [vmem:[%s6844_s6 + $0x28] sm:$0xff]  ;;  %s4819_s6 = sld [smem:[#allocation6 + $0x180]] }
0x1459   :  { %v6255_v46 = vpack.c.bf16 %v1358_v43, %v1357_v42 }
0x145b   :  { %5565 = vmatpush3.bf16.msra.mxu1 %v6255_v46 }
0x145c   :  { %5566 = vmatprep.subr.bf16.mxu1 %v5928_v3 }
0x145e   :  { %s3049_s27 = scalar_lea.vmem %s6841_s3, %s4819_s6 }
0x145f   :  { %5568 = vmatpush3.bf16.msra.mxu1 %v6267_v50 }
0x1460   :  { %5187 = vmatprep.subr.mxu1 %v5930_v6 }
0x14bb   :  { %v1213_v4 = vpop.permute.xlu0 %1212 }
0x14bc   :  { %v1215_v63 = vmul.f32 %v6188_v62, %v1213_v4  ;;  %v341_v4 = vcombine.high %v340_v52, %v340_v52 }
0x14be   :  { %1217 = vrot.lane.b32.xlu1 %v1215_v63, %s5932_s5  ;;  %v355_v1 = vrot.slane %v341_v4, %v6196_v10 }
0x14c0   :  { %v363_v7 = vrot.slane %v355_v1, %v6203_v16 }
0x1530   :  { %v1218_v8 = vpop.permute.xlu1 %1217 }
0x1531   :  { %v6193_v9 = vadd.f32 %v1218_v8, %v1210_v12  ;;  %v937_v12 = vcombine.high %v936_v59, %v936_v59  ;;  %v1268_v8 = vld [vmem:[%s6846_s8] sm:$0xff] }
0x1532   :  { %v5549_v15 = vpack.c.bf16 %v1269_v11, %v1268_v8 }
0x1533   :  { %5773 = vtanh.f32 %v6193_v9  ;;  %v951_v19 = vrot.slane %v937_v12, %v6196_v10 }
0x1534   :  { %5550 = vmatprep.subr.bf16.mxu0 %v5549_v15 }
0x1535   :  { %5552 = vmatpush3.bf16.msra.mxu0 %v5549_v15 }
0x153d   :  { %v5774_v17 = vpop.eup %5773 }
0x153e   :  { %1223 = vrot.lane.b32.xlu0 %v5774_v17, %s5931_s18 }
0x1542   :  { %214 = vrot.lane.b32.xlu0 %v209_v20, %s5932_s5  ;;  %v1270_v20 = vld [vmem:[%s6846_s8 + $0x10] sm:$0xff]  ;;  %s4786_s8 = sld [smem:[#allocation6 + $0x1]] }
0x1543   :  { %v5553_v21 = vpack.c.bf16 %v1271_v29, %v1270_v20 }
0x1545   :  { %5554 = vmatprep.subr.bf16.mxu0 %v5553_v21 }
0x1546   :  { %513 = vrot.lane.b32.xlu0 %v508_v14, %s5932_s5  ;;  %5556 = vmatpush3.bf16.msra.mxu0 %v5553_v21 }
0x1547   :  { %5172 = vmatprep.subr.mxu0 %v5930_v6 }
0x1548   :  { %s1374_s30 = scalar_lea.vmem %s6841_s3, %s4786_s8  ;;  %s4830_s8 = sld [smem:[#allocation6 + $0x200]] }
0x1549   :  { %v1375_v47 = vld [vmem:[%s1374_s30] sm:$0x1] }
0x154a   :  { %811 = vrot.lane.b32.xlu0 %v806_v25, %s5932_s5  ;;  %v959_v25 = vrot.slane %v951_v19, %v6203_v16  ;;  %v1377_v48 = vrot.slane %v1375_v47, 7 }
0x154e   :  { %1109 = vrot.lane.b32.xlu0 %v1104_v26, %s5932_s5  ;;  %s3602_s11 = scalar_lea.vmem %s6841_s3, %s4830_s8 }
0x1552   :  { %216 = vrot.lane.b32.xlu0 %v213_v30, %s5932_s5 }
0x1556   :  { %515 = vrot.lane.b32.xlu0 %v512_v36, %s5932_s5 }
0x155a   :  { %813 = vrot.lane.b32.xlu0 %v810_v44, %s5932_s5 }
0x155e   :  { %1111 = vrot.lane.b32.xlu0 %v1108_v49, %s5932_s5  ;;  %v1372_v49 = vld [vmem:[%s1371_s13] sm:$0x1]  ;;  %s1943_s13 = scalar_lea.vmem %s6841_s3, %s4797_s2 }
0x155f   :  { %v1379_v52 = vsel %vm75_vm1, %v1372_v49, %v1377_v48 }
0x15b0   :  { %v1224_v53 = vpop.permute.xlu0 %1223 }
0x15b1   :  { %v1226_v56 = vmul.f32 %v6188_v62, %v1224_v53  ;;  %v657_v62 = vrot.slane %v646_v58, %v6203_v16  ;;  %v6360_v53 = vld [vmem:[%s6845_s7] ss:$0 sm:$0xff] }
0x15b3   :  { %1380 = vrot.lane.b32.xlu1 %v1226_v56, %s5931_s18  ;;  %v1234_v17 = vrot.slane %v1226_v56, %v6196_v10 }
0x15b4   :  { %v215_v57 = vpop.permute.xlu0 %214 }
0x15b5   :  { %221 = vst.msk [vmem:[#allocation2] sm:$0x1] %vm220_vm3, %v215_v57  ;;  %v1235_v23 = vcombine.high %v1234_v17, %v1234_v17  ;;  %v1242_v24 = vrot.slane %v1234_v17, %v6196_v10 }
0x15b7   :  { %364 = vrot.lane.b32.xlu1 %v359_v51, %s5932_s5  ;;  %v1253_v26 = vrot.slane %v1242_v24, %v6203_v16  ;;  %v1249_v27 = vrot.slane %v1235_v23, %v6196_v10 }
0x15b8   :  { %v514_v61 = vpop.permute.xlu0 %513 }
0x15b9   :  { %519 = vst.msk [vmem:[#allocation2 + $0x2] sm:$0x1] %vm220_vm3, %v514_v61  ;;  %v1257_v30 = vrot.slane %v1249_v27, %v6203_v16 }
0x15bb   :  { %662 = vrot.lane.b32.xlu1 %v657_v62, %s5932_s5 }
0x15bc   :  { %v812_v63 = vpop.permute.xlu0 %811 }
0x15bd   :  { %817 = vst.msk [vmem:[#allocation2 + $0x4] sm:$0x1] %vm220_vm3, %v812_v63 }
0x15bf   :  { %960 = vrot.lane.b32.xlu1 %v955_v22, %s5932_s5 }
0x15c0   :  { %v1110_v2 = vpop.permute.xlu0 %1109 }
0x15c1   :  { %1115 = vst.msk [vmem:[#allocation2 + $0x6] sm:$0x1] %vm220_vm3, %v1110_v2 }
0x15c3   :  { %366 = vrot.lane.b32.xlu1 %v363_v7, %s5932_s5 }
0x15c4   :  { %v217_v13 = vpop.permute.xlu0 %216 }
0x15c5   :  { %222 = vst.msk [vmem:[#allocation2 + $0x8] sm:$0x1] %vm220_vm3, %v217_v13 }
0x15c7   :  { %664 = vrot.lane.b32.xlu1 %v661_v18, %s5932_s5 }
0x15c8   :  { %v516_v14 = vpop.permute.xlu0 %515 }
0x15c9   :  { %520 = vst.msk [vmem:[#allocation2 + $0xa] sm:$0x1] %vm220_vm3, %v516_v14 }
0x15cb   :  { %962 = vrot.lane.b32.xlu1 %v959_v25, %s5932_s5 }
0x15cc   :  { %v814_v60 = vpop.permute.xlu0 %813 }
0x15cd   :  { %818 = vst.msk [vmem:[#allocation2 + $0xc] sm:$0x1] %vm220_vm3, %v814_v60 }
0x15cf   :  { %1258 = vrot.lane.b32.xlu1 %v1253_v26, %s5932_s5 }
0x15d0   :  { %v1112_v28 = vpop.permute.xlu0 %1111 }
0x15d1   :  { %1116 = vst.msk [vmem:[#allocation2 + $0xe] sm:$0x1] %vm220_vm3, %v1112_v28 }
0x15d3   :  { %1260 = vrot.lane.b32.xlu1 %v1257_v30, %s5932_s5 }
0x1625   :  { %v1381_v31 = vpop.permute.xlu1 %1380 }
0x1626   :  { %v1383_v32 = vsel %vm77_vm2, 0.0, %v1381_v31 }
0x1627   :  { %5170 = vmatmul.mubr.msk.f32.vlgmr.msra.gmra.mrb[10].mxu1 %vm1384_vm4, %v1383_v32 }
0x1628   :  { %5189 = vmatprep.mubr.msk.f32.mxu1 %vm5929_vm0, %v5930_v6 }
0x1629   :  { %v365_v33 = vpop.permute.xlu1 %364 }
0x162a   :  { %370 = vst.msk [vmem:[#allocation2 + $0x1] sm:$0x1] %vm220_vm3, %v365_v33 }
0x162d   :  { %v663_v34 = vpop.permute.xlu1 %662 }
0x162e   :  { %668 = vst.msk [vmem:[#allocation2 + $0x3] sm:$0x1] %vm220_vm3, %v663_v34 }
0x1631   :  { %v961_v35 = vpop.permute.xlu1 %960 }
0x1632   :  { %966 = vst.msk [vmem:[#allocation2 + $0x5] sm:$0x1] %vm220_vm3, %v961_v35 }
0x1635   :  { %v367_v36 = vpop.permute.xlu1 %366 }
0x1636   :  { %371 = vst.msk [vmem:[#allocation2 + $0x9] sm:$0x1] %vm220_vm3, %v367_v36 }
0x1639   :  { %v665_v38 = vpop.permute.xlu1 %664 }
0x163a   :  { %669 = vst.msk [vmem:[#allocation2 + $0xb] sm:$0x1] %vm220_vm3, %v665_v38 }
0x163d   :  { %v963_v40 = vpop.permute.xlu1 %962 }
0x163e   :  { %967 = vst.msk [vmem:[#allocation2 + $0xd] sm:$0x1] %vm220_vm3, %v963_v40  ;;  %v1362_v40 = vld [vmem:[%s6847_s9] sm:$0xff] }
0x1641   :  { %v1259_v42 = vpop.permute.xlu1 %1258 }
0x1642   :  { %1264 = vst.msk [vmem:[#allocation2 + $0x7] sm:$0x1] %vm220_vm3, %v1259_v42  ;;  %v1363_v42 = vld [vmem:[%s6847_s9 + $0x8] sm:$0xff] }
0x1643   :  { %v6406_v47 = vpack.c.bf16 %v1363_v42, %v1362_v40 }
0x1645   :  { %v1261_v43 = vpop.permute.xlu1 %1260 }
0x1646   :  { %1265 = vst.msk [vmem:[#allocation2 + $0xf] sm:$0x1] %vm220_vm3, %v1261_v43 }
0x1649   :  { %v6338_v44 = vld [vmem:[#allocation2] sm:$0xff] }
0x164a   :  { %5150 = vmatprep.mubr.msk.f32.mxu0 %vm77_vm2, %v6338_v44 }
0x164d   :  { %v6342_v45 = vld [vmem:[#allocation2 + $0x8] sm:$0xff] }
0x164e   :  { %5151 = vmatmul.mubr.msk.f32.vlgmr.msra.gmra.mrb[6].mxu0 %vm77_vm2, %v6342_v45  ;;  %5188 = vmatpush3.msra.mxu1 %v6342_v45 }
0x164f   :  { %5174 = vmatprep.mubr.msk.f32.mxu0 %vm5929_vm0, %v5930_v6  ;;  %5581 = vmatprep.subr.bf16.mxu1 %v5928_v3 }
0x16fa   :  { %v1454_v54 = vpop.f32.mrb[10].mxu1 }
0x16fb   :  { %v1458_v55 = vadd.f32 %v1454_v54, %v1379_v52  ;;  %v5171_v56 = vpop.f32.mrb[11].mxu1  ;;  %v1364_v52 = vld [vmem:[%s6847_s9 + $0x10] sm:$0xff]  ;;  %v1365_v54 = vld [vmem:[%s6847_s9 + $0x18] sm:$0xff] }
0x16fc   :  { %v6416_v56 = vpack.c.bf16 %v1365_v54, %v1364_v52 }
0x16fd   :  { %v1465_v57 = vadd.f32 %v6360_v53, %v1458_v55 }
0x16ff   :  { %5775 = vtanh.f32 %v1465_v57  ;;  %v4789_v61 = vmul.f32 -1.442695, %v1465_v57  ;;  %v1366_v57 = vld [vmem:[%s6847_s9 + $0x20] sm:$0xff] }
0x1701   :  { %5777 = vpow2.f32 %v4789_v61 }
0x1709   :  { %v5776_v58 = vpop.eup %5775 }
0x170a   :  { %1475 = vrot.lane.b32.xlu0 %v5776_v58, %s5931_s18  ;;  %v1367_v58 = vld [vmem:[%s6847_s9 + $0x28] sm:$0xff] }
0x170b   :  { %v5778_v4 = vpop.eup %5777  ;;  %v6433_v61 = vpack.c.bf16 %v1367_v58, %v1366_v57 }
0x170c   :  { %v1469_v37 = vadd.f32 1.0, %v5778_v4  ;;  %v1368_v4 = vld [vmem:[%s6847_s9 + $0x30] sm:$0xff] }
0x170e   :  { %5779 = vrcp.f32 %v1469_v37  ;;  %v1369_v37 = vld [vmem:[%s6847_s9 + $0x38] sm:$0xff]  ;;  %s4798_s9 = sld [smem:[#allocation6 + $0x81]] }
0x1714   :  { %s1946_s30 = scalar_lea.vmem %s6841_s3, %s4798_s9 }
0x1718   :  { %v5780_v62 = vpop.eup %5779 }
0x1719   :  { %v1473_v22 = vmul.f32 %v5780_v62, %v6193_v9 }
0x1721   :  { %v6364_v59 = vpop.f32.mrb[6].mxu0 }
0x1722   :  { %v6366_v51 = vpop.f32.mrb[7].mxu0 }
0x1723   :  { %5173 = vmatpush3.xpose.msk.msra.mxu0 %vm77_vm2, %v6366_v51 }
0x1724   :  { %5177 = vmatprep.subr.mxu0 %v5930_v6 }
0x177c   :  { %v1476_v63 = vpop.permute.xlu0 %1475 }
0x177d   :  { %v1478_v0 = vmul.f32 %v5780_v62, %v1476_v63 }
0x177f   :  { %1480 = vrot.lane.b32.xlu1 %v1478_v0, %s5932_s5 }
0x17f1   :  { %v1481_v1 = vpop.permute.xlu1 %1480 }
0x17f2   :  { %v6373_v2 = vadd.f32 %v1481_v1, %v1473_v22 }
0x17f4   :  { %5781 = vtanh.f32 %v6373_v2 }
0x17fe   :  { %v5782_v12 = vpop.eup %5781 }
0x17ff   :  { %1486 = vrot.lane.b32.xlu0 %v5782_v12, %s5931_s18 }
0x1871   :  { %v1487_v7 = vpop.permute.xlu0 %1486 }
0x1872   :  { %v1489_v5 = vmul.f32 %v5780_v62, %v1487_v7  ;;  %v6445_v62 = vpack.c.bf16 %v1369_v37, %v1368_v4 }
0x1874   :  { %v1497_v8 = vrot.slane %v1489_v5, %v6196_v10 }
0x1876   :  { %v1498_v11 = vcombine.high %v1497_v8, %v1497_v8  ;;  %v1505_v13 = vrot.slane %v1497_v8, %v6196_v10 }
0x1878   :  { %v1516_v15 = vrot.slane %v1505_v13, %v6203_v16  ;;  %v1512_v17 = vrot.slane %v1498_v11, %v6196_v10 }
0x187a   :  { %1517 = vrot.lane.b32.xlu1 %v1516_v15, %s5932_s5  ;;  %v1597_v9 = vrot.slane %v1512_v17, %v6203_v16 }
0x187c   :  { %1598 = vrot.lane.b32.xlu0 %v1597_v9, %s5932_s5  ;;  %v1947_v9 = vld [vmem:[%s1946_s30] sm:$0x1] }
0x18ec   :  { %v1518_v18 = vpop.permute.xlu1 %1517 }
0x18ed   :  { %5175 = vmatmul.mubr.msk.f32.vlgmr.msra.gmra.mrb[8].mxu0 %vm77_vm2, %v1518_v18  ;;  %v1949_v18 = vrot.slane %v1947_v9, 7 }
0x18ee   :  { %5178 = vmatpush3.xpose.msk.msra.mxu0 %vm77_vm2, %v6364_v59  ;;  %5179 = vmatprep.mubr.msk.f32.mxu0 %vm5929_vm0, %v5930_v6  ;;  %v1599_v19 = vpop.permute.xlu0 %1598 }
0x18ef   :  { %5182 = vmatprep.subr.mxu0 %v5930_v6 }
0x18f1   :  { %5180 = vmatmul.mubr.msk.f32.vlgmr.msra.gmra.mrb[10].mxu0 %vm77_vm2, %v1599_v19  ;;  %v1944_v19 = vld [vmem:[%s1943_s13] sm:$0x1]  ;;  %s4841_s13 = sld [smem:[#allocation6 + $0x280]] }
0x18f2   :  { %5183 = vmatpush3.msra.mxu0 %v6338_v44  ;;  %5184 = vmatprep.mubr.msk.f32.mxu0 %vm5929_vm0, %v5930_v6 }
0x18f3   :  { %5569 = vmatprep.subr.bf16.mxu0 %v5928_v3 }
0x18f7   :  { %s4155_s20 = scalar_lea.vmem %s6841_s3, %s4841_s13  ;;  %s5934_s3 = smov [#allocation8]  }
0x19c0   :  { %v1590_v20 = vpop.f32.mrb[8].mxu0 }
0x19c1   :  { %v5176_v29 = vpop.f32.mrb[9].mxu0 }
0x19c4   :  { %v1671_v21 = vpop.f32.mrb[10].mxu0 }
0x19c5   :  { %v1677_v14 = vrot.slane %v1671_v21, 7  ;;  %v5181_v23 = vpop.f32.mrb[11].mxu0 }
0x19c7   :  { %v1679_v24 = vsel %vm1678_vm5, %v1677_v14, %v1590_v20 }
0x19c8   :  { %v1682_v25 = vsel %vm1681_vm6, %v1679_v24, -inf }
0x19c9   :  { %1683 = vmax.xlane.f32.xlu1 %v1682_v25 }
0x1a56   :  { %v1684_v60 = vpop.xlane.xlu1 %1683 }
0x1a57   :  { %v1686_v26 = vrot.slane %v1684_v60, 1  ;;  %v1689_v27 = vsub.f32 %v1590_v20, %v1684_v60  ;;  %v1951_v20 = vsel %vm75_vm1, %v1944_v19, %v1949_v18 }
0x1a59   :  { %v1690_v28 = vsub.f32 %v1671_v21, %v1686_v26  ;;  %v1691_v30 = vmul.f32 1.442695, %v1689_v27 }
0x1a5b   :  { %v1693_v31 = vmul.f32 1.442695, %v1690_v28 }
0x1a5d   :  { %5783 = vpow2.f32 %v1693_v31 }
0x1a5e   :  { %5785 = vpow2.f32 %v1691_v30 }
0x1a67   :  { %v5784_v32 = vpop.eup %5783 }
0x1a68   :  { %v1697_v33 = vrot.slane %v5784_v32, 7  ;;  %v5786_v34 = vpop.eup %5785 }
0x1a6a   :  { %v1698_v35 = vsel %vm1678_vm5, %v1697_v33, %v5786_v34 }
0x1a6b   :  { %v1700_v36 = vsel %vm1681_vm6, %v1698_v35, 0.0 }
0x1a6c   :  { %1701 = vadd.xlane.f32.xlu0 %v1700_v36 }
0x1a82   :  { %1862 = vrot.lane.b32.xlu0 %v1489_v5, %s5931_s18 }
0x1af9   :  { %v1702_v38 = vpop.xlane.xlu0 %1701 }
0x1afa   :  { %5787 = vrcp.f32 %v1702_v38 }
0x1afd   :  { %v1863_v7 = vpop.permute.xlu0 %1862 }
0x1b04   :  { %v5788_v43 = vpop.eup %5787 }
0x1b05   :  { %v1705_v48 = vrot.slane %v5788_v43, 1  ;;  %v1708_v49 = vmul.f32 %v5788_v43, %v5786_v34 }
0x1b07   :  { %5185 = vmatmul.mubr.msk.f32.vlgmr.msra.gmra.mrb[12].mxu0 %vm1710_vm7, %v1708_v49  ;;  %v1709_v55 = vmul.f32 %v5784_v32, %v1705_v48 }
0x1b08   :  { %5571 = vmatpush3.bf16.msra.mxu0 %v6406_v47  ;;  %5208 = vmatprep.mubr.msk.f32.mxu0 %vm5929_vm0, %v5930_v6 }
0x1b09   :  { %5190 = vmatmul.mubr.msk.f32.vlgmr.msra.gmra.mrb[12].mxu1 %vm1710_vm7, %v1709_v55  ;;  %5572 = vmatprep.subr.bf16.mxu0 %v5928_v3 }
0x1b0a   :  { %5583 = vmatpush3.bf16.msra.mxu1 %v6235_v39  ;;  %5227 = vmatprep.mubr.msk.f32.mxu1 %vm5929_vm0, %v5930_v6 }
0x1b0b   :  { %5584 = vmatprep.subr.bf16.mxu1 %v5928_v3 }
0x1b0c   :  { %5574 = vmatpush3.bf16.msra.mxu0 %v6416_v56 }
0x1b0d   :  { %5575 = vmatprep.subr.bf16.mxu0 %v5928_v3 }
0x1b0e   :  { %5586 = vmatpush3.bf16.msra.mxu1 %v6242_v41 }
0x1b0f   :  { %5587 = vmatprep.subr.bf16.mxu1 %v5928_v3 }
0x1b10   :  { %5577 = vmatpush3.bf16.msra.mxu0 %v6433_v61 }
0x1b11   :  { %5578 = vmatprep.subr.bf16.mxu0 %v5928_v3 }
0x1b12   :  { %5589 = vmatpush3.bf16.msra.mxu1 %v6255_v46 }
0x1b13   :  { %5590 = vmatprep.subr.bf16.mxu1 %v5928_v3 }
0x1b14   :  { %5580 = vmatpush3.bf16.msra.mxu0 %v6445_v62 }
0x1b15   :  { %5230 = vmatprep.subr.mxu0 %v5930_v6 }
0x1b16   :  { %5592 = vmatpush3.bf16.msra.mxu1 %v6267_v50 }
0x1b17   :  { %5235 = vmatprep.subr.mxu1 %v5930_v6 }
0x1bda   :  { %v1780_v63 = vpop.f32.mrb[12].mxu0 }
0x1bdb   :  { %v5186_v0 = vpop.f32.mrb[13].mxu0 }
0x1bdc   :  { %v1853_v22 = vpop.f32.mrb[12].mxu1 }
0x1bdd   :  { %v1859_v1 = vrot.slane %v1853_v22, 7  ;;  %v5191_v12 = vpop.f32.mrb[13].mxu1 }
0x1bdf   :  { %v1860_v5 = vsel %vm1678_vm5, %v1859_v1, %v1780_v63 }
0x1be0   :  { %v1865_v8 = vsel %vm77_vm2, %v1860_v5, %v1863_v7 }
0x1be1   :  { %5209 = vmatmul.mubr.msk.f32.vlgmr.msra.gmra.mrb[14].mxu0 %vm1384_vm4, %v1865_v8 }
0x1be2   :  { %5231 = vmatpush3.xpose.msk.msra.mxu0 %vm77_vm2, %v6366_v51  ;;  %5232 = vmatprep.mubr.msk.f32.mxu0 %vm5929_vm0, %v5930_v6 }
0x1be3   :  { %5240 = vmatprep.subr.mxu0 %v5930_v6 }
0x1cb4   :  { %v1935_v11 = vpop.f32.mrb[14].mxu0 }
0x1cb5   :  { %5789 = vtanh.f32 %v1935_v11  ;;  %v5210_v13 = vpop.f32.mrb[15].mxu0 }
0x1cbf   :  { %v5790_v15 = vpop.eup %5789 }
0x1cc0   :  { %1941 = vst.msk [vmem:[#allocation8] sm:$0x3] %vm1940_vm8, %v5790_v15  ;;  %v1952_v17 = vsel %vm77_vm2, %v5790_v15, %v1863_v7 }
0x1cc1   :  { %5228 = vmatmul.mubr.msk.f32.vlgmr.msra.gmra.mrb[14].mxu1 %vm1384_vm4, %v1952_v17 }
0x1cc2   :  { %5236 = vmatpush3.xpose.msk.msra.mxu1 %vm77_vm2, %v6364_v59  ;;  %5237 = vmatprep.mubr.msk.f32.mxu1 %vm5929_vm0, %v5930_v6 }
0x1cc3   :  { %5245 = vmatprep.subr.mxu1 %v5930_v6 }
0x1d94   :  { %v2022_v29 = vpop.f32.mrb[14].mxu1 }
0x1d95   :  { %v2026_v21 = vadd.f32 %v2022_v29, %v1951_v20  ;;  %v5229_v14 = vpop.f32.mrb[15].mxu1 }
0x1d97   :  { %v2027_v23 = vadd.f32 %v6360_v53, %v2026_v21 }
0x1d99   :  { %5791 = vtanh.f32 %v2027_v23  ;;  %v4800_v25 = vmul.f32 -1.442695, %v2027_v23 }
0x1d9b   :  { %5793 = vpow2.f32 %v4800_v25 }
0x1da3   :  { %v5792_v24 = vpop.eup %5791 }
0x1da4   :  { %2037 = vrot.lane.b32.xlu1 %v5792_v24, %s5931_s18 }
0x1da5   :  { %v5794_v60 = vpop.eup %5793 }
0x1da6   :  { %v2031_v26 = vadd.f32 1.0, %v5794_v60 }
0x1da8   :  { %5795 = vrcp.f32 %v2031_v26 }
0x1db2   :  { %v5796_v27 = vpop.eup %5795 }
0x1db3   :  { %v2035_v31 = vmul.f32 %v5796_v27, %v6373_v2 }
0x1e16   :  { %v2038_v28 = vpop.permute.xlu1 %2037 }
0x1e17   :  { %v2040_v30 = vmul.f32 %v5796_v27, %v2038_v28 }
0x1e19   :  { %2042 = vrot.lane.b32.xlu1 %v2040_v30, %s5932_s5 }
0x1e8b   :  { %v2043_v32 = vpop.permute.xlu1 %2042 }
0x1e8c   :  { %v6481_v33 = vadd.f32 %v2043_v32, %v2035_v31 }
0x1e8e   :  { %5797 = vtanh.f32 %v6481_v33 }
0x1e98   :  { %v5798_v34 = vpop.eup %5797 }
0x1e99   :  { %2048 = vrot.lane.b32.xlu0 %v5798_v34, %s5931_s18  ;;  %v2500_v34 = vld [vmem:[%s2499_s19] sm:$0x1] }
0x1f0b   :  { %v2049_v35 = vpop.permute.xlu0 %2048 }
0x1f0c   :  { %v2051_v36 = vmul.f32 %v5796_v27, %v2049_v35  ;;  %v2502_v35 = vrot.slane %v2500_v34, 7 }
0x1f0e   :  { %v2059_v38 = vrot.slane %v2051_v36, %v6196_v10 }
0x1f10   :  { %v2060_v40 = vcombine.high %v2059_v38, %v2059_v38  ;;  %v2067_v42 = vrot.slane %v2059_v38, %v6196_v10 }
0x1f12   :  { %v2078_v43 = vrot.slane %v2067_v42, %v6203_v16  ;;  %v2074_v48 = vrot.slane %v2060_v40, %v6196_v10 }
0x1f14   :  { %2079 = vrot.lane.b32.xlu0 %v2078_v43, %s5932_s5  ;;  %v2156_v2 = vrot.slane %v2074_v48, %v6203_v16 }
0x1f16   :  { %2157 = vrot.lane.b32.xlu1 %v2156_v2, %s5932_s5 }
0x1f86   :  { %v2080_v49 = vpop.permute.xlu0 %2079 }
0x1f87   :  { %5233 = vmatmul.mubr.msk.f32.vlgmr.msra.gmra.mrb[16].mxu0 %vm77_vm2, %v2080_v49 }
0x1f88   :  { %5241 = vmatpush3.msra.mxu0 %v6338_v44  ;;  %v2158_v52 = vpop.permute.xlu1 %2157  ;;  %5242 = vmatprep.mubr.msk.f32.mxu0 %vm5929_vm0, %v5930_v6 }
0x1f89   :  { %5238 = vmatmul.mubr.msk.f32.vlgmr.msra.gmra.mrb[16].mxu1 %vm77_vm2, %v2158_v52  ;;  %5593 = vmatprep.subr.bf16.mxu0 %v5928_v3 }
0x1f8a   :  { %5246 = vmatpush3.msra.mxu1 %v6342_v45  ;;  %5247 = vmatprep.mubr.msk.f32.mxu1 %vm5929_vm0, %v5930_v6 }
0x1f8b   :  { %5605 = vmatprep.subr.bf16.mxu1 %v5928_v3 }
0x205a   :  { %v2149_v54 = vpop.f32.mrb[16].mxu0 }
0x205b   :  { %v5234_v55 = vpop.f32.mrb[17].mxu0 }
0x205c   :  { %v2227_v57 = vpop.f32.mrb[16].mxu1 }
0x205d   :  { %v2233_v58 = vrot.slane %v2227_v57, 7  ;;  %v5239_v4 = vpop.f32.mrb[17].mxu1 }
0x205f   :  { %v2234_v37 = vsel %vm1678_vm5, %v2233_v58, %v2149_v54 }
0x2060   :  { %v2236_v63 = vsel %vm1681_vm6, %v2234_v37, -inf }
0x2061   :  { %2237 = vmax.xlane.f32.xlu1 %v2236_v63 }
0x20ee   :  { %v2238_v0 = vpop.xlane.xlu1 %2237 }
0x20ef   :  { %v2240_v22 = vrot.slane %v2238_v0, 1  ;;  %v2243_v1 = vsub.f32 %v2149_v54, %v2238_v0 }
0x20f1   :  { %v2244_v12 = vsub.f32 %v2227_v57, %v2240_v22  ;;  %v2245_v7 = vmul.f32 1.442695, %v2243_v1 }
0x20f3   :  { %v2247_v5 = vmul.f32 1.442695, %v2244_v12 }
0x20f5   :  { %5799 = vpow2.f32 %v2247_v5 }
0x20f6   :  { %5801 = vpow2.f32 %v2245_v7 }
0x20ff   :  { %v5800_v8 = vpop.eup %5799 }
0x2100   :  { %v2251_v11 = vrot.slane %v5800_v8, 7  ;;  %v5802_v13 = vpop.eup %5801 }
0x2102   :  { %v2252_v15 = vsel %vm1678_vm5, %v2251_v11, %v5802_v13 }
0x2103   :  { %v2254_v17 = vsel %vm1681_vm6, %v2252_v15, 0.0 }
0x2104   :  { %2255 = vadd.xlane.f32.xlu0 %v2254_v17 }
0x211a   :  { %2415 = vrot.lane.b32.xlu0 %v2051_v36, %s5931_s18  ;;  %v2497_v36 = vld [vmem:[%s2496_s0] sm:$0x1] }
0x211b   :  { %v2504_v38 = vsel %vm75_vm1, %v2497_v36, %v2502_v35 }
0x2191   :  { %v2256_v9 = vpop.xlane.xlu0 %2255 }
0x2192   :  { %5803 = vrcp.f32 %v2256_v9 }
0x2195   :  { %v2416_v60 = vpop.permute.xlu0 %2415 }
0x219c   :  { %v5804_v18 = vpop.eup %5803 }
0x219d   :  { %v2259_v19 = vrot.slane %v5804_v18, 1  ;;  %v2262_v20 = vmul.f32 %v5804_v18, %v5802_v13 }
0x219f   :  { %5243 = vmatmul.mubr.msk.f32.vlgmr.msra.gmra.mrb[18].mxu0 %vm1710_vm7, %v2262_v20  ;;  %v2263_v29 = vmul.f32 %v5800_v8, %v2259_v19 }
0x21a0   :  { %5595 = vmatpush3.bf16.msra.mxu0 %v6406_v47  ;;  %5266 = vmatprep.mubr.msk.f32.mxu0 %vm5929_vm0, %v5930_v6 }
0x21a1   :  { %5248 = vmatmul.mubr.msk.f32.vlgmr.msra.gmra.mrb[18].mxu1 %vm1710_vm7, %v2263_v29  ;;  %5596 = vmatprep.subr.bf16.mxu0 %v5928_v3 }
0x21a2   :  { %5607 = vmatpush3.bf16.msra.mxu1 %v6235_v39  ;;  %5285 = vmatprep.mubr.msk.f32.mxu1 %vm5929_vm0, %v5930_v6 }
0x21a3   :  { %5608 = vmatprep.subr.bf16.mxu1 %v5928_v3 }
0x21a4   :  { %5598 = vmatpush3.bf16.msra.mxu0 %v6416_v56 }
0x21a5   :  { %5599 = vmatprep.subr.bf16.mxu0 %v5928_v3 }
0x21a6   :  { %5610 = vmatpush3.bf16.msra.mxu1 %v6242_v41 }
0x21a7   :  { %5611 = vmatprep.subr.bf16.mxu1 %v5928_v3 }
0x21a8   :  { %5601 = vmatpush3.bf16.msra.mxu0 %v6433_v61 }
0x21a9   :  { %5602 = vmatprep.subr.bf16.mxu0 %v5928_v3 }
0x21aa   :  { %5613 = vmatpush3.bf16.msra.mxu1 %v6255_v46 }
0x21ab   :  { %5614 = vmatprep.subr.bf16.mxu1 %v5928_v3 }
0x21ac   :  { %5604 = vmatpush3.bf16.msra.mxu0 %v6445_v62 }
0x21ad   :  { %5288 = vmatprep.subr.mxu0 %v5930_v6 }
0x21ae   :  { %5616 = vmatpush3.bf16.msra.mxu1 %v6267_v50 }
0x21af   :  { %5293 = vmatprep.subr.mxu1 %v5930_v6 }
0x2272   :  { %v2333_v21 = vpop.f32.mrb[18].mxu0 }
0x2273   :  { %v5244_v14 = vpop.f32.mrb[19].mxu0 }
0x2274   :  { %v2406_v23 = vpop.f32.mrb[18].mxu1 }
0x2275   :  { %v2412_v24 = vrot.slane %v2406_v23, 7  ;;  %v5249_v25 = vpop.f32.mrb[19].mxu1 }
0x2277   :  { %v2413_v26 = vsel %vm1678_vm5, %v2412_v24, %v2333_v21 }
0x2278   :  { %v2418_v27 = vsel %vm77_vm2, %v2413_v26, %v2416_v60 }
0x2279   :  { %5267 = vmatmul.mubr.msk.f32.vlgmr.msra.gmra.mrb[20].mxu0 %vm1384_vm4, %v2418_v27 }
0x227a   :  { %5289 = vmatpush3.xpose.msk.msra.mxu0 %vm77_vm2, %v6366_v51  ;;  %5290 = vmatprep.mubr.msk.f32.mxu0 %vm5929_vm0, %v5930_v6 }
0x227b   :  { %5298 = vmatprep.subr.mxu0 %v5930_v6 }
0x234c   :  { %v2488_v28 = vpop.f32.mrb[20].mxu0 }
0x234d   :  { %5805 = vtanh.f32 %v2488_v28  ;;  %v5268_v30 = vpop.f32.mrb[21].mxu0 }
0x2357   :  { %v5806_v31 = vpop.eup %5805 }
0x2358   :  { %2494 = vst.msk [vmem:[#allocation8 + $0x2] sm:$0x3] %vm1940_vm8, %v5806_v31  ;;  %v2505_v32 = vsel %vm77_vm2, %v5806_v31, %v2416_v60 }
0x2359   :  { %5286 = vmatmul.mubr.msk.f32.vlgmr.msra.gmra.mrb[20].mxu1 %vm1384_vm4, %v2505_v32 }
0x235a   :  { %5294 = vmatpush3.xpose.msk.msra.mxu1 %vm77_vm2, %v6364_v59  ;;  %5295 = vmatprep.mubr.msk.f32.mxu1 %vm5929_vm0, %v5930_v6 }
0x235b   :  { %5303 = vmatprep.subr.mxu1 %v5930_v6 }
0x242c   :  { %v2575_v40 = vpop.f32.mrb[20].mxu1 }
0x242d   :  { %v2579_v42 = vadd.f32 %v2575_v40, %v2504_v38  ;;  %v5287_v43 = vpop.f32.mrb[21].mxu1 }
0x242f   :  { %v2580_v48 = vadd.f32 %v6360_v53, %v2579_v42 }
0x2431   :  { %5807 = vtanh.f32 %v2580_v48  ;;  %v4811_v49 = vmul.f32 -1.442695, %v2580_v48 }
0x2433   :  { %5809 = vpow2.f32 %v4811_v49 }
0x243b   :  { %v5808_v2 = vpop.eup %5807 }
0x243c   :  { %2590 = vrot.lane.b32.xlu1 %v5808_v2, %s5931_s18 }
0x243d   :  { %v5810_v52 = vpop.eup %5809 }
0x243e   :  { %v2584_v54 = vadd.f32 1.0, %v5810_v52 }
0x2440   :  { %5811 = vrcp.f32 %v2584_v54 }
0x244a   :  { %v5812_v55 = vpop.eup %5811 }
0x244b   :  { %v2588_v4 = vmul.f32 %v5812_v55, %v6481_v33 }
0x24ae   :  { %v2591_v57 = vpop.permute.xlu1 %2590 }
0x24af   :  { %v2593_v58 = vmul.f32 %v5812_v55, %v2591_v57 }
0x24b1   :  { %2595 = vrot.lane.b32.xlu1 %v2593_v58, %s5932_s5 }
0x2523   :  { %v2596_v37 = vpop.permute.xlu1 %2595 }
0x2524   :  { %v6556_v63 = vadd.f32 %v2596_v37, %v2588_v4 }
0x2526   :  { %5813 = vtanh.f32 %v6556_v63 }
0x2530   :  { %v5814_v0 = vpop.eup %5813 }
0x2531   :  { %2601 = vrot.lane.b32.xlu0 %v5814_v0, %s5931_s18  ;;  %v3053_v0 = vld [vmem:[%s3052_s24] sm:$0x1] }
0x25a3   :  { %v2602_v22 = vpop.permute.xlu0 %2601 }
0x25a4   :  { %v2604_v1 = vmul.f32 %v5812_v55, %v2602_v22  ;;  %v3055_v22 = vrot.slane %v3053_v0, 7 }
0x25a6   :  { %v2612_v12 = vrot.slane %v2604_v1, %v6196_v10 }
0x25a8   :  { %v2613_v7 = vcombine.high %v2612_v12, %v2612_v12  ;;  %v2620_v5 = vrot.slane %v2612_v12, %v6196_v10 }
0x25aa   :  { %v2631_v8 = vrot.slane %v2620_v5, %v6203_v16  ;;  %v2627_v11 = vrot.slane %v2613_v7, %v6196_v10 }
0x25ac   :  { %2632 = vrot.lane.b32.xlu0 %v2631_v8, %s5932_s5  ;;  %v2709_v33 = vrot.slane %v2627_v11, %v6203_v16 }
0x25ae   :  { %2710 = vrot.lane.b32.xlu1 %v2709_v33, %s5932_s5 }
0x261e   :  { %v2633_v13 = vpop.permute.xlu0 %2632 }
0x261f   :  { %5291 = vmatmul.mubr.msk.f32.vlgmr.msra.gmra.mrb[22].mxu0 %vm77_vm2, %v2633_v13 }
0x2620   :  { %5299 = vmatpush3.msra.mxu0 %v6338_v44  ;;  %v2711_v15 = vpop.permute.xlu1 %2710  ;;  %5300 = vmatprep.mubr.msk.f32.mxu0 %vm5929_vm0, %v5930_v6 }
0x2621   :  { %5296 = vmatmul.mubr.msk.f32.vlgmr.msra.gmra.mrb[22].mxu1 %vm77_vm2, %v2711_v15  ;;  %5617 = vmatprep.subr.bf16.mxu0 %v5928_v3 }
0x2622   :  { %5304 = vmatpush3.msra.mxu1 %v6342_v45  ;;  %5305 = vmatprep.mubr.msk.f32.mxu1 %vm5929_vm0, %v5930_v6 }
0x2623   :  { %5629 = vmatprep.subr.bf16.mxu1 %v5928_v3 }
0x26f2   :  { %v2702_v17 = vpop.f32.mrb[22].mxu0 }
0x26f3   :  { %v5292_v9 = vpop.f32.mrb[23].mxu0 }
0x26f4   :  { %v2780_v18 = vpop.f32.mrb[22].mxu1 }
0x26f5   :  { %v2786_v19 = vrot.slane %v2780_v18, 7  ;;  %v5297_v20 = vpop.f32.mrb[23].mxu1 }
0x26f7   :  { %v2787_v29 = vsel %vm1678_vm5, %v2786_v19, %v2702_v17 }
0x26f8   :  { %v2789_v21 = vsel %vm1681_vm6, %v2787_v29, -inf }
0x26f9   :  { %2790 = vmax.xlane.f32.xlu1 %v2789_v21 }
0x2786   :  { %v2791_v14 = vpop.xlane.xlu1 %2790 }
0x2787   :  { %v2793_v23 = vrot.slane %v2791_v14, 1  ;;  %v2796_v24 = vsub.f32 %v2702_v17, %v2791_v14 }
0x2789   :  { %v2797_v25 = vsub.f32 %v2780_v18, %v2793_v23  ;;  %v2798_v60 = vmul.f32 1.442695, %v2796_v24 }
0x278b   :  { %v2800_v26 = vmul.f32 1.442695, %v2797_v25 }
0x278d   :  { %5815 = vpow2.f32 %v2800_v26 }
0x278e   :  { %5817 = vpow2.f32 %v2798_v60 }
0x2797   :  { %v5816_v27 = vpop.eup %5815 }
0x2798   :  { %v2804_v28 = vrot.slane %v5816_v27, 7  ;;  %v5818_v30 = vpop.eup %5817 }
0x279a   :  { %v2805_v31 = vsel %vm1678_vm5, %v2804_v28, %v5818_v30 }
0x279b   :  { %v2807_v32 = vsel %vm1681_vm6, %v2805_v31, 0.0 }
0x279c   :  { %2808 = vadd.xlane.f32.xlu0 %v2807_v32 }
0x27b2   :  { %2968 = vrot.lane.b32.xlu0 %v2604_v1, %s5931_s18  ;;  %v3050_v1 = vld [vmem:[%s3049_s27] sm:$0x1] }
0x27b3   :  { %v3057_v12 = vsel %vm75_vm1, %v3050_v1, %v3055_v22 }
0x2829   :  { %v2809_v34 = vpop.xlane.xlu0 %2808 }
0x282a   :  { %5819 = vrcp.f32 %v2809_v34 }
0x282d   :  { %v2969_v52 = vpop.permute.xlu0 %2968 }
0x2834   :  { %v5820_v35 = vpop.eup %5819 }
0x2835   :  { %v2812_v36 = vrot.slane %v5820_v35, 1  ;;  %v2815_v38 = vmul.f32 %v5820_v35, %v5818_v30 }
0x2837   :  { %5301 = vmatmul.mubr.msk.f32.vlgmr.msra.gmra.mrb[24].mxu0 %vm1710_vm7, %v2815_v38  ;;  %v2816_v40 = vmul.f32 %v5816_v27, %v2812_v36 }
0x2838   :  { %5619 = vmatpush3.bf16.msra.mxu0 %v6406_v47  ;;  %5324 = vmatprep.mubr.msk.f32.mxu0 %vm5929_vm0, %v5930_v6 }
0x2839   :  { %5306 = vmatmul.mubr.msk.f32.vlgmr.msra.gmra.mrb[24].mxu1 %vm1710_vm7, %v2816_v40  ;;  %5620 = vmatprep.subr.bf16.mxu0 %v5928_v3 }
0x283a   :  { %5631 = vmatpush3.bf16.msra.mxu1 %v6235_v39  ;;  %5343 = vmatprep.mubr.msk.f32.mxu1 %vm5929_vm0, %v5930_v6 }
0x283b   :  { %5632 = vmatprep.subr.bf16.mxu1 %v5928_v3 }
0x283c   :  { %5622 = vmatpush3.bf16.msra.mxu0 %v6416_v56 }
0x283d   :  { %5623 = vmatprep.subr.bf16.mxu0 %v5928_v3 }
0x283e   :  { %5634 = vmatpush3.bf16.msra.mxu1 %v6242_v41 }
0x283f   :  { %5635 = vmatprep.subr.bf16.mxu1 %v5928_v3 }
0x2840   :  { %5625 = vmatpush3.bf16.msra.mxu0 %v6433_v61 }
0x2841   :  { %5626 = vmatprep.subr.bf16.mxu0 %v5928_v3 }
0x2842   :  { %5637 = vmatpush3.bf16.msra.mxu1 %v6255_v46 }
0x2843   :  { %5638 = vmatprep.subr.bf16.mxu1 %v5928_v3 }
0x2844   :  { %5628 = vmatpush3.bf16.msra.mxu0 %v6445_v62 }
0x2845   :  { %5346 = vmatprep.subr.mxu0 %v5930_v6 }
0x2846   :  { %5640 = vmatpush3.bf16.msra.mxu1 %v6267_v50 }
0x2847   :  { %5351 = vmatprep.subr.mxu1 %v5930_v6 }
0x290a   :  { %v2886_v42 = vpop.f32.mrb[24].mxu0 }
0x290b   :  { %v5302_v43 = vpop.f32.mrb[25].mxu0 }
0x290c   :  { %v2959_v48 = vpop.f32.mrb[24].mxu1 }
0x290d   :  { %v2965_v2 = vrot.slane %v2959_v48, 7  ;;  %v5307_v49 = vpop.f32.mrb[25].mxu1 }
0x290f   :  { %v2966_v54 = vsel %vm1678_vm5, %v2965_v2, %v2886_v42 }
0x2910   :  { %v2971_v55 = vsel %vm77_vm2, %v2966_v54, %v2969_v52 }
0x2911   :  { %5325 = vmatmul.mubr.msk.f32.vlgmr.msra.gmra.mrb[26].mxu0 %vm1384_vm4, %v2971_v55 }
0x2912   :  { %5347 = vmatpush3.xpose.msk.msra.mxu0 %vm77_vm2, %v6366_v51  ;;  %5348 = vmatprep.mubr.msk.f32.mxu0 %vm5929_vm0, %v5930_v6 }
0x2913   :  { %5356 = vmatprep.subr.mxu0 %v5930_v6 }
0x29e4   :  { %v3041_v57 = vpop.f32.mrb[26].mxu0 }
0x29e5   :  { %5821 = vtanh.f32 %v3041_v57  ;;  %v5326_v58 = vpop.f32.mrb[27].mxu0 }
0x29ef   :  { %v5822_v4 = vpop.eup %5821 }
0x29f0   :  { %3047 = vst.msk [vmem:[#allocation8 + $0x4] sm:$0x3] %vm1940_vm8, %v5822_v4  ;;  %v3058_v37 = vsel %vm77_vm2, %v5822_v4, %v2969_v52 }
0x29f1   :  { %5344 = vmatmul.mubr.msk.f32.vlgmr.msra.gmra.mrb[26].mxu1 %vm1384_vm4, %v3058_v37 }
0x29f2   :  { %5352 = vmatpush3.xpose.msk.msra.mxu1 %vm77_vm2, %v6364_v59  ;;  %5353 = vmatprep.mubr.msk.f32.mxu1 %vm5929_vm0, %v5930_v6 }
0x29f3   :  { %5361 = vmatprep.subr.mxu1 %v5930_v6 }
0x2ac4   :  { %v3128_v7 = vpop.f32.mrb[26].mxu1 }
0x2ac5   :  { %v3132_v5 = vadd.f32 %v3128_v7, %v3057_v12  ;;  %v5345_v8 = vpop.f32.mrb[27].mxu1 }
0x2ac7   :  { %v3133_v11 = vadd.f32 %v6360_v53, %v3132_v5 }
0x2ac9   :  { %5823 = vtanh.f32 %v3133_v11  ;;  %v4822_v13 = vmul.f32 -1.442695, %v3133_v11 }
0x2acb   :  { %5825 = vpow2.f32 %v4822_v13 }
0x2ad3   :  { %v5824_v33 = vpop.eup %5823 }
0x2ad4   :  { %3143 = vrot.lane.b32.xlu1 %v5824_v33, %s5931_s18 }
0x2ad5   :  { %v5826_v15 = vpop.eup %5825 }
0x2ad6   :  { %v3137_v17 = vadd.f32 1.0, %v5826_v15 }
0x2ad8   :  { %5827 = vrcp.f32 %v3137_v17 }
0x2ae2   :  { %v5828_v9 = vpop.eup %5827 }
0x2ae3   :  { %v3141_v20 = vmul.f32 %v5828_v9, %v6556_v63 }
0x2b46   :  { %v3144_v18 = vpop.permute.xlu1 %3143 }
0x2b47   :  { %v3146_v19 = vmul.f32 %v5828_v9, %v3144_v18 }
0x2b49   :  { %3148 = vrot.lane.b32.xlu1 %v3146_v19, %s5932_s5 }
0x2bbb   :  { %v3149_v29 = vpop.permute.xlu1 %3148 }
0x2bbc   :  { %v6631_v21 = vadd.f32 %v3149_v29, %v3141_v20  ;;  %v3606_v20 = vld [vmem:[%s3605_s4] sm:$0x1] }
0x2bbd   :  { %v3608_v29 = vrot.slane %v3606_v20, 7 }
0x2bbe   :  { %5829 = vtanh.f32 %v6631_v21 }
0x2bc8   :  { %v5830_v14 = vpop.eup %5829 }
0x2bc9   :  { %3154 = vrot.lane.b32.xlu0 %v5830_v14, %s5931_s18  ;;  %v3603_v14 = vld [vmem:[%s3602_s11] sm:$0x1] }
0x2c3b   :  { %v3155_v23 = vpop.permute.xlu0 %3154 }
0x2c3c   :  { %v3157_v24 = vmul.f32 %v5828_v9, %v3155_v23  ;;  %v3610_v23 = vsel %vm75_vm1, %v3603_v14, %v3608_v29 }
0x2c3e   :  { %v3165_v25 = vrot.slane %v3157_v24, %v6196_v10 }
0x2c40   :  { %v3166_v60 = vcombine.high %v3165_v25, %v3165_v25  ;;  %v3173_v26 = vrot.slane %v3165_v25, %v6196_v10 }
0x2c42   :  { %v3184_v27 = vrot.slane %v3173_v26, %v6203_v16  ;;  %v3180_v28 = vrot.slane %v3166_v60, %v6196_v10 }
0x2c44   :  { %3185 = vrot.lane.b32.xlu0 %v3184_v27, %s5932_s5  ;;  %v3262_v63 = vrot.slane %v3180_v28, %v6203_v16 }
0x2c46   :  { %3263 = vrot.lane.b32.xlu1 %v3262_v63, %s5932_s5 }
0x2cb6   :  { %v3186_v30 = vpop.permute.xlu0 %3185 }
0x2cb7   :  { %5349 = vmatmul.mubr.msk.f32.vlgmr.msra.gmra.mrb[28].mxu0 %vm77_vm2, %v3186_v30 }
0x2cb8   :  { %5357 = vmatpush3.msra.mxu0 %v6338_v44  ;;  %v3264_v31 = vpop.permute.xlu1 %3263  ;;  %5358 = vmatprep.mubr.msk.f32.mxu0 %vm5929_vm0, %v5930_v6 }
0x2cb9   :  { %5354 = vmatmul.mubr.msk.f32.vlgmr.msra.gmra.mrb[28].mxu1 %vm77_vm2, %v3264_v31  ;;  %5641 = vmatprep.subr.bf16.mxu0 %v5928_v3 }
0x2cba   :  { %5362 = vmatpush3.msra.mxu1 %v6342_v45  ;;  %5363 = vmatprep.mubr.msk.f32.mxu1 %vm5929_vm0, %v5930_v6 }
0x2cbb   :  { %5653 = vmatprep.subr.bf16.mxu1 %v5928_v3 }
0x2d8a   :  { %v3255_v32 = vpop.f32.mrb[28].mxu0 }
0x2d8b   :  { %v5350_v34 = vpop.f32.mrb[29].mxu0 }
0x2d8c   :  { %v3333_v35 = vpop.f32.mrb[28].mxu1 }
0x2d8d   :  { %v3339_v36 = vrot.slane %v3333_v35, 7  ;;  %v5355_v44 = vpop.f32.mrb[29].mxu1 }
0x2d8f   :  { %v3340_v38 = vsel %vm1678_vm5, %v3339_v36, %v3255_v32 }
0x2d90   :  { %v3342_v40 = vsel %vm1681_vm6, %v3340_v38, -inf }
0x2d91   :  { %3343 = vmax.xlane.f32.xlu1 %v3342_v40 }
0x2e1e   :  { %v3344_v42 = vpop.xlane.xlu1 %3343 }
0x2e1f   :  { %v3346_v43 = vrot.slane %v3344_v42, 1  ;;  %v3349_v48 = vsub.f32 %v3255_v32, %v3344_v42 }
0x2e21   :  { %v3350_v2 = vsub.f32 %v3333_v35, %v3346_v43  ;;  %v3351_v45 = vmul.f32 1.442695, %v3349_v48 }
0x2e23   :  { %v3353_v49 = vmul.f32 1.442695, %v3350_v2 }
0x2e25   :  { %5831 = vpow2.f32 %v3353_v49 }
0x2e26   :  { %5833 = vpow2.f32 %v3351_v45 }
0x2e2f   :  { %v5832_v52 = vpop.eup %5831 }
0x2e30   :  { %v3357_v54 = vrot.slane %v5832_v52, 7  ;;  %v5834_v55 = vpop.eup %5833 }
0x2e32   :  { %v3358_v57 = vsel %vm1678_vm5, %v3357_v54, %v5834_v55 }
0x2e33   :  { %v3360_v58 = vsel %vm1681_vm6, %v3358_v57, 0.0 }
0x2e34   :  { %3361 = vadd.xlane.f32.xlu0 %v3360_v58 }
0x2e4a   :  { %3521 = vrot.lane.b32.xlu0 %v3157_v24, %s5931_s18 }
0x2ec1   :  { %v3362_v4 = vpop.xlane.xlu0 %3361 }
0x2ec2   :  { %5835 = vrcp.f32 %v3362_v4 }
0x2ec5   :  { %v3522_v33 = vpop.permute.xlu0 %3521 }
0x2ecc   :  { %v5836_v37 = vpop.eup %5835 }
0x2ecd   :  { %v3365_v0 = vrot.slane %v5836_v37, 1  ;;  %v3368_v22 = vmul.f32 %v5836_v37, %v5834_v55  ;;  %v6725_v55 = vld [vmem:[#allocation2 + $0x8] sm:$0xff] }
0x2ecf   :  { %5359 = vmatmul.mubr.msk.f32.vlgmr.msra.gmra.mrb[30].mxu0 %vm1710_vm7, %v3368_v22  ;;  %v3369_v1 = vmul.f32 %v5832_v52, %v3365_v0  ;;  %v6718_v52 = vld [vmem:[#allocation2] sm:$0xff] }
0x2ed0   :  { %5643 = vmatpush3.bf16.msra.mxu0 %v6406_v47  ;;  %5382 = vmatprep.mubr.msk.f32.mxu0 %vm5929_vm0, %v5930_v6 }
0x2ed1   :  { %5364 = vmatmul.mubr.msk.f32.vlgmr.msra.gmra.mrb[30].mxu1 %vm1710_vm7, %v3369_v1  ;;  %5644 = vmatprep.subr.bf16.mxu0 %v5928_v3 }
0x2ed2   :  { %5655 = vmatpush3.bf16.msra.mxu1 %v6235_v39  ;;  %5401 = vmatprep.mubr.msk.f32.mxu1 %vm5929_vm0, %v5930_v6 }
0x2ed3   :  { %5656 = vmatprep.subr.bf16.mxu1 %v5928_v3 }
0x2ed4   :  { %5646 = vmatpush3.bf16.msra.mxu0 %v6416_v56 }
0x2ed5   :  { %5647 = vmatprep.subr.bf16.mxu0 %v5928_v3 }
0x2ed6   :  { %5658 = vmatpush3.bf16.msra.mxu1 %v6242_v41 }
0x2ed7   :  { %5659 = vmatprep.subr.bf16.mxu1 %v5928_v3 }
0x2ed8   :  { %5649 = vmatpush3.bf16.msra.mxu0 %v6433_v61 }
0x2ed9   :  { %5650 = vmatprep.subr.bf16.mxu0 %v5928_v3 }
0x2eda   :  { %5661 = vmatpush3.bf16.msra.mxu1 %v6255_v46 }
0x2edb   :  { %5662 = vmatprep.subr.bf16.mxu1 %v5928_v3 }
0x2edc   :  { %5652 = vmatpush3.bf16.msra.mxu0 %v6445_v62 }
0x2edd   :  { %5404 = vmatprep.subr.mxu0 %v5930_v6 }
0x2ede   :  { %5664 = vmatpush3.bf16.msra.mxu1 %v6267_v50 }
0x2edf   :  { %5409 = vmatprep.subr.mxu1 %v5930_v6 }
0x2fa2   :  { %v3439_v12 = vpop.f32.mrb[30].mxu0 }
0x2fa3   :  { %v5360_v7 = vpop.f32.mrb[31].mxu0 }
0x2fa4   :  { %v3512_v5 = vpop.f32.mrb[30].mxu1 }
0x2fa5   :  { %v3518_v8 = vrot.slane %v3512_v5, 7  ;;  %v5365_v11 = vpop.f32.mrb[31].mxu1 }
0x2fa7   :  { %v3519_v13 = vsel %vm1678_vm5, %v3518_v8, %v3439_v12 }
0x2fa8   :  { %v3524_v15 = vsel %vm77_vm2, %v3519_v13, %v3522_v33 }
0x2fa9   :  { %5383 = vmatmul.mubr.msk.f32.vlgmr.msra.gmra.mrb[32].mxu0 %vm1384_vm4, %v3524_v15 }
0x2faa   :  { %5405 = vmatpush3.xpose.msk.msra.mxu0 %vm77_vm2, %v6366_v51  ;;  %5406 = vmatprep.mubr.msk.f32.mxu0 %vm5929_vm0, %v5930_v6 }
0x2fab   :  { %5414 = vmatprep.subr.mxu0 %v5930_v6 }
0x307c   :  { %v3594_v17 = vpop.f32.mrb[32].mxu0 }
0x307d   :  { %5837 = vtanh.f32 %v3594_v17  ;;  %v5384_v9 = vpop.f32.mrb[33].mxu0 }
0x3087   :  { %v5838_v18 = vpop.eup %5837 }
0x3088   :  { %3600 = vst.msk [vmem:[#allocation8 + $0x6] sm:$0x3] %vm1940_vm8, %v5838_v18  ;;  %v3611_v19 = vsel %vm77_vm2, %v5838_v18, %v3522_v33 }
0x3089   :  { %5402 = vmatmul.mubr.msk.f32.vlgmr.msra.gmra.mrb[32].mxu1 %vm1384_vm4, %v3611_v19 }
0x308a   :  { %5410 = vmatpush3.xpose.msk.msra.mxu1 %vm77_vm2, %v6364_v59  ;;  %5411 = vmatprep.mubr.msk.f32.mxu1 %vm5929_vm0, %v5930_v6 }
0x308b   :  { %5419 = vmatprep.subr.mxu1 %v5930_v6 }
0x315c   :  { %v3681_v24 = vpop.f32.mrb[32].mxu1 }
0x315d   :  { %v3685_v25 = vadd.f32 %v3681_v24, %v3610_v23  ;;  %v5403_v60 = vpop.f32.mrb[33].mxu1 }
0x315f   :  { %v3686_v26 = vadd.f32 %v6360_v53, %v3685_v25 }
0x3161   :  { %5839 = vtanh.f32 %v3686_v26  ;;  %v4833_v28 = vmul.f32 -1.442695, %v3686_v26 }
0x3163   :  { %5841 = vpow2.f32 %v4833_v28 }
0x316b   :  { %v5840_v27 = vpop.eup %5839 }
0x316c   :  { %3696 = vrot.lane.b32.xlu1 %v5840_v27, %s5931_s18 }
0x316d   :  { %v5842_v63 = vpop.eup %5841 }
0x316e   :  { %v3690_v30 = vadd.f32 1.0, %v5842_v63 }
0x3170   :  { %5843 = vrcp.f32 %v3690_v30 }
0x317a   :  { %v5844_v31 = vpop.eup %5843 }
0x317b   :  { %v3694_v35 = vmul.f32 %v5844_v31, %v6631_v21 }
0x31de   :  { %v3697_v32 = vpop.permute.xlu1 %3696 }
0x31df   :  { %v3699_v34 = vmul.f32 %v5844_v31, %v3697_v32  ;;  %v4156_v32 = vld [vmem:[%s4155_s20] sm:$0x1] }
0x31e1   :  { %3701 = vrot.lane.b32.xlu1 %v3699_v34, %s5932_s5 }
0x3253   :  { %v3702_v36 = vpop.permute.xlu1 %3701 }
0x3254   :  { %v6706_v44 = vadd.f32 %v3702_v36, %v3694_v35 }
0x3256   :  { %5845 = vtanh.f32 %v6706_v44 }
0x3260   :  { %v5846_v53 = vpop.eup %5845 }
0x3261   :  { %3707 = vrot.lane.b32.xlu0 %v5846_v53, %s5931_s18  ;;  %v5873_v53 = vld [vmem:[%s6845_s7] ss:$0 sm:$0xff]  ;;  %s4712_s7 = sshll.u32 %s5934_s3, 4  ;;  %s4713_s7 = int_to_ptr.vmem [resolvable:$true] %s4712_s7 }
0x3262   :  { %p5903_p11 = scmp.lt.s32.totalorder %s4713_s7, %s4713_s7 }
0x32d3   :  { %v3708_v38 = vpop.permute.xlu0 %3707 }
0x32d4   :  { %v3710_v40 = vmul.f32 %v5844_v31, %v3708_v38 }
0x32d6   :  { %v3718_v42 = vrot.slane %v3710_v40, %v6196_v10 }
0x32d8   :  { %v3719_v43 = vcombine.high %v3718_v42, %v3718_v42  ;;  %v3726_v48 = vrot.slane %v3718_v42, %v6196_v10 }
0x32da   :  { %v3737_v2 = vrot.slane %v3726_v48, %v6203_v16  ;;  %v3733_v45 = vrot.slane %v3719_v43, %v6196_v10 }
0x32dc   :  { %3738 = vrot.lane.b32.xlu0 %v3737_v2, %s5932_s5  ;;  %v3815_v21 = vrot.slane %v3733_v45, %v6203_v16 }
0x32de   :  { %3816 = vrot.lane.b32.xlu1 %v3815_v21, %s5932_s5 }
0x334e   :  { %v3739_v49 = vpop.permute.xlu0 %3738 }
0x334f   :  { %5407 = vmatmul.mubr.msk.f32.vlgmr.msra.gmra.mrb[34].mxu0 %vm77_vm2, %v3739_v49 }
0x3350   :  { %5415 = vmatpush3.msra.mxu0 %v6718_v52  ;;  %v3817_v54 = vpop.permute.xlu1 %3816  ;;  %5416 = vmatprep.mubr.msk.f32.mxu0 %vm5929_vm0, %v5930_v6 }
0x3351   :  { %5412 = vmatmul.mubr.msk.f32.vlgmr.msra.gmra.mrb[34].mxu1 %vm77_vm2, %v3817_v54  ;;  %5665 = vmatprep.subr.bf16.mxu0 %v5928_v3 }
0x3352   :  { %5420 = vmatpush3.msra.mxu1 %v6725_v55  ;;  %5421 = vmatprep.mubr.msk.f32.mxu1 %vm5929_vm0, %v5930_v6 }
0x3353   :  { %5677 = vmatprep.subr.bf16.mxu1 %v5928_v3 }
0x3422   :  { %v3808_v57 = vpop.f32.mrb[34].mxu0 }
0x3423   :  { %v5408_v58 = vpop.f32.mrb[35].mxu0 }
0x3424   :  { %v3886_v4 = vpop.f32.mrb[34].mxu1 }
0x3425   :  { %v3892_v37 = vrot.slane %v3886_v4, 7  ;;  %v5413_v0 = vpop.f32.mrb[35].mxu1 }
0x3427   :  { %v3893_v22 = vsel %vm1678_vm5, %v3892_v37, %v3808_v57 }
0x3428   :  { %v3895_v1 = vsel %vm1681_vm6, %v3893_v22, -inf }
0x3429   :  { %3896 = vmax.xlane.f32.xlu1 %v3895_v1 }
0x34b6   :  { %v3897_v12 = vpop.xlane.xlu1 %3896 }
0x34b7   :  { %v3899_v7 = vrot.slane %v3897_v12, 1  ;;  %v3902_v5 = vsub.f32 %v3808_v57, %v3897_v12 }
0x34b9   :  { %v3903_v8 = vsub.f32 %v3886_v4, %v3899_v7  ;;  %v3904_v11 = vmul.f32 1.442695, %v3902_v5 }
0x34bb   :  { %v3906_v33 = vmul.f32 1.442695, %v3903_v8 }
0x34bd   :  { %5847 = vpow2.f32 %v3906_v33 }
0x34be   :  { %5849 = vpow2.f32 %v3904_v11 }
0x34c7   :  { %v5848_v13 = vpop.eup %5847 }
0x34c8   :  { %v3910_v15 = vrot.slane %v5848_v13, 7  ;;  %v5850_v17 = vpop.eup %5849 }
0x34ca   :  { %v3911_v9 = vsel %vm1678_vm5, %v3910_v15, %v5850_v17 }
0x34cb   :  { %v3913_v18 = vsel %vm1681_vm6, %v3911_v9, 0.0 }
0x34cc   :  { %3914 = vadd.xlane.f32.xlu0 %v3913_v18 }
0x34e2   :  { %4074 = vrot.lane.b32.xlu0 %v3710_v40, %s5931_s18 }
0x3559   :  { %v3915_v19 = vpop.xlane.xlu0 %3914 }
0x355a   :  { %5851 = vrcp.f32 %v3915_v19 }
0x355d   :  { %v4075_v26 = vpop.permute.xlu0 %4074 }
0x3564   :  { %v5852_v20 = vpop.eup %5851 }
0x3565   :  { %v3918_v29 = vrot.slane %v5852_v20, 1  ;;  %v3921_v14 = vmul.f32 %v5852_v20, %v5850_v17 }
0x3567   :  { %5417 = vmatmul.mubr.msk.f32.vlgmr.msra.gmra.mrb[36].mxu0 %vm1710_vm7, %v3921_v14  ;;  %v3922_v23 = vmul.f32 %v5848_v13, %v3918_v29 }
0x3568   :  { %5667 = vmatpush3.bf16.msra.mxu0 %v6406_v47  ;;  %5440 = vmatprep.mubr.msk.f32.mxu0 %vm5929_vm0, %v5930_v6 }
0x3569   :  { %5422 = vmatmul.mubr.msk.f32.vlgmr.msra.gmra.mrb[36].mxu1 %vm1710_vm7, %v3922_v23  ;;  %5668 = vmatprep.subr.bf16.mxu0 %v5928_v3 }
0x356a   :  { %5679 = vmatpush3.bf16.msra.mxu1 %v6235_v39  ;;  %5459 = vmatprep.mubr.msk.f32.mxu1 %vm5929_vm0, %v5930_v6 }
0x356b   :  { %5680 = vmatprep.subr.bf16.mxu1 %v5928_v3 }
0x356c   :  { %5670 = vmatpush3.bf16.msra.mxu0 %v6416_v56 }
0x356d   :  { %5671 = vmatprep.subr.bf16.mxu0 %v5928_v3 }
0x356e   :  { %5682 = vmatpush3.bf16.msra.mxu1 %v6242_v41 }
0x356f   :  { %5683 = vmatprep.subr.bf16.mxu1 %v5928_v3 }
0x3570   :  { %5673 = vmatpush3.bf16.msra.mxu0 %v6433_v61 }
0x3571   :  { %5674 = vmatprep.subr.bf16.mxu0 %v5928_v3 }
0x3572   :  { %5685 = vmatpush3.bf16.msra.mxu1 %v6255_v46 }
0x3573   :  { %5686 = vmatprep.subr.bf16.mxu1 %v5928_v3 }
0x3574   :  { %5676 = vmatpush3.bf16.msra.mxu0 %v6445_v62 }
0x3575   :  { %5462 = vmatprep.subr.mxu0 %v5930_v6 }
0x3576   :  { %5688 = vmatpush3.bf16.msra.mxu1 %v6267_v50 }
0x3577   :  { %5467 = vmatprep.subr.mxu1 %v5930_v6 }
0x363a   :  { %v3992_v39 = vpop.f32.mrb[36].mxu0 }
0x363b   :  { %v5418_v41 = vpop.f32.mrb[37].mxu0 }
0x363c   :  { %v4065_v24 = vpop.f32.mrb[36].mxu1 }
0x363d   :  { %v4071_v25 = vrot.slane %v4065_v24, 7  ;;  %v5423_v60 = vpop.f32.mrb[37].mxu1 }
0x363f   :  { %v4072_v27 = vsel %vm1678_vm5, %v4071_v25, %v3992_v39 }
0x3640   :  { %v4077_v46 = vsel %vm77_vm2, %v4072_v27, %v4075_v26 }
0x3641   :  { %5441 = vmatmul.mubr.msk.f32.vlgmr.msra.gmra.mrb[38].mxu0 %vm1384_vm4, %v4077_v46 }
0x3642   :  { %5463 = vmatpush3.xpose.msk.msra.mxu0 %vm77_vm2, %v6366_v51  ;;  %5464 = vmatprep.mubr.msk.f32.mxu0 %vm5929_vm0, %v5930_v6  ;;  %v4159_v51 = vld [vmem:[%s4158_s16] sm:$0x1] }
0x3643   :  { %5472 = vmatprep.subr.mxu0 %v5930_v6  ;;  %v4161_v31 = vrot.slane %v4159_v51, 7 }
0x3714   :  { %v4147_v50 = vpop.f32.mrb[38].mxu0 }
0x3715   :  { %5853 = vtanh.f32 %v4147_v50  ;;  %v5442_v28 = vpop.f32.mrb[39].mxu0 }
0x371f   :  { %v5854_v63 = vpop.eup %5853 }
0x3720   :  { %4153 = vst.msk [vmem:[#allocation8 + $0x8] sm:$0x3] %vm1940_vm8, %v5854_v63  ;;  %v4164_v30 = vsel %vm77_vm2, %v5854_v63, %v4075_v26 }
0x3721   :  { %5460 = vmatmul.mubr.msk.f32.vlgmr.msra.gmra.mrb[38].mxu1 %vm1384_vm4, %v4164_v30 }
0x3722   :  { %5468 = vmatpush3.xpose.msk.msra.mxu1 %vm77_vm2, %v6364_v59  ;;  %5469 = vmatprep.mubr.msk.f32.mxu1 %vm5929_vm0, %v5930_v6  ;;  %v4163_v59 = vsel %vm75_vm1, %v4156_v32, %v4161_v31 }
0x3723   :  { %5477 = vmatprep.subr.mxu1 %v5930_v6 }
0x37f4   :  { %v4234_v34 = vpop.f32.mrb[38].mxu1 }
0x37f5   :  { %v4238_v35 = vadd.f32 %v4234_v34, %v4163_v59  ;;  %v5461_v36 = vpop.f32.mrb[39].mxu1 }
0x37f7   :  { %v4239_v38 = vadd.f32 %v5873_v53, %v4238_v35 }
0x37f9   :  { %5855 = vtanh.f32 %v4239_v38  ;;  %v4844_v42 = vmul.f32 -1.442695, %v4239_v38 }
0x37fb   :  { %5857 = vpow2.f32 %v4844_v42 }
0x3803   :  { %v5856_v40 = vpop.eup %5855 }
0x3804   :  { %4249 = vrot.lane.b32.xlu1 %v5856_v40, %s5931_s18 }
0x3805   :  { %v5858_v43 = vpop.eup %5857 }
0x3806   :  { %v4243_v48 = vadd.f32 1.0, %v5858_v43 }
0x3808   :  { %5859 = vrcp.f32 %v4243_v48 }
0x3812   :  { %v5860_v2 = vpop.eup %5859 }
0x3813   :  { %v4247_v49 = vmul.f32 %v5860_v2, %v6706_v44 }
0x3876   :  { %v4250_v45 = vpop.permute.xlu1 %4249 }
0x3877   :  { %v4252_v21 = vmul.f32 %v5860_v2, %v4250_v45 }
0x3879   :  { %4254 = vrot.lane.b32.xlu1 %v4252_v21, %s5932_s5 }
0x38eb   :  { %v4255_v54 = vpop.permute.xlu1 %4254 }
0x38ec   :  { %v4257_v57 = vadd.f32 %v4255_v54, %v4247_v49 }
0x38ee   :  { %5861 = vtanh.f32 %v4257_v57 }
0x38f8   :  { %v5862_v58 = vpop.eup %5861 }
0x38f9   :  { %4260 = vrot.lane.b32.xlu0 %v5862_v58, %s5931_s18 }
0x396b   :  { %v4261_v4 = vpop.permute.xlu0 %4260 }
0x396c   :  { %v4263_v37 = vmul.f32 %v5860_v2, %v4261_v4 }
0x396e   :  { %v4271_v0 = vrot.slane %v4263_v37, %v6196_v10 }
0x3970   :  { %v4272_v22 = vcombine.high %v4271_v0, %v4271_v0  ;;  %v4279_v1 = vrot.slane %v4271_v0, %v6196_v10 }
0x3972   :  { %v4290_v12 = vrot.slane %v4279_v1, %v6203_v16  ;;  %v4286_v7 = vrot.slane %v4272_v22, %v6196_v10 }
0x3974   :  { %4291 = vrot.lane.b32.xlu0 %v4290_v12, %s5932_s5  ;;  %v4368_v44 = vrot.slane %v4286_v7, %v6203_v16 }
0x3976   :  { %4369 = vrot.lane.b32.xlu1 %v4368_v44, %s5932_s5 }
0x39e6   :  { %v4292_v5 = vpop.permute.xlu0 %4291 }
0x39e7   :  { %5465 = vmatmul.mubr.msk.f32.vlgmr.msra.gmra.mrb[40].mxu0 %vm77_vm2, %v4292_v5 }
0x39e8   :  { %5473 = vmatpush3.msra.mxu0 %v6718_v52  ;;  %v4370_v8 = vpop.permute.xlu1 %4369  ;;  %5474 = vmatprep.mubr.msk.f32.mxu0 %vm5929_vm0, %v5930_v6 }
0x39e9   :  { %5470 = vmatmul.mubr.msk.f32.vlgmr.msra.gmra.mrb[40].mxu1 %vm77_vm2, %v4370_v8  ;;  %5689 = vmatprep.subr.bf16.mxu0 %v5928_v3 }
0x39ea   :  { %5478 = vmatpush3.msra.mxu1 %v6725_v55  ;;  %5479 = vmatprep.mubr.msk.f32.mxu1 %vm5929_vm0, %v5930_v6 }
0x3aba   :  { %v4361_v10 = vpop.f32.mrb[40].mxu0 }
0x3abb   :  { %v5466_v16 = vpop.f32.mrb[41].mxu0 }
0x3abc   :  { %v4439_v11 = vpop.f32.mrb[40].mxu1 }
0x3abd   :  { %v4445_v33 = vrot.slane %v4439_v11, 7  ;;  %v5471_v13 = vpop.f32.mrb[41].mxu1 }
0x3abf   :  { %v4446_v52 = vsel %vm1678_vm5, %v4445_v33, %v4361_v10 }
0x3ac0   :  { %v4448_v15 = vsel %vm1681_vm6, %v4446_v52, -inf }
0x3ac1   :  { %4449 = vmax.xlane.f32.xlu1 %v4448_v15 }
0x3b4e   :  { %v4450_v17 = vpop.xlane.xlu1 %4449 }
0x3b4f   :  { %v4452_v9 = vrot.slane %v4450_v17, 1  ;;  %v4455_v18 = vsub.f32 %v4361_v10, %v4450_v17 }
0x3b51   :  { %v4456_v19 = vsub.f32 %v4439_v11, %v4452_v9  ;;  %v4457_v20 = vmul.f32 1.442695, %v4455_v18 }
0x3b53   :  { %v4459_v29 = vmul.f32 1.442695, %v4456_v19 }
0x3b55   :  { %5863 = vpow2.f32 %v4459_v29 }
0x3b56   :  { %5865 = vpow2.f32 %v4457_v20 }
0x3b5f   :  { %v5864_v55 = vpop.eup %5863 }
0x3b60   :  { %v4463_v14 = vrot.slane %v5864_v55, 7  ;;  %v5866_v23 = vpop.eup %5865 }
0x3b62   :  { %v4464_v39 = vsel %vm1678_vm5, %v4463_v14, %v5866_v23 }
0x3b63   :  { %v4466_v41 = vsel %vm1681_vm6, %v4464_v39, 0.0 }
0x3b64   :  { %4467 = vadd.xlane.f32.xlu0 %v4466_v41 }
0x3b7a   :  { %4627 = vrot.lane.b32.xlu0 %v4263_v37, %s5931_s18  ;;  %s5898_s18 = scalar_lea.vmem %s4713_s7, 192 }
0x3b7b   :  { %p5899_p10 = scmp.ne.s32.totalorder %s4713_s7, %s5898_s18  ;;  %p5904_p12 = scmp.lt.s32.totalorder %s5898_s18, %s5898_s18 }
0x3b7d   :  { %p5905_p13 = por %p5904_p12, %p5903_p11 }
0x3b7f   :  { %p5906_p0 = pnand %p5905_p13, %p5899_p10 }
0x3bf1   :  { %v4468_v24 = vpop.xlane.xlu0 %4467 }
0x3bf2   :  { %5867 = vrcp.f32 %v4468_v24 }
0x3bfc   :  { %v5868_v25 = vpop.eup %5867 }
0x3bfd   :  { %v4471_v60 = vrot.slane %v5868_v25, 1  ;;  %v4474_v26 = vmul.f32 %v5868_v25, %v5866_v23 }
0x3bff   :  { %5475 = vmatmul.mubr.msk.f32.vlgmr.msra.gmra.mrb[42].mxu0 %vm1710_vm7, %v4474_v26  ;;  %v4475_v27 = vmul.f32 %v5864_v55, %v4471_v60 }
0x3c00   :  { %5691 = vmatpush3.bf16.msra.mxu0 %v6406_v47  ;;  %5498 = vmatprep.mubr.msk.f32.mxu0 %vm5929_vm0, %v5930_v6  ;;  %v4628_v6 = vpop.permute.xlu0 %4627 }
0x3c01   :  { %5480 = vmatmul.mubr.msk.f32.vlgmr.msra.gmra.mrb[42].mxu1 %vm1710_vm7, %v4475_v27  ;;  %5692 = vmatprep.subr.bf16.mxu0 %v5928_v3 }
0x3c04   :  { %5694 = vmatpush3.bf16.msra.mxu0 %v6416_v56 }
0x3c05   :  { %5695 = vmatprep.subr.bf16.mxu0 %v5928_v3 }
0x3c08   :  { %5697 = vmatpush3.bf16.msra.mxu0 %v6433_v61 }
0x3c09   :  { %5698 = vmatprep.subr.bf16.mxu0 %v5928_v3 }
0x3c0c   :  { %5700 = vmatpush3.bf16.msra.mxu0 %v6445_v62 }
0x3cd2   :  { %v4545_v46 = vpop.f32.mrb[42].mxu0 }
0x3cd3   :  { %v5476_v50 = vpop.f32.mrb[43].mxu0 }
0x3cd4   :  { %v4618_v47 = vpop.f32.mrb[42].mxu1 }
0x3cd5   :  { %v4624_v28 = vrot.slane %v4618_v47, 7  ;;  %v5481_v63 = vpop.f32.mrb[43].mxu1 }
0x3cd7   :  { %v4625_v30 = vsel %vm1678_vm5, %v4624_v28, %v4545_v46 }
0x3cd8   :  { %v4630_v51 = vsel %vm77_vm2, %v4625_v30, %v4628_v6 }
0x3cd9   :  { %5499 = vmatmul.mubr.msk.f32.vlgmr.msra.gmra.mrb[44].mxu0 %vm1384_vm4, %v4630_v51 }
0x3dac   :  { %v4700_v56 = vpop.f32.mrb[44].mxu0 }
0x3dad   :  { %5869 = vtanh.f32 %v4700_v56  ;;  %v5500_v31 = vpop.f32.mrb[45].mxu0 }
0x3db7   :  { %v5870_v3 = vpop.eup %5869 }
0x3db8   :  { %4706 = vst.msk [vmem:[#allocation8 + $0xa] sm:$0x3] %vm1940_vm8, %v5870_v3 }
0x3db9   :  { %5909 = shalt.err (!%p5906_p0)
}
0x3dba   :  { %s5910_s22 = scalar_lea.hbm %s6848_s10, 192 }
0x3dbb   :  { %p5911_p1 = scmp.ne.s32.totalorder %s6848_s10, %s5910_s22  ;;  %p5914_p2 = scmp.lt.u32.totalorder %s5910_s22, %s6848_s10 }
0x3dbd   :  { %p5916_p3 = pnand %p5914_p2, %p5911_p1 }
0x3dbf   :  { %5919 = shalt.err (!%p5916_p3)
}
0x3dc0   :  { %s5935_s27 = smov 2  }
0x3dc1   :  { %4718 = dma.vmem_to_hbm [thread:$0]  %s4713_s7, 192, %s6848_s10, [#allocation4], %s5932_s5, %s5932_s5, %s5935_s27  }
0x3dc2   :  { %5924 = dma.done.wait [#allocation4], 192  }
0x3dc3   :  { %5925 = vsyncadd [#allocation4], 4294967104 }
0x3dc4   :  { %4722 = vsyncpa [#allocation4], 1 }
0x3dc5   :  { %4723 = vsyncpa [#allocation5], 1 }
0x3dc6   :  { %4724 = vsyncpa [#allocation7], 1 }

</bundles_post_ra>
